<compile_context>
chip_gen: v7x
topology: tpu7x:2x2x1
jax: 0.10.0
libtpu: 0.0.40
codegen_flags: <defaults>
</compile_context>

<pallas_src>
import numpy as np
import jax
import jax.numpy as jnp
from jax import lax
from jax.experimental import pallas as pl
from jax.experimental.pallas import tpu as pltpu  # noqa: F401  (TPU backend assumed)

# ------------------------- small synthetic config -------------------------
VOCAB = 256
HIDDEN = 128
INTERMEDIATE = 256
NUM_LAYERS = 2
NUM_HEADS = 4
HEAD_DIM = HIDDEN // NUM_HEADS          # 32
ACTION_DIM = 3
NUM_IMAGE_PATCHES = 12
NUM_ACTION_EMB = 4
NUM_SPATIO = NUM_IMAGE_PATCHES + NUM_ACTION_EMB   # 16 tokens / frame
NUM_TEMPORAL = 3                                   # num_frames
SEQ_LEN = (NUM_TEMPORAL - 1) * NUM_SPATIO          # 32
RMS_EPS = 1e-5
ROPE_THETA = 10000.0
NEG_INF = -1e30   # fp32 causal-mask fill


# ------------------------------ helpers ------------------------------
def _rmsnorm(x, w):
    var = jnp.mean(x * x, axis=-1, keepdims=True)
    return x * lax.rsqrt(var + RMS_EPS) * w


def _bf16(x):
    return x.astype(jnp.bfloat16)


# ------------------------------ Pallas kernels ------------------------------
def _fused_forward_kernel(ids_ref, tok_ref, a0_ref, a1_ref, a2_ref,
                          w1_ref, b1_ref, w2_ref, b2_ref, w3_ref, b3_ref,
                          sp_ref, tp_ref, cos2_ref, sin2_ref, rot2_ref, fln_ref,
                          ln1_ref, wqkv_ref, wo_ref, ln2_ref, wgu_ref, wd_ref,
                          out_ref):
    """Embedding combine + full Llama decoder stack + final norm in one invocation."""
    # ---------------- embedding combine (was a separate pallas_call) ----------------
    ids = ids_ref[...]                                    # (T, 1) int32
    img_mask = (ids > 0).astype(jnp.float32)              # image tokens (> 0)
    act_mask = (ids == -3).astype(jnp.float32)            # action slots (== -3)

    # V2 action projection MLP; first Linear(ACTION_DIM=3, H) as 3 broadcast FMAs.
    h0 = (b1_ref[...]
          + a0_ref[...] * w1_ref[0:1, :]
          + a1_ref[...] * w1_ref[1:2, :]
          + a2_ref[...] * w1_ref[2:3, :])
    h0 = jnp.maximum(h0, 0.0)                                                     # ReLU
    h1 = jnp.dot(_bf16(h0), w2_ref[...], preferred_element_type=jnp.float32) + b2_ref[...]
    h1 = jnp.maximum(h1, 0.0)                                                     # ReLU
    act_emb = jnp.dot(_bf16(h1), w3_ref[...], preferred_element_type=jnp.float32) + b3_ref[...]

    h = (img_mask * tok_ref[...] + act_mask * act_emb
         + sp_ref[...] + tp_ref[...])                     # (T, H) f32

    # ---------------- hoisted constants (built once, not per layer) ----------------
    t = h.shape[0]
    row = lax.broadcasted_iota(jnp.int32, (t, t), 0)
    col = lax.broadcasted_iota(jnp.int32, (t, t), 1)
    causal = row >= col
    lane = lax.broadcasted_iota(jnp.int32, (1, HIDDEN), 1)
    head_masks = [((lane >= hh * HEAD_DIM) & (lane < (hh + 1) * HEAD_DIM)).astype(jnp.float32)
                  for hh in range(NUM_HEADS)]
    cos2 = cos2_ref[...]                                  # (T, 2H) f32
    sin2 = sin2_ref[...]
    rot2 = rot2_ref[...]                                  # (2H, 2H) bf16 block-diag
    scale = 1.0 / (HEAD_DIM ** 0.5)

    # ---------------- decoder layers (unrolled; weights fully VMEM-resident) --------
    for l in range(NUM_LAYERS):
        # attention: RMSNorm -> QKV -> RoPE -> causal attention -> o_proj + residual
        xn = _rmsnorm(h, ln1_ref[l])
        qkv = jnp.dot(_bf16(xn), wqkv_ref[l], preferred_element_type=jnp.float32)  # (T, 3H)
        qk = qkv[:, :2 * HIDDEN]                          # 128-aligned slices only
        v = qkv[:, 2 * HIDDEN:]

        # rotate-half for q|k jointly via one +/-1 block-diagonal matmul (MXU).
        qk = qk * cos2 + jnp.dot(_bf16(qk), rot2, preferred_element_type=jnp.float32) * sin2
        q = qk[:, :HIDDEN]
        k = qk[:, HIDDEN:]
        q_bf = _bf16(q)

        # lane-dense multi-head attention: per-head lane masks on K (scores) and V
        # (output placement) — no 32-lane slices, no concatenate.
        attn = jnp.zeros((t, HIDDEN), jnp.float32)
        for hm in head_masks:
            s = lax.dot_general(q_bf, _bf16(k * hm), (((1,), (1,)), ((), ())),
                                preferred_element_type=jnp.float32) * scale       # (T, T)
            s = jnp.where(causal, s, NEG_INF)
            m = jnp.max(s, axis=-1, keepdims=True)
            p = jnp.exp(s - m)
            denom = jnp.sum(p, axis=-1, keepdims=True)
            p = p * pl.reciprocal(denom, approx=True)
            attn = attn + jnp.dot(_bf16(p), _bf16(v * hm),
                                  preferred_element_type=jnp.float32)             # (T, H)

        h = h + jnp.dot(_bf16(attn), wo_ref[l], preferred_element_type=jnp.float32)

        # MLP: RMSNorm -> fused gate_up SwiGLU -> down_proj + residual
        xn = _rmsnorm(h, ln2_ref[l])
        gu = jnp.dot(_bf16(xn), wgu_ref[l], preferred_element_type=jnp.float32)    # (T, 2I)
        g = gu[:, :INTERMEDIATE]
        u = gu[:, INTERMEDIATE:]
        h = h + jnp.dot(_bf16((g * jax.nn.sigmoid(g)) * u), wd_ref[l],
                        preferred_element_type=jnp.float32)

    out_ref[...] = _rmsnorm(h, fln_ref[...])              # final model norm


def _logits_kernel(h_ref, emb_ref, out_ref):
    # hidden @ embed_tokens.T (tied weights) without a runtime transpose; bf16 operands.
    out_ref[...] = lax.dot_general(_bf16(h_ref[...]), emb_ref[...],
                                   (((1,), (1,)), ((), ())),
                                   preferred_element_type=jnp.float32)


# ------------------------------ Pallas wrappers ------------------------------
def pallas_fused_forward(ids2d, tok_emb, a0, a1, a2, params, sp, tp, cos2, sin2):
    # Single invocation (no grid); every operand fits VMEM comfortably at this size.
    return pl.pallas_call(
        _fused_forward_kernel,
        out_shape=jax.ShapeDtypeStruct((ids2d.shape[0], HIDDEN), jnp.float32),
    )(ids2d, tok_emb, a0, a1, a2,
      params['act_w1'], params['act_b1'], params['act_w2'], params['act_b2'],
      params['act_w3'], params['act_b3'],
      sp, tp, cos2, sin2, params['rope_rot2'], params['final_ln'],
      params['ln1'], params['wqkv'], params['wo'],
      params['ln2'], params['wgu'], params['wd'])


def pallas_logits(hidden_states, embed_tokens_bf16):
    return pl.pallas_call(
        _logits_kernel,
        out_shape=jax.ShapeDtypeStruct((hidden_states.shape[0], embed_tokens_bf16.shape[0]),
                                       jnp.float32),
    )(hidden_states, embed_tokens_bf16)


# ------------------------------ model glue ------------------------------
def rope_tables(positions):
    inv_freq = 1.0 / (ROPE_THETA ** (jnp.arange(0, HEAD_DIM, 2, dtype=jnp.float32) / HEAD_DIM))
    freqs = positions.astype(jnp.float32)[:, None] * inv_freq[None, :]   # (T, hd/2)
    emb = jnp.concatenate([freqs, freqs], axis=-1)                       # (T, hd)
    return jnp.cos(emb), jnp.sin(emb)


def build_rope_rot2():
    """Block-diag R (2H,2H) such that (x @ R) == rotate_half(x) per head for q|k jointly."""
    half = HEAD_DIM // 2
    r = np.zeros((HEAD_DIM, HEAD_DIM), np.float32)
    for j in range(half):
        r[j + half, j] = -1.0        # out[:half]  = -x[half:]
        r[j, j + half] = 1.0         # out[half:]  =  x[:half]
    big = np.zeros((2 * HIDDEN, 2 * HIDDEN), np.float32)
    for hh in range(2 * NUM_HEADS):
        big[hh * HEAD_DIM:(hh + 1) * HEAD_DIM, hh * HEAD_DIM:(hh + 1) * HEAD_DIM] = r
    return jnp.asarray(big, dtype=jnp.bfloat16)           # +/-1 exact in bf16


@jax.jit
def forward(params, input_ids, positions, actions):
    """Mirrors LlamaActionV2ForCausalLM.forward (prefill path, no intermediate_tensors)."""
    is_act = (input_ids == -3)

    # plain-JAX gathers (glue); masking happens inside the fused kernel
    tok_emb = params['embed_tokens'][jnp.clip(input_ids, 0, VOCAB - 1)]          # (T, H)
    act_slot = jnp.clip(jnp.cumsum(is_act.astype(jnp.int32)) - 1, 0, actions.shape[0] - 1)
    act_feat = actions[act_slot].astype(jnp.float32)                             # (T, 3)
    sp = params['spatio_emb'][positions % NUM_SPATIO]
    tp = params['temporal_emb'][positions // NUM_SPATIO]
    ids2d = input_ids[:, None].astype(jnp.int32)

    cos, sin = rope_tables(positions)
    cos2 = jnp.tile(cos, (1, 2 * NUM_HEADS))              # (T, 2*HIDDEN) for q|k jointly
    sin2 = jnp.tile(sin, (1, 2 * NUM_HEADS))

    return pallas_fused_forward(ids2d, tok_emb,
                                act_feat[:, 0:1], act_feat[:, 1:2], act_feat[:, 2:3],
                                params, sp, tp, cos2, sin2)


@jax.jit
def compute_logits(params, hidden_states):
    # tie_word_embeddings: lm_head weight == embed_tokens (bf16 copy, no transpose)
    return pallas_logits(hidden_states, params['embed_tokens_bf16'])


# ------------------------------ parameter init ------------------------------
def init_params(key):
    def nrm(k, shape, scale=0.02, dtype=jnp.float32):
        return (scale * jax.random.normal(k, shape, dtype=jnp.float32)).astype(dtype)

    keys = iter(jax.random.split(key, 32))
    embed = nrm(next(keys), (VOCAB, HIDDEN))
    return {
        'embed_tokens': embed,                                   # f32 gather source
        'embed_tokens_bf16': embed.astype(jnp.bfloat16),         # bf16 lm_head (tied)
        'spatio_emb': nrm(next(keys), (NUM_SPATIO, HIDDEN)),
        'temporal_emb': nrm(next(keys), (NUM_TEMPORAL, HIDDEN)),
        # V2 action projection MLP: Linear(3,H) -> ReLU -> Linear(H,H) -> ReLU -> Linear(H,H)
        'act_w1': nrm(next(keys), (ACTION_DIM, HIDDEN)),                       # f32 (FMA path)
        'act_b1': nrm(next(keys), (1, HIDDEN)),
        'act_w2': nrm(next(keys), (HIDDEN, HIDDEN), dtype=jnp.bfloat16),
        'act_b2': nrm(next(keys), (1, HIDDEN)),
        'act_w3': nrm(next(keys), (HIDDEN, HIDDEN), dtype=jnp.bfloat16),
        'act_b3': nrm(next(keys), (1, HIDDEN)),
        'final_ln': jnp.ones((1, HIDDEN), jnp.float32),
        # stacked per-layer weights (leading layer axis; bf16 MXU operands)
        'ln1': jnp.ones((NUM_LAYERS, 1, HIDDEN), jnp.float32),
        'ln2': jnp.ones((NUM_LAYERS, 1, HIDDEN), jnp.float32),
        'wqkv': nrm(next(keys), (NUM_LAYERS, HIDDEN, 3 * HIDDEN), dtype=jnp.bfloat16),
        'wo': nrm(next(keys), (NUM_LAYERS, HIDDEN, HIDDEN), dtype=jnp.bfloat16),
        'wgu': nrm(next(keys), (NUM_LAYERS, HIDDEN, 2 * INTERMEDIATE), dtype=jnp.bfloat16),
        'wd': nrm(next(keys), (NUM_LAYERS, INTERMEDIATE, HIDDEN), dtype=jnp.bfloat16),
        'rope_rot2': build_rope_rot2(),
    }


# ------------------------------ main ------------------------------
if __name__ == "__main__":
    root = jax.random.PRNGKey(0)
    pkey, ikey = jax.random.split(root)
    params = init_params(pkey)

    # interleaved sequence: per frame, image tokens then -3 action tokens
    frame_keys = jax.random.split(ikey, NUM_TEMPORAL - 1)
    frames = []
    for f in range(NUM_TEMPORAL - 1):
        img = jax.random.randint(frame_keys[f], (NUM_IMAGE_PATCHES,), 1, VOCAB, dtype=jnp.int32)
        act = jnp.full((NUM_ACTION_EMB,), -3, dtype=jnp.int32)
        frames.append(jnp.concatenate([img, act]))
    input_ids = jnp.concatenate(frames)                         # (SEQ_LEN,)
    positions = jnp.arange(SEQ_LEN, dtype=jnp.int32)

    # deterministic actions (mirrors create_dummy_data): rows [0, 2i, 0.5i]
    i = jnp.arange(9, dtype=jnp.float32)
    base = jnp.stack([jnp.zeros(9, jnp.float32), 2.0 * i, 0.5 * i], axis=1)
    actions = jnp.concatenate([base[:NUM_ACTION_EMB]] * (NUM_TEMPORAL - 1), axis=0)  # (8, 3)

    hidden_states = forward(params, input_ids, positions, actions)
    logits = compute_logits(params, hidden_states)
    jax.block_until_ready((hidden_states, logits))

    assert hidden_states.shape == (SEQ_LEN, HIDDEN)
    assert logits.shape == (SEQ_LEN, VOCAB)
    assert bool(jnp.all(jnp.isfinite(hidden_states))) and bool(jnp.all(jnp.isfinite(logits)))
    print("KERNEL_OK")
</pallas_src>

<mosaic_0001>
module attributes {stable_mosaic.version = 11 : i64} {
  func.func @_fused_forward_kernel(%arg0: memref<32x1xi32, #tpu.memory_space<vmem>>, %arg1: memref<32x128xf32, #tpu.memory_space<vmem>>, %arg2: memref<32x1xf32, #tpu.memory_space<vmem>>, %arg3: memref<32x1xf32, #tpu.memory_space<vmem>>, %arg4: memref<32x1xf32, #tpu.memory_space<vmem>>, %arg5: memref<3x128xf32, #tpu.memory_space<vmem>>, %arg6: memref<1x128xf32, #tpu.memory_space<vmem>>, %arg7: memref<128x128xbf16, #tpu.memory_space<vmem>>, %arg8: memref<1x128xf32, #tpu.memory_space<vmem>>, %arg9: memref<128x128xbf16, #tpu.memory_space<vmem>>, %arg10: memref<1x128xf32, #tpu.memory_space<vmem>>, %arg11: memref<32x128xf32, #tpu.memory_space<vmem>>, %arg12: memref<32x128xf32, #tpu.memory_space<vmem>>, %arg13: memref<32x256xf32, #tpu.memory_space<vmem>>, %arg14: memref<32x256xf32, #tpu.memory_space<vmem>>, %arg15: memref<256x256xbf16, #tpu.memory_space<vmem>>, %arg16: memref<1x128xf32, #tpu.memory_space<vmem>>, %arg17: memref<2x1x128xf32, #tpu.memory_space<vmem>>, %arg18: memref<2x128x384xbf16, #tpu.memory_space<vmem>>, %arg19: memref<2x128x128xbf16, #tpu.memory_space<vmem>>, %arg20: memref<2x1x128xf32, #tpu.memory_space<vmem>>, %arg21: memref<2x128x512xbf16, #tpu.memory_space<vmem>>, %arg22: memref<2x256x128xbf16, #tpu.memory_space<vmem>>, %arg23: memref<32x128xf32, #tpu.memory_space<vmem>>) attributes {dimension_semantics = [], scalar_prefetch = 0 : i64, scratch_operands = 0 : i64, tpu.core_type = #tpu.core_type<tc>} {
    %c0 = arith.constant 0 : index
    %c0_0 = arith.constant 0 : index
    %0 = vector.load %arg0[%c0, %c0_0] : memref<32x1xi32, #tpu.memory_space<vmem>>, vector<32x1xi32>
    %c0_i32 = arith.constant 0 : i32
    %1 = vector.broadcast %c0_i32 : i32 to vector<32x1xi32>
    %2 = arith.cmpi sgt, %0, %1 : vector<32x1xi32>
    %3 = arith.extui %2 : vector<32x1xi1> to vector<32x1xi32>
    %4 = arith.sitofp %3 : vector<32x1xi32> to vector<32x1xf32>
    %c-3_i32 = arith.constant -3 : i32
    %5 = vector.broadcast %c-3_i32 : i32 to vector<32x1xi32>
    %6 = arith.cmpi eq, %0, %5 : vector<32x1xi32>
    %7 = arith.extui %6 : vector<32x1xi1> to vector<32x1xi32>
    %8 = arith.sitofp %7 : vector<32x1xi32> to vector<32x1xf32>
    %c0_1 = arith.constant 0 : index
    %c0_2 = arith.constant 0 : index
    %9 = vector.load %arg6[%c0_1, %c0_2] : memref<1x128xf32, #tpu.memory_space<vmem>>, vector<1x128xf32>
    %c0_3 = arith.constant 0 : index
    %c0_4 = arith.constant 0 : index
    %10 = vector.load %arg2[%c0_3, %c0_4] : memref<32x1xf32, #tpu.memory_space<vmem>>, vector<32x1xf32>
    %c0_5 = arith.constant 0 : index
    %c0_6 = arith.constant 0 : index
    %11 = vector.load %arg5[%c0_5, %c0_6] : memref<3x128xf32, #tpu.memory_space<vmem>>, vector<1x128xf32>
    %12 = vector.broadcast %10 : vector<32x1xf32> to vector<32x128xf32>
    %13 = vector.broadcast %11 : vector<1x128xf32> to vector<32x128xf32>
    %14 = arith.mulf %12, %13 : vector<32x128xf32>
    %15 = vector.broadcast %9 : vector<1x128xf32> to vector<32x128xf32>
    %16 = arith.addf %15, %14 : vector<32x128xf32>
    %c0_7 = arith.constant 0 : index
    %c0_8 = arith.constant 0 : index
    %17 = vector.load %arg3[%c0_7, %c0_8] : memref<32x1xf32, #tpu.memory_space<vmem>>, vector<32x1xf32>
    %c1 = arith.constant 1 : index
    %c0_9 = arith.constant 0 : index
    %18 = vector.load %arg5[%c1, %c0_9] : memref<3x128xf32, #tpu.memory_space<vmem>>, vector<1x128xf32>
    %19 = vector.broadcast %17 : vector<32x1xf32> to vector<32x128xf32>
    %20 = vector.broadcast %18 : vector<1x128xf32> to vector<32x128xf32>
    %21 = arith.mulf %19, %20 : vector<32x128xf32>
    %22 = arith.addf %16, %21 : vector<32x128xf32>
    %c0_10 = arith.constant 0 : index
    %c0_11 = arith.constant 0 : index
    %23 = vector.load %arg4[%c0_10, %c0_11] : memref<32x1xf32, #tpu.memory_space<vmem>>, vector<32x1xf32>
    %c2 = arith.constant 2 : index
    %c0_12 = arith.constant 0 : index
    %24 = vector.load %arg5[%c2, %c0_12] : memref<3x128xf32, #tpu.memory_space<vmem>>, vector<1x128xf32>
    %25 = vector.broadcast %23 : vector<32x1xf32> to vector<32x128xf32>
    %26 = vector.broadcast %24 : vector<1x128xf32> to vector<32x128xf32>
    %27 = arith.mulf %25, %26 : vector<32x128xf32>
    %28 = arith.addf %22, %27 : vector<32x128xf32>
    %cst = arith.constant 0.000000e+00 : f32
    %29 = vector.broadcast %cst : f32 to vector<32x128xf32>
    %30 = arith.maximumf %28, %29 : vector<32x128xf32>
    %31 = arith.truncf %30 : vector<32x128xf32> to vector<32x128xbf16>
    %c0_13 = arith.constant 0 : index
    %c0_14 = arith.constant 0 : index
    %32 = vector.load %arg7[%c0_13, %c0_14] : memref<128x128xbf16, #tpu.memory_space<vmem>>, vector<128x128xbf16>
    %cst_15 = arith.constant dense<0.000000e+00> : vector<32x128xf32>
    %33 = tpu.matmul %31, %32, %cst_15 {dimension_numbers = #tpu.dot_dimension_numbers<[1], [0], [0], [1], [0, 0, 1, 1], [], []>} : vector<32x128xbf16>, vector<128x128xbf16>, vector<32x128xf32> -> vector<32x128xf32>
    %c0_16 = arith.constant 0 : index
    %c0_17 = arith.constant 0 : index
    %34 = vector.load %arg8[%c0_16, %c0_17] : memref<1x128xf32, #tpu.memory_space<vmem>>, vector<1x128xf32>
    %35 = vector.broadcast %34 : vector<1x128xf32> to vector<32x128xf32>
    %36 = arith.addf %33, %35 : vector<32x128xf32>
    %cst_18 = arith.constant 0.000000e+00 : f32
    %37 = vector.broadcast %cst_18 : f32 to vector<32x128xf32>
    %38 = arith.maximumf %36, %37 : vector<32x128xf32>
    %39 = arith.truncf %38 : vector<32x128xf32> to vector<32x128xbf16>
    %c0_19 = arith.constant 0 : index
    %c0_20 = arith.constant 0 : index
    %40 = vector.load %arg9[%c0_19, %c0_20] : memref<128x128xbf16, #tpu.memory_space<vmem>>, vector<128x128xbf16>
    %cst_21 = arith.constant dense<0.000000e+00> : vector<32x128xf32>
    %41 = tpu.matmul %39, %40, %cst_21 {dimension_numbers = #tpu.dot_dimension_numbers<[1], [0], [0], [1], [0, 0, 1, 1], [], []>} : vector<32x128xbf16>, vector<128x128xbf16>, vector<32x128xf32> -> vector<32x128xf32>
    %c0_22 = arith.constant 0 : index
    %c0_23 = arith.constant 0 : index
    %42 = vector.load %arg10[%c0_22, %c0_23] : memref<1x128xf32, #tpu.memory_space<vmem>>, vector<1x128xf32>
    %43 = vector.broadcast %42 : vector<1x128xf32> to vector<32x128xf32>
    %44 = arith.addf %41, %43 : vector<32x128xf32>
    %c0_24 = arith.constant 0 : index
    %c0_25 = arith.constant 0 : index
    %45 = vector.load %arg1[%c0_24, %c0_25] : memref<32x128xf32, #tpu.memory_space<vmem>>, vector<32x128xf32>
    %46 = vector.broadcast %4 : vector<32x1xf32> to vector<32x128xf32>
    %47 = arith.mulf %46, %45 : vector<32x128xf32>
    %48 = vector.broadcast %8 : vector<32x1xf32> to vector<32x128xf32>
    %49 = arith.mulf %48, %44 : vector<32x128xf32>
    %50 = arith.addf %47, %49 : vector<32x128xf32>
    %c0_26 = arith.constant 0 : index
    %c0_27 = arith.constant 0 : index
    %51 = vector.load %arg11[%c0_26, %c0_27] : memref<32x128xf32, #tpu.memory_space<vmem>>, vector<32x128xf32>
    %52 = arith.addf %50, %51 : vector<32x128xf32>
    %c0_28 = arith.constant 0 : index
    %c0_29 = arith.constant 0 : index
    %53 = vector.load %arg12[%c0_28, %c0_29] : memref<32x128xf32, #tpu.memory_space<vmem>>, vector<32x128xf32>
    %54 = arith.addf %52, %53 : vector<32x128xf32>
    %55 = tpu.iota {dimensions = array<i32: 0>} : vector<32x32xi32>
    %56 = tpu.iota {dimensions = array<i32: 1>} : vector<32x32xi32>
    %57 = arith.cmpi sge, %55, %56 : vector<32x32xi32>
    %58 = tpu.iota {dimensions = array<i32: 1>} : vector<1x128xi32>
    %c0_i32_30 = arith.constant 0 : i32
    %59 = vector.broadcast %c0_i32_30 : i32 to vector<1x128xi32>
    %60 = arith.cmpi sge, %58, %59 : vector<1x128xi32>
    %c32_i32 = arith.constant 32 : i32
    %61 = vector.broadcast %c32_i32 : i32 to vector<1x128xi32>
    %62 = arith.cmpi slt, %58, %61 : vector<1x128xi32>
    %63 = arith.andi %60, %62 : vector<1x128xi1>
    %64 = arith.extui %63 : vector<1x128xi1> to vector<1x128xi32>
    %65 = arith.sitofp %64 : vector<1x128xi32> to vector<1x128xf32>
    %c32_i32_31 = arith.constant 32 : i32
    %66 = vector.broadcast %c32_i32_31 : i32 to vector<1x128xi32>
    %67 = arith.cmpi sge, %58, %66 : vector<1x128xi32>
    %c64_i32 = arith.constant 64 : i32
    %68 = vector.broadcast %c64_i32 : i32 to vector<1x128xi32>
    %69 = arith.cmpi slt, %58, %68 : vector<1x128xi32>
    %70 = arith.andi %67, %69 : vector<1x128xi1>
    %71 = arith.extui %70 : vector<1x128xi1> to vector<1x128xi32>
    %72 = arith.sitofp %71 : vector<1x128xi32> to vector<1x128xf32>
    %c64_i32_32 = arith.constant 64 : i32
    %73 = vector.broadcast %c64_i32_32 : i32 to vector<1x128xi32>
    %74 = arith.cmpi sge, %58, %73 : vector<1x128xi32>
    %c96_i32 = arith.constant 96 : i32
    %75 = vector.broadcast %c96_i32 : i32 to vector<1x128xi32>
    %76 = arith.cmpi slt, %58, %75 : vector<1x128xi32>
    %77 = arith.andi %74, %76 : vector<1x128xi1>
    %78 = arith.extui %77 : vector<1x128xi1> to vector<1x128xi32>
    %79 = arith.sitofp %78 : vector<1x128xi32> to vector<1x128xf32>
    %c96_i32_33 = arith.constant 96 : i32
    %80 = vector.broadcast %c96_i32_33 : i32 to vector<1x128xi32>
    %81 = arith.cmpi sge, %58, %80 : vector<1x128xi32>
    %c128_i32 = arith.constant 128 : i32
    %82 = vector.broadcast %c128_i32 : i32 to vector<1x128xi32>
    %83 = arith.cmpi slt, %58, %82 : vector<1x128xi32>
    %84 = arith.andi %81, %83 : vector<1x128xi1>
    %85 = arith.extui %84 : vector<1x128xi1> to vector<1x128xi32>
    %86 = arith.sitofp %85 : vector<1x128xi32> to vector<1x128xf32>
    %c0_34 = arith.constant 0 : index
    %c0_35 = arith.constant 0 : index
    %87 = vector.load %arg13[%c0_34, %c0_35] : memref<32x256xf32, #tpu.memory_space<vmem>>, vector<32x256xf32>
    %c0_36 = arith.constant 0 : index
    %c0_37 = arith.constant 0 : index
    %88 = vector.load %arg14[%c0_36, %c0_37] : memref<32x256xf32, #tpu.memory_space<vmem>>, vector<32x256xf32>
    %c0_38 = arith.constant 0 : index
    %c0_39 = arith.constant 0 : index
    %89 = vector.load %arg15[%c0_38, %c0_39] : memref<256x256xbf16, #tpu.memory_space<vmem>>, vector<256x256xbf16>
    %c0_40 = arith.constant 0 : index
    %c0_41 = arith.constant 0 : index
    %c0_42 = arith.constant 0 : index
    %90 = vector.load %arg17[%c0_40, %c0_41, %c0_42] : memref<2x1x128xf32, #tpu.memory_space<vmem>>, vector<1x1x128xf32>
    %91 = vector.shape_cast %90 : vector<1x1x128xf32> to vector<1x128xf32>
    %92 = arith.mulf %54, %54 : vector<32x128xf32>
    %cst_43 = arith.constant dense<0.000000e+00> : vector<32xf32>
    %93 = vector.multi_reduction <add>, %92, %cst_43 [1] : vector<32x128xf32> to vector<32xf32>
    %94 = vector.shape_cast %93 : vector<32xf32> to vector<32x1xf32>
    %cst_44 = arith.constant 1.280000e+02 : f32
    %95 = vector.broadcast %cst_44 : f32 to vector<32x1xf32>
    %96 = arith.divf %94, %95 : vector<32x1xf32>
    %cst_45 = arith.constant 9.99999974E-6 : f32
    %97 = vector.broadcast %cst_45 : f32 to vector<32x1xf32>
    %98 = arith.addf %96, %97 : vector<32x1xf32>
    %99 = math.rsqrt %98 : vector<32x1xf32>
    %100 = vector.broadcast %99 : vector<32x1xf32> to vector<32x128xf32>
    %101 = arith.mulf %54, %100 : vector<32x128xf32>
    %102 = vector.broadcast %91 : vector<1x128xf32> to vector<32x128xf32>
    %103 = arith.mulf %101, %102 : vector<32x128xf32>
    %104 = arith.truncf %103 : vector<32x128xf32> to vector<32x128xbf16>
    %c0_46 = arith.constant 0 : index
    %c0_47 = arith.constant 0 : index
    %c0_48 = arith.constant 0 : index
    %105 = vector.load %arg18[%c0_46, %c0_47, %c0_48] : memref<2x128x384xbf16, #tpu.memory_space<vmem>>, vector<1x128x384xbf16>
    %106 = vector.shape_cast %105 : vector<1x128x384xbf16> to vector<128x384xbf16>
    %cst_49 = arith.constant dense<0.000000e+00> : vector<32x384xf32>
    %107 = tpu.matmul %104, %106, %cst_49 {dimension_numbers = #tpu.dot_dimension_numbers<[1], [0], [0], [1], [0, 0, 1, 1], [], []>} : vector<32x128xbf16>, vector<128x384xbf16>, vector<32x384xf32> -> vector<32x384xf32>
    %108 = vector.extract_strided_slice %107 {offsets = [0, 0], sizes = [32, 256], strides = [1, 1]} : vector<32x384xf32> to vector<32x256xf32>
    %109 = vector.extract_strided_slice %107 {offsets = [0, 256], sizes = [32, 128], strides = [1, 1]} : vector<32x384xf32> to vector<32x128xf32>
    %110 = arith.mulf %108, %87 : vector<32x256xf32>
    %111 = arith.truncf %108 : vector<32x256xf32> to vector<32x256xbf16>
    %cst_50 = arith.constant dense<0.000000e+00> : vector<32x256xf32>
    %112 = tpu.matmul %111, %89, %cst_50 {dimension_numbers = #tpu.dot_dimension_numbers<[1], [0], [0], [1], [0, 0, 1, 1], [], []>} : vector<32x256xbf16>, vector<256x256xbf16>, vector<32x256xf32> -> vector<32x256xf32>
    %113 = arith.mulf %112, %88 : vector<32x256xf32>
    %114 = arith.addf %110, %113 : vector<32x256xf32>
    %115 = vector.extract_strided_slice %114 {offsets = [0, 0], sizes = [32, 128], strides = [1, 1]} : vector<32x256xf32> to vector<32x128xf32>
    %116 = vector.extract_strided_slice %114 {offsets = [0, 128], sizes = [32, 128], strides = [1, 1]} : vector<32x256xf32> to vector<32x128xf32>
    %117 = arith.truncf %115 : vector<32x128xf32> to vector<32x128xbf16>
    %cst_51 = arith.constant 0.000000e+00 : f32
    %118 = vector.broadcast %cst_51 : f32 to vector<32x128xf32>
    %119 = vector.broadcast %65 : vector<1x128xf32> to vector<32x128xf32>
    %120 = arith.mulf %116, %119 : vector<32x128xf32>
    %121 = arith.truncf %120 : vector<32x128xf32> to vector<32x128xbf16>
    %cst_52 = arith.constant dense<0.000000e+00> : vector<32x32xf32>
    %122 = tpu.matmul %117, %121, %cst_52 {dimension_numbers = #tpu.dot_dimension_numbers<[1], [1], [0], [0], [0, 0, 1, 0], [], []>} : vector<32x128xbf16>, vector<32x128xbf16>, vector<32x32xf32> -> vector<32x32xf32>
    %cst_53 = arith.constant 0.176776692 : f32
    %123 = vector.broadcast %cst_53 : f32 to vector<32x32xf32>
    %124 = arith.mulf %122, %123 : vector<32x32xf32>
    %cst_54 = arith.constant -1.000000e+30 : f32
    %125 = vector.broadcast %cst_54 : f32 to vector<32x32xf32>
    %126 = arith.select %57, %124, %125 : vector<32x32xi1>, vector<32x32xf32>
    %cst_55 = arith.constant dense<0xFF800000> : vector<32xf32>
    %127 = vector.multi_reduction <maximumf>, %126, %cst_55 [1] : vector<32x32xf32> to vector<32xf32>
    %128 = vector.shape_cast %127 : vector<32xf32> to vector<32x1xf32>
    %129 = vector.broadcast %128 : vector<32x1xf32> to vector<32x32xf32>
    %130 = arith.subf %126, %129 : vector<32x32xf32>
    %131 = math.exp %130 : vector<32x32xf32>
    %cst_56 = arith.constant dense<0.000000e+00> : vector<32xf32>
    %132 = vector.multi_reduction <add>, %131, %cst_56 [1] : vector<32x32xf32> to vector<32xf32>
    %133 = vector.shape_cast %132 : vector<32xf32> to vector<32x1xf32>
    %134 = tpu.reciprocal %133 {approx = true} : vector<32x1xf32> -> vector<32x1xf32>
    %135 = vector.broadcast %134 : vector<32x1xf32> to vector<32x32xf32>
    %136 = arith.mulf %131, %135 : vector<32x32xf32>
    %137 = arith.truncf %136 : vector<32x32xf32> to vector<32x32xbf16>
    %138 = vector.broadcast %65 : vector<1x128xf32> to vector<32x128xf32>
    %139 = arith.mulf %109, %138 : vector<32x128xf32>
    %140 = arith.truncf %139 : vector<32x128xf32> to vector<32x128xbf16>
    %cst_57 = arith.constant dense<0.000000e+00> : vector<32x128xf32>
    %141 = tpu.matmul %137, %140, %cst_57 {dimension_numbers = #tpu.dot_dimension_numbers<[1], [0], [0], [1], [0, 0, 1, 1], [], []>} : vector<32x32xbf16>, vector<32x128xbf16>, vector<32x128xf32> -> vector<32x128xf32>
    %142 = arith.addf %118, %141 : vector<32x128xf32>
    %143 = vector.broadcast %72 : vector<1x128xf32> to vector<32x128xf32>
    %144 = arith.mulf %116, %143 : vector<32x128xf32>
    %145 = arith.truncf %144 : vector<32x128xf32> to vector<32x128xbf16>
    %cst_58 = arith.constant dense<0.000000e+00> : vector<32x32xf32>
    %146 = tpu.matmul %117, %145, %cst_58 {dimension_numbers = #tpu.dot_dimension_numbers<[1], [1], [0], [0], [0, 0, 1, 0], [], []>} : vector<32x128xbf16>, vector<32x128xbf16>, vector<32x32xf32> -> vector<32x32xf32>
    %cst_59 = arith.constant 0.176776692 : f32
    %147 = vector.broadcast %cst_59 : f32 to vector<32x32xf32>
    %148 = arith.mulf %146, %147 : vector<32x32xf32>
    %cst_60 = arith.constant -1.000000e+30 : f32
    %149 = vector.broadcast %cst_60 : f32 to vector<32x32xf32>
    %150 = arith.select %57, %148, %149 : vector<32x32xi1>, vector<32x32xf32>
    %cst_61 = arith.constant dense<0xFF800000> : vector<32xf32>
    %151 = vector.multi_reduction <maximumf>, %150, %cst_61 [1] : vector<32x32xf32> to vector<32xf32>
    %152 = vector.shape_cast %151 : vector<32xf32> to vector<32x1xf32>
    %153 = vector.broadcast %152 : vector<32x1xf32> to vector<32x32xf32>
    %154 = arith.subf %150, %153 : vector<32x32xf32>
    %155 = math.exp %154 : vector<32x32xf32>
    %cst_62 = arith.constant dense<0.000000e+00> : vector<32xf32>
    %156 = vector.multi_reduction <add>, %155, %cst_62 [1] : vector<32x32xf32> to vector<32xf32>
    %157 = vector.shape_cast %156 : vector<32xf32> to vector<32x1xf32>
    %158 = tpu.reciprocal %157 {approx = true} : vector<32x1xf32> -> vector<32x1xf32>
    %159 = vector.broadcast %158 : vector<32x1xf32> to vector<32x32xf32>
    %160 = arith.mulf %155, %159 : vector<32x32xf32>
    %161 = arith.truncf %160 : vector<32x32xf32> to vector<32x32xbf16>
    %162 = vector.broadcast %72 : vector<1x128xf32> to vector<32x128xf32>
    %163 = arith.mulf %109, %162 : vector<32x128xf32>
    %164 = arith.truncf %163 : vector<32x128xf32> to vector<32x128xbf16>
    %cst_63 = arith.constant dense<0.000000e+00> : vector<32x128xf32>
    %165 = tpu.matmul %161, %164, %cst_63 {dimension_numbers = #tpu.dot_dimension_numbers<[1], [0], [0], [1], [0, 0, 1, 1], [], []>} : vector<32x32xbf16>, vector<32x128xbf16>, vector<32x128xf32> -> vector<32x128xf32>
    %166 = arith.addf %142, %165 : vector<32x128xf32>
    %167 = vector.broadcast %79 : vector<1x128xf32> to vector<32x128xf32>
    %168 = arith.mulf %116, %167 : vector<32x128xf32>
    %169 = arith.truncf %168 : vector<32x128xf32> to vector<32x128xbf16>
    %cst_64 = arith.constant dense<0.000000e+00> : vector<32x32xf32>
    %170 = tpu.matmul %117, %169, %cst_64 {dimension_numbers = #tpu.dot_dimension_numbers<[1], [1], [0], [0], [0, 0, 1, 0], [], []>} : vector<32x128xbf16>, vector<32x128xbf16>, vector<32x32xf32> -> vector<32x32xf32>
    %cst_65 = arith.constant 0.176776692 : f32
    %171 = vector.broadcast %cst_65 : f32 to vector<32x32xf32>
    %172 = arith.mulf %170, %171 : vector<32x32xf32>
    %cst_66 = arith.constant -1.000000e+30 : f32
    %173 = vector.broadcast %cst_66 : f32 to vector<32x32xf32>
    %174 = arith.select %57, %172, %173 : vector<32x32xi1>, vector<32x32xf32>
    %cst_67 = arith.constant dense<0xFF800000> : vector<32xf32>
    %175 = vector.multi_reduction <maximumf>, %174, %cst_67 [1] : vector<32x32xf32> to vector<32xf32>
    %176 = vector.shape_cast %175 : vector<32xf32> to vector<32x1xf32>
    %177 = vector.broadcast %176 : vector<32x1xf32> to vector<32x32xf32>
    %178 = arith.subf %174, %177 : vector<32x32xf32>
    %179 = math.exp %178 : vector<32x32xf32>
    %cst_68 = arith.constant dense<0.000000e+00> : vector<32xf32>
    %180 = vector.multi_reduction <add>, %179, %cst_68 [1] : vector<32x32xf32> to vector<32xf32>
    %181 = vector.shape_cast %180 : vector<32xf32> to vector<32x1xf32>
    %182 = tpu.reciprocal %181 {approx = true} : vector<32x1xf32> -> vector<32x1xf32>
    %183 = vector.broadcast %182 : vector<32x1xf32> to vector<32x32xf32>
    %184 = arith.mulf %179, %183 : vector<32x32xf32>
    %185 = arith.truncf %184 : vector<32x32xf32> to vector<32x32xbf16>
    %186 = vector.broadcast %79 : vector<1x128xf32> to vector<32x128xf32>
    %187 = arith.mulf %109, %186 : vector<32x128xf32>
    %188 = arith.truncf %187 : vector<32x128xf32> to vector<32x128xbf16>
    %cst_69 = arith.constant dense<0.000000e+00> : vector<32x128xf32>
    %189 = tpu.matmul %185, %188, %cst_69 {dimension_numbers = #tpu.dot_dimension_numbers<[1], [0], [0], [1], [0, 0, 1, 1], [], []>} : vector<32x32xbf16>, vector<32x128xbf16>, vector<32x128xf32> -> vector<32x128xf32>
    %190 = arith.addf %166, %189 : vector<32x128xf32>
    %191 = vector.broadcast %86 : vector<1x128xf32> to vector<32x128xf32>
    %192 = arith.mulf %116, %191 : vector<32x128xf32>
    %193 = arith.truncf %192 : vector<32x128xf32> to vector<32x128xbf16>
    %cst_70 = arith.constant dense<0.000000e+00> : vector<32x32xf32>
    %194 = tpu.matmul %117, %193, %cst_70 {dimension_numbers = #tpu.dot_dimension_numbers<[1], [1], [0], [0], [0, 0, 1, 0], [], []>} : vector<32x128xbf16>, vector<32x128xbf16>, vector<32x32xf32> -> vector<32x32xf32>
    %cst_71 = arith.constant 0.176776692 : f32
    %195 = vector.broadcast %cst_71 : f32 to vector<32x32xf32>
    %196 = arith.mulf %194, %195 : vector<32x32xf32>
    %cst_72 = arith.constant -1.000000e+30 : f32
    %197 = vector.broadcast %cst_72 : f32 to vector<32x32xf32>
    %198 = arith.select %57, %196, %197 : vector<32x32xi1>, vector<32x32xf32>
    %cst_73 = arith.constant dense<0xFF800000> : vector<32xf32>
    %199 = vector.multi_reduction <maximumf>, %198, %cst_73 [1] : vector<32x32xf32> to vector<32xf32>
    %200 = vector.shape_cast %199 : vector<32xf32> to vector<32x1xf32>
    %201 = vector.broadcast %200 : vector<32x1xf32> to vector<32x32xf32>
    %202 = arith.subf %198, %201 : vector<32x32xf32>
    %203 = math.exp %202 : vector<32x32xf32>
    %cst_74 = arith.constant dense<0.000000e+00> : vector<32xf32>
    %204 = vector.multi_reduction <add>, %203, %cst_74 [1] : vector<32x32xf32> to vector<32xf32>
    %205 = vector.shape_cast %204 : vector<32xf32> to vector<32x1xf32>
    %206 = tpu.reciprocal %205 {approx = true} : vector<32x1xf32> -> vector<32x1xf32>
    %207 = vector.broadcast %206 : vector<32x1xf32> to vector<32x32xf32>
    %208 = arith.mulf %203, %207 : vector<32x32xf32>
    %209 = arith.truncf %208 : vector<32x32xf32> to vector<32x32xbf16>
    %210 = vector.broadcast %86 : vector<1x128xf32> to vector<32x128xf32>
    %211 = arith.mulf %109, %210 : vector<32x128xf32>
    %212 = arith.truncf %211 : vector<32x128xf32> to vector<32x128xbf16>
    %cst_75 = arith.constant dense<0.000000e+00> : vector<32x128xf32>
    %213 = tpu.matmul %209, %212, %cst_75 {dimension_numbers = #tpu.dot_dimension_numbers<[1], [0], [0], [1], [0, 0, 1, 1], [], []>} : vector<32x32xbf16>, vector<32x128xbf16>, vector<32x128xf32> -> vector<32x128xf32>
    %214 = arith.addf %190, %213 : vector<32x128xf32>
    %215 = arith.truncf %214 : vector<32x128xf32> to vector<32x128xbf16>
    %c0_76 = arith.constant 0 : index
    %c0_77 = arith.constant 0 : index
    %c0_78 = arith.constant 0 : index
    %216 = vector.load %arg19[%c0_76, %c0_77, %c0_78] : memref<2x128x128xbf16, #tpu.memory_space<vmem>>, vector<1x128x128xbf16>
    %217 = vector.shape_cast %216 : vector<1x128x128xbf16> to vector<128x128xbf16>
    %cst_79 = arith.constant dense<0.000000e+00> : vector<32x128xf32>
    %218 = tpu.matmul %215, %217, %cst_79 {dimension_numbers = #tpu.dot_dimension_numbers<[1], [0], [0], [1], [0, 0, 1, 1], [], []>} : vector<32x128xbf16>, vector<128x128xbf16>, vector<32x128xf32> -> vector<32x128xf32>
    %219 = arith.addf %54, %218 : vector<32x128xf32>
    %c0_80 = arith.constant 0 : index
    %c0_81 = arith.constant 0 : index
    %c0_82 = arith.constant 0 : index
    %220 = vector.load %arg20[%c0_80, %c0_81, %c0_82] : memref<2x1x128xf32, #tpu.memory_space<vmem>>, vector<1x1x128xf32>
    %221 = vector.shape_cast %220 : vector<1x1x128xf32> to vector<1x128xf32>
    %222 = arith.mulf %219, %219 : vector<32x128xf32>
    %cst_83 = arith.constant dense<0.000000e+00> : vector<32xf32>
    %223 = vector.multi_reduction <add>, %222, %cst_83 [1] : vector<32x128xf32> to vector<32xf32>
    %224 = vector.shape_cast %223 : vector<32xf32> to vector<32x1xf32>
    %cst_84 = arith.constant 1.280000e+02 : f32
    %225 = vector.broadcast %cst_84 : f32 to vector<32x1xf32>
    %226 = arith.divf %224, %225 : vector<32x1xf32>
    %cst_85 = arith.constant 9.99999974E-6 : f32
    %227 = vector.broadcast %cst_85 : f32 to vector<32x1xf32>
    %228 = arith.addf %226, %227 : vector<32x1xf32>
    %229 = math.rsqrt %228 : vector<32x1xf32>
    %230 = vector.broadcast %229 : vector<32x1xf32> to vector<32x128xf32>
    %231 = arith.mulf %219, %230 : vector<32x128xf32>
    %232 = vector.broadcast %221 : vector<1x128xf32> to vector<32x128xf32>
    %233 = arith.mulf %231, %232 : vector<32x128xf32>
    %234 = arith.truncf %233 : vector<32x128xf32> to vector<32x128xbf16>
    %c0_86 = arith.constant 0 : index
    %c0_87 = arith.constant 0 : index
    %c0_88 = arith.constant 0 : index
    %235 = vector.load %arg21[%c0_86, %c0_87, %c0_88] : memref<2x128x512xbf16, #tpu.memory_space<vmem>>, vector<1x128x512xbf16>
    %236 = vector.shape_cast %235 : vector<1x128x512xbf16> to vector<128x512xbf16>
    %cst_89 = arith.constant dense<0.000000e+00> : vector<32x512xf32>
    %237 = tpu.matmul %234, %236, %cst_89 {dimension_numbers = #tpu.dot_dimension_numbers<[1], [0], [0], [1], [0, 0, 1, 1], [], []>} : vector<32x128xbf16>, vector<128x512xbf16>, vector<32x512xf32> -> vector<32x512xf32>
    %238 = vector.extract_strided_slice %237 {offsets = [0, 0], sizes = [32, 256], strides = [1, 1]} : vector<32x512xf32> to vector<32x256xf32>
    %239 = vector.extract_strided_slice %237 {offsets = [0, 256], sizes = [32, 256], strides = [1, 1]} : vector<32x512xf32> to vector<32x256xf32>
    %240 = arith.negf %238 : vector<32x256xf32>
    %241 = math.exp %240 : vector<32x256xf32>
    %cst_90 = arith.constant 1.000000e+00 : f32
    %242 = vector.broadcast %cst_90 : f32 to vector<32x256xf32>
    %243 = arith.addf %242, %241 : vector<32x256xf32>
    %244 = arith.divf %242, %243 : vector<32x256xf32>
    %245 = arith.mulf %238, %244 : vector<32x256xf32>
    %246 = arith.mulf %245, %239 : vector<32x256xf32>
    %247 = arith.truncf %246 : vector<32x256xf32> to vector<32x256xbf16>
    %c0_91 = arith.constant 0 : index
    %c0_92 = arith.constant 0 : index
    %c0_93 = arith.constant 0 : index
    %248 = vector.load %arg22[%c0_91, %c0_92, %c0_93] : memref<2x256x128xbf16, #tpu.memory_space<vmem>>, vector<1x256x128xbf16>
    %249 = vector.shape_cast %248 : vector<1x256x128xbf16> to vector<256x128xbf16>
    %cst_94 = arith.constant dense<0.000000e+00> : vector<32x128xf32>
    %250 = tpu.matmul %247, %249, %cst_94 {dimension_numbers = #tpu.dot_dimension_numbers<[1], [0], [0], [1], [0, 0, 1, 1], [], []>} : vector<32x256xbf16>, vector<256x128xbf16>, vector<32x128xf32> -> vector<32x128xf32>
    %251 = arith.addf %219, %250 : vector<32x128xf32>
    %c1_95 = arith.constant 1 : index
    %c0_96 = arith.constant 0 : index
    %c0_97 = arith.constant 0 : index
    %252 = vector.load %arg17[%c1_95, %c0_96, %c0_97] : memref<2x1x128xf32, #tpu.memory_space<vmem>>, vector<1x1x128xf32>
    %253 = vector.shape_cast %252 : vector<1x1x128xf32> to vector<1x128xf32>
    %254 = arith.mulf %251, %251 : vector<32x128xf32>
    %cst_98 = arith.constant dense<0.000000e+00> : vector<32xf32>
    %255 = vector.multi_reduction <add>, %254, %cst_98 [1] : vector<32x128xf32> to vector<32xf32>
    %256 = vector.shape_cast %255 : vector<32xf32> to vector<32x1xf32>
    %cst_99 = arith.constant 1.280000e+02 : f32
    %257 = vector.broadcast %cst_99 : f32 to vector<32x1xf32>
    %258 = arith.divf %256, %257 : vector<32x1xf32>
    %cst_100 = arith.constant 9.99999974E-6 : f32
    %259 = vector.broadcast %cst_100 : f32 to vector<32x1xf32>
    %260 = arith.addf %258, %259 : vector<32x1xf32>
    %261 = math.rsqrt %260 : vector<32x1xf32>
    %262 = vector.broadcast %261 : vector<32x1xf32> to vector<32x128xf32>
    %263 = arith.mulf %251, %262 : vector<32x128xf32>
    %264 = vector.broadcast %253 : vector<1x128xf32> to vector<32x128xf32>
    %265 = arith.mulf %263, %264 : vector<32x128xf32>
    %266 = arith.truncf %265 : vector<32x128xf32> to vector<32x128xbf16>
    %c1_101 = arith.constant 1 : index
    %c0_102 = arith.constant 0 : index
    %c0_103 = arith.constant 0 : index
    %267 = vector.load %arg18[%c1_101, %c0_102, %c0_103] : memref<2x128x384xbf16, #tpu.memory_space<vmem>>, vector<1x128x384xbf16>
    %268 = vector.shape_cast %267 : vector<1x128x384xbf16> to vector<128x384xbf16>
    %cst_104 = arith.constant dense<0.000000e+00> : vector<32x384xf32>
    %269 = tpu.matmul %266, %268, %cst_104 {dimension_numbers = #tpu.dot_dimension_numbers<[1], [0], [0], [1], [0, 0, 1, 1], [], []>} : vector<32x128xbf16>, vector<128x384xbf16>, vector<32x384xf32> -> vector<32x384xf32>
    %270 = vector.extract_strided_slice %269 {offsets = [0, 0], sizes = [32, 256], strides = [1, 1]} : vector<32x384xf32> to vector<32x256xf32>
    %271 = vector.extract_strided_slice %269 {offsets = [0, 256], sizes = [32, 128], strides = [1, 1]} : vector<32x384xf32> to vector<32x128xf32>
    %272 = arith.mulf %270, %87 : vector<32x256xf32>
    %273 = arith.truncf %270 : vector<32x256xf32> to vector<32x256xbf16>
    %cst_105 = arith.constant dense<0.000000e+00> : vector<32x256xf32>
    %274 = tpu.matmul %273, %89, %cst_105 {dimension_numbers = #tpu.dot_dimension_numbers<[1], [0], [0], [1], [0, 0, 1, 1], [], []>} : vector<32x256xbf16>, vector<256x256xbf16>, vector<32x256xf32> -> vector<32x256xf32>
    %275 = arith.mulf %274, %88 : vector<32x256xf32>
    %276 = arith.addf %272, %275 : vector<32x256xf32>
    %277 = vector.extract_strided_slice %276 {offsets = [0, 0], sizes = [32, 128], strides = [1, 1]} : vector<32x256xf32> to vector<32x128xf32>
    %278 = vector.extract_strided_slice %276 {offsets = [0, 128], sizes = [32, 128], strides = [1, 1]} : vector<32x256xf32> to vector<32x128xf32>
    %279 = arith.truncf %277 : vector<32x128xf32> to vector<32x128xbf16>
    %cst_106 = arith.constant 0.000000e+00 : f32
    %280 = vector.broadcast %cst_106 : f32 to vector<32x128xf32>
    %281 = vector.broadcast %65 : vector<1x128xf32> to vector<32x128xf32>
    %282 = arith.mulf %278, %281 : vector<32x128xf32>
    %283 = arith.truncf %282 : vector<32x128xf32> to vector<32x128xbf16>
    %cst_107 = arith.constant dense<0.000000e+00> : vector<32x32xf32>
    %284 = tpu.matmul %279, %283, %cst_107 {dimension_numbers = #tpu.dot_dimension_numbers<[1], [1], [0], [0], [0, 0, 1, 0], [], []>} : vector<32x128xbf16>, vector<32x128xbf16>, vector<32x32xf32> -> vector<32x32xf32>
    %cst_108 = arith.constant 0.176776692 : f32
    %285 = vector.broadcast %cst_108 : f32 to vector<32x32xf32>
    %286 = arith.mulf %284, %285 : vector<32x32xf32>
    %cst_109 = arith.constant -1.000000e+30 : f32
    %287 = vector.broadcast %cst_109 : f32 to vector<32x32xf32>
    %288 = arith.select %57, %286, %287 : vector<32x32xi1>, vector<32x32xf32>
    %cst_110 = arith.constant dense<0xFF800000> : vector<32xf32>
    %289 = vector.multi_reduction <maximumf>, %288, %cst_110 [1] : vector<32x32xf32> to vector<32xf32>
    %290 = vector.shape_cast %289 : vector<32xf32> to vector<32x1xf32>
    %291 = vector.broadcast %290 : vector<32x1xf32> to vector<32x32xf32>
    %292 = arith.subf %288, %291 : vector<32x32xf32>
    %293 = math.exp %292 : vector<32x32xf32>
    %cst_111 = arith.constant dense<0.000000e+00> : vector<32xf32>
    %294 = vector.multi_reduction <add>, %293, %cst_111 [1] : vector<32x32xf32> to vector<32xf32>
    %295 = vector.shape_cast %294 : vector<32xf32> to vector<32x1xf32>
    %296 = tpu.reciprocal %295 {approx = true} : vector<32x1xf32> -> vector<32x1xf32>
    %297 = vector.broadcast %296 : vector<32x1xf32> to vector<32x32xf32>
    %298 = arith.mulf %293, %297 : vector<32x32xf32>
    %299 = arith.truncf %298 : vector<32x32xf32> to vector<32x32xbf16>
    %300 = vector.broadcast %65 : vector<1x128xf32> to vector<32x128xf32>
    %301 = arith.mulf %271, %300 : vector<32x128xf32>
    %302 = arith.truncf %301 : vector<32x128xf32> to vector<32x128xbf16>
    %cst_112 = arith.constant dense<0.000000e+00> : vector<32x128xf32>
    %303 = tpu.matmul %299, %302, %cst_112 {dimension_numbers = #tpu.dot_dimension_numbers<[1], [0], [0], [1], [0, 0, 1, 1], [], []>} : vector<32x32xbf16>, vector<32x128xbf16>, vector<32x128xf32> -> vector<32x128xf32>
    %304 = arith.addf %280, %303 : vector<32x128xf32>
    %305 = vector.broadcast %72 : vector<1x128xf32> to vector<32x128xf32>
    %306 = arith.mulf %278, %305 : vector<32x128xf32>
    %307 = arith.truncf %306 : vector<32x128xf32> to vector<32x128xbf16>
    %cst_113 = arith.constant dense<0.000000e+00> : vector<32x32xf32>
    %308 = tpu.matmul %279, %307, %cst_113 {dimension_numbers = #tpu.dot_dimension_numbers<[1], [1], [0], [0], [0, 0, 1, 0], [], []>} : vector<32x128xbf16>, vector<32x128xbf16>, vector<32x32xf32> -> vector<32x32xf32>
    %cst_114 = arith.constant 0.176776692 : f32
    %309 = vector.broadcast %cst_114 : f32 to vector<32x32xf32>
    %310 = arith.mulf %308, %309 : vector<32x32xf32>
    %cst_115 = arith.constant -1.000000e+30 : f32
    %311 = vector.broadcast %cst_115 : f32 to vector<32x32xf32>
    %312 = arith.select %57, %310, %311 : vector<32x32xi1>, vector<32x32xf32>
    %cst_116 = arith.constant dense<0xFF800000> : vector<32xf32>
    %313 = vector.multi_reduction <maximumf>, %312, %cst_116 [1] : vector<32x32xf32> to vector<32xf32>
    %314 = vector.shape_cast %313 : vector<32xf32> to vector<32x1xf32>
    %315 = vector.broadcast %314 : vector<32x1xf32> to vector<32x32xf32>
    %316 = arith.subf %312, %315 : vector<32x32xf32>
    %317 = math.exp %316 : vector<32x32xf32>
    %cst_117 = arith.constant dense<0.000000e+00> : vector<32xf32>
    %318 = vector.multi_reduction <add>, %317, %cst_117 [1] : vector<32x32xf32> to vector<32xf32>
    %319 = vector.shape_cast %318 : vector<32xf32> to vector<32x1xf32>
    %320 = tpu.reciprocal %319 {approx = true} : vector<32x1xf32> -> vector<32x1xf32>
    %321 = vector.broadcast %320 : vector<32x1xf32> to vector<32x32xf32>
    %322 = arith.mulf %317, %321 : vector<32x32xf32>
    %323 = arith.truncf %322 : vector<32x32xf32> to vector<32x32xbf16>
    %324 = vector.broadcast %72 : vector<1x128xf32> to vector<32x128xf32>
    %325 = arith.mulf %271, %324 : vector<32x128xf32>
    %326 = arith.truncf %325 : vector<32x128xf32> to vector<32x128xbf16>
    %cst_118 = arith.constant dense<0.000000e+00> : vector<32x128xf32>
    %327 = tpu.matmul %323, %326, %cst_118 {dimension_numbers = #tpu.dot_dimension_numbers<[1], [0], [0], [1], [0, 0, 1, 1], [], []>} : vector<32x32xbf16>, vector<32x128xbf16>, vector<32x128xf32> -> vector<32x128xf32>
    %328 = arith.addf %304, %327 : vector<32x128xf32>
    %329 = vector.broadcast %79 : vector<1x128xf32> to vector<32x128xf32>
    %330 = arith.mulf %278, %329 : vector<32x128xf32>
    %331 = arith.truncf %330 : vector<32x128xf32> to vector<32x128xbf16>
    %cst_119 = arith.constant dense<0.000000e+00> : vector<32x32xf32>
    %332 = tpu.matmul %279, %331, %cst_119 {dimension_numbers = #tpu.dot_dimension_numbers<[1], [1], [0], [0], [0, 0, 1, 0], [], []>} : vector<32x128xbf16>, vector<32x128xbf16>, vector<32x32xf32> -> vector<32x32xf32>
    %cst_120 = arith.constant 0.176776692 : f32
    %333 = vector.broadcast %cst_120 : f32 to vector<32x32xf32>
    %334 = arith.mulf %332, %333 : vector<32x32xf32>
    %cst_121 = arith.constant -1.000000e+30 : f32
    %335 = vector.broadcast %cst_121 : f32 to vector<32x32xf32>
    %336 = arith.select %57, %334, %335 : vector<32x32xi1>, vector<32x32xf32>
    %cst_122 = arith.constant dense<0xFF800000> : vector<32xf32>
    %337 = vector.multi_reduction <maximumf>, %336, %cst_122 [1] : vector<32x32xf32> to vector<32xf32>
    %338 = vector.shape_cast %337 : vector<32xf32> to vector<32x1xf32>
    %339 = vector.broadcast %338 : vector<32x1xf32> to vector<32x32xf32>
    %340 = arith.subf %336, %339 : vector<32x32xf32>
    %341 = math.exp %340 : vector<32x32xf32>
    %cst_123 = arith.constant dense<0.000000e+00> : vector<32xf32>
    %342 = vector.multi_reduction <add>, %341, %cst_123 [1] : vector<32x32xf32> to vector<32xf32>
    %343 = vector.shape_cast %342 : vector<32xf32> to vector<32x1xf32>
    %344 = tpu.reciprocal %343 {approx = true} : vector<32x1xf32> -> vector<32x1xf32>
    %345 = vector.broadcast %344 : vector<32x1xf32> to vector<32x32xf32>
    %346 = arith.mulf %341, %345 : vector<32x32xf32>
    %347 = arith.truncf %346 : vector<32x32xf32> to vector<32x32xbf16>
    %348 = vector.broadcast %79 : vector<1x128xf32> to vector<32x128xf32>
    %349 = arith.mulf %271, %348 : vector<32x128xf32>
    %350 = arith.truncf %349 : vector<32x128xf32> to vector<32x128xbf16>
    %cst_124 = arith.constant dense<0.000000e+00> : vector<32x128xf32>
    %351 = tpu.matmul %347, %350, %cst_124 {dimension_numbers = #tpu.dot_dimension_numbers<[1], [0], [0], [1], [0, 0, 1, 1], [], []>} : vector<32x32xbf16>, vector<32x128xbf16>, vector<32x128xf32> -> vector<32x128xf32>
    %352 = arith.addf %328, %351 : vector<32x128xf32>
    %353 = vector.broadcast %86 : vector<1x128xf32> to vector<32x128xf32>
    %354 = arith.mulf %278, %353 : vector<32x128xf32>
    %355 = arith.truncf %354 : vector<32x128xf32> to vector<32x128xbf16>
    %cst_125 = arith.constant dense<0.000000e+00> : vector<32x32xf32>
    %356 = tpu.matmul %279, %355, %cst_125 {dimension_numbers = #tpu.dot_dimension_numbers<[1], [1], [0], [0], [0, 0, 1, 0], [], []>} : vector<32x128xbf16>, vector<32x128xbf16>, vector<32x32xf32> -> vector<32x32xf32>
    %cst_126 = arith.constant 0.176776692 : f32
    %357 = vector.broadcast %cst_126 : f32 to vector<32x32xf32>
    %358 = arith.mulf %356, %357 : vector<32x32xf32>
    %cst_127 = arith.constant -1.000000e+30 : f32
    %359 = vector.broadcast %cst_127 : f32 to vector<32x32xf32>
    %360 = arith.select %57, %358, %359 : vector<32x32xi1>, vector<32x32xf32>
    %cst_128 = arith.constant dense<0xFF800000> : vector<32xf32>
    %361 = vector.multi_reduction <maximumf>, %360, %cst_128 [1] : vector<32x32xf32> to vector<32xf32>
    %362 = vector.shape_cast %361 : vector<32xf32> to vector<32x1xf32>
    %363 = vector.broadcast %362 : vector<32x1xf32> to vector<32x32xf32>
    %364 = arith.subf %360, %363 : vector<32x32xf32>
    %365 = math.exp %364 : vector<32x32xf32>
    %cst_129 = arith.constant dense<0.000000e+00> : vector<32xf32>
    %366 = vector.multi_reduction <add>, %365, %cst_129 [1] : vector<32x32xf32> to vector<32xf32>
    %367 = vector.shape_cast %366 : vector<32xf32> to vector<32x1xf32>
    %368 = tpu.reciprocal %367 {approx = true} : vector<32x1xf32> -> vector<32x1xf32>
    %369 = vector.broadcast %368 : vector<32x1xf32> to vector<32x32xf32>
    %370 = arith.mulf %365, %369 : vector<32x32xf32>
    %371 = arith.truncf %370 : vector<32x32xf32> to vector<32x32xbf16>
    %372 = vector.broadcast %86 : vector<1x128xf32> to vector<32x128xf32>
    %373 = arith.mulf %271, %372 : vector<32x128xf32>
    %374 = arith.truncf %373 : vector<32x128xf32> to vector<32x128xbf16>
    %cst_130 = arith.constant dense<0.000000e+00> : vector<32x128xf32>
    %375 = tpu.matmul %371, %374, %cst_130 {dimension_numbers = #tpu.dot_dimension_numbers<[1], [0], [0], [1], [0, 0, 1, 1], [], []>} : vector<32x32xbf16>, vector<32x128xbf16>, vector<32x128xf32> -> vector<32x128xf32>
    %376 = arith.addf %352, %375 : vector<32x128xf32>
    %377 = arith.truncf %376 : vector<32x128xf32> to vector<32x128xbf16>
    %c1_131 = arith.constant 1 : index
    %c0_132 = arith.constant 0 : index
    %c0_133 = arith.constant 0 : index
    %378 = vector.load %arg19[%c1_131, %c0_132, %c0_133] : memref<2x128x128xbf16, #tpu.memory_space<vmem>>, vector<1x128x128xbf16>
    %379 = vector.shape_cast %378 : vector<1x128x128xbf16> to vector<128x128xbf16>
    %cst_134 = arith.constant dense<0.000000e+00> : vector<32x128xf32>
    %380 = tpu.matmul %377, %379, %cst_134 {dimension_numbers = #tpu.dot_dimension_numbers<[1], [0], [0], [1], [0, 0, 1, 1], [], []>} : vector<32x128xbf16>, vector<128x128xbf16>, vector<32x128xf32> -> vector<32x128xf32>
    %381 = arith.addf %251, %380 : vector<32x128xf32>
    %c1_135 = arith.constant 1 : index
    %c0_136 = arith.constant 0 : index
    %c0_137 = arith.constant 0 : index
    %382 = vector.load %arg20[%c1_135, %c0_136, %c0_137] : memref<2x1x128xf32, #tpu.memory_space<vmem>>, vector<1x1x128xf32>
    %383 = vector.shape_cast %382 : vector<1x1x128xf32> to vector<1x128xf32>
    %384 = arith.mulf %381, %381 : vector<32x128xf32>
    %cst_138 = arith.constant dense<0.000000e+00> : vector<32xf32>
    %385 = vector.multi_reduction <add>, %384, %cst_138 [1] : vector<32x128xf32> to vector<32xf32>
    %386 = vector.shape_cast %385 : vector<32xf32> to vector<32x1xf32>
    %cst_139 = arith.constant 1.280000e+02 : f32
    %387 = vector.broadcast %cst_139 : f32 to vector<32x1xf32>
    %388 = arith.divf %386, %387 : vector<32x1xf32>
    %cst_140 = arith.constant 9.99999974E-6 : f32
    %389 = vector.broadcast %cst_140 : f32 to vector<32x1xf32>
    %390 = arith.addf %388, %389 : vector<32x1xf32>
    %391 = math.rsqrt %390 : vector<32x1xf32>
    %392 = vector.broadcast %391 : vector<32x1xf32> to vector<32x128xf32>
    %393 = arith.mulf %381, %392 : vector<32x128xf32>
    %394 = vector.broadcast %383 : vector<1x128xf32> to vector<32x128xf32>
    %395 = arith.mulf %393, %394 : vector<32x128xf32>
    %396 = arith.truncf %395 : vector<32x128xf32> to vector<32x128xbf16>
    %c1_141 = arith.constant 1 : index
    %c0_142 = arith.constant 0 : index
    %c0_143 = arith.constant 0 : index
    %397 = vector.load %arg21[%c1_141, %c0_142, %c0_143] : memref<2x128x512xbf16, #tpu.memory_space<vmem>>, vector<1x128x512xbf16>
    %398 = vector.shape_cast %397 : vector<1x128x512xbf16> to vector<128x512xbf16>
    %cst_144 = arith.constant dense<0.000000e+00> : vector<32x512xf32>
    %399 = tpu.matmul %396, %398, %cst_144 {dimension_numbers = #tpu.dot_dimension_numbers<[1], [0], [0], [1], [0, 0, 1, 1], [], []>} : vector<32x128xbf16>, vector<128x512xbf16>, vector<32x512xf32> -> vector<32x512xf32>
    %400 = vector.extract_strided_slice %399 {offsets = [0, 0], sizes = [32, 256], strides = [1, 1]} : vector<32x512xf32> to vector<32x256xf32>
    %401 = vector.extract_strided_slice %399 {offsets = [0, 256], sizes = [32, 256], strides = [1, 1]} : vector<32x512xf32> to vector<32x256xf32>
    %402 = arith.negf %400 : vector<32x256xf32>
    %403 = math.exp %402 : vector<32x256xf32>
    %cst_145 = arith.constant 1.000000e+00 : f32
    %404 = vector.broadcast %cst_145 : f32 to vector<32x256xf32>
    %405 = arith.addf %404, %403 : vector<32x256xf32>
    %406 = arith.divf %404, %405 : vector<32x256xf32>
    %407 = arith.mulf %400, %406 : vector<32x256xf32>
    %408 = arith.mulf %407, %401 : vector<32x256xf32>
    %409 = arith.truncf %408 : vector<32x256xf32> to vector<32x256xbf16>
    %c1_146 = arith.constant 1 : index
    %c0_147 = arith.constant 0 : index
    %c0_148 = arith.constant 0 : index
    %410 = vector.load %arg22[%c1_146, %c0_147, %c0_148] : memref<2x256x128xbf16, #tpu.memory_space<vmem>>, vector<1x256x128xbf16>
    %411 = vector.shape_cast %410 : vector<1x256x128xbf16> to vector<256x128xbf16>
    %cst_149 = arith.constant dense<0.000000e+00> : vector<32x128xf32>
    %412 = tpu.matmul %409, %411, %cst_149 {dimension_numbers = #tpu.dot_dimension_numbers<[1], [0], [0], [1], [0, 0, 1, 1], [], []>} : vector<32x256xbf16>, vector<256x128xbf16>, vector<32x128xf32> -> vector<32x128xf32>
    %413 = arith.addf %381, %412 : vector<32x128xf32>
    %c0_150 = arith.constant 0 : index
    %c0_151 = arith.constant 0 : index
    %414 = vector.load %arg16[%c0_150, %c0_151] : memref<1x128xf32, #tpu.memory_space<vmem>>, vector<1x128xf32>
    %415 = arith.mulf %413, %413 : vector<32x128xf32>
    %cst_152 = arith.constant dense<0.000000e+00> : vector<32xf32>
    %416 = vector.multi_reduction <add>, %415, %cst_152 [1] : vector<32x128xf32> to vector<32xf32>
    %417 = vector.shape_cast %416 : vector<32xf32> to vector<32x1xf32>
    %cst_153 = arith.constant 1.280000e+02 : f32
    %418 = vector.broadcast %cst_153 : f32 to vector<32x1xf32>
    %419 = arith.divf %417, %418 : vector<32x1xf32>
    %cst_154 = arith.constant 9.99999974E-6 : f32
    %420 = vector.broadcast %cst_154 : f32 to vector<32x1xf32>
    %421 = arith.addf %419, %420 : vector<32x1xf32>
    %422 = math.rsqrt %421 : vector<32x1xf32>
    %423 = vector.broadcast %422 : vector<32x1xf32> to vector<32x128xf32>
    %424 = arith.mulf %413, %423 : vector<32x128xf32>
    %425 = vector.broadcast %414 : vector<1x128xf32> to vector<32x128xf32>
    %426 = arith.mulf %424, %425 : vector<32x128xf32>
    %c0_155 = arith.constant 0 : index
    %c0_156 = arith.constant 0 : index
    %427 = vector.load %arg23[%c0_155, %c0_156] : memref<32x128xf32, #tpu.memory_space<vmem>>, vector<32x128xf32>
    tpu.vector_store %arg23[%c0_155, %c0_156], %426 {strides = array<i32>} : memref<32x128xf32, #tpu.memory_space<vmem>>, vector<32x128xf32>,
    return
  }
}

</mosaic_0001>

<bundles_post_ra>
// kernel: tile.14
= control target key start
LH: loop header
LB: loop body
LE: loop exit
PB: predicated region body
PF: predicated region fallthrough
CT: control target
= control target key end

     0   :  { %vm92_vm0 = vcmask 1047556   ;;  %s459_s14 = smov 96   ;;  %s460_s26 = smov 64   ;;  %vm3_vm1 = vcmask 261120   ;;  %vm96_vm2 = vcmask 1048320   ;;  %vm183_vm3 = vcmask 785920   ;;  %s904_s0 = inlined_call_operand.vmem [shape: f32[32,8,32], index: 0, kind: input, shape index: {}]   ;;  %s905_s1 = inlined_call_operand.vmem [shape: f32[32,256], index: 1, kind: output, shape index: {}]  }
   0x1   :  { %v392_v0 = vld [vmem:[%s904_s0 + $0x7] ss:$8 sm:$0xf]   ;;  %v387_v3 = vld [vmem:[%s904_s0 + $0x3] ss:$8 sm:$0xf]  }
   0x2   :  { %v393_v1 = vld [vmem:[%s904_s0 + $0x7] ss:$8 sm:$0xf0]   ;;  %v388_v4 = vld [vmem:[%s904_s0 + $0x3] ss:$8 sm:$0xf0]  }
   0x3   :  { %v114_v2 = vsel %vm92_vm0, %v393_v1, %v392_v0  ;;  %v93_v5 = vsel %vm92_vm0, %v388_v4, %v387_v3  ;;  %v395_v6 = vld [vmem:[%s904_s0 + $0x87] ss:$8 sm:$0xf]   ;;  %v389_v9 = vld [vmem:[%s904_s0 + $0x83] ss:$8 sm:$0xf]  }
   0x4   :  { %115 = vrot.lane.b32.xlu1 %v114_v2, %s459_s14  ;;  %v396_v7 = vld [vmem:[%s904_s0 + $0x87] ss:$8 sm:$0xf0]   ;;  %94 = vrot.lane.b32.xlu0 %v93_v5, %s459_s14  ;;  %v390_v10 = vld [vmem:[%s904_s0 + $0x83] ss:$8 sm:$0xf0]  }
   0x5   :  { %v125_v8 = vsel %vm92_vm0, %v396_v7, %v395_v6  ;;  %v103_v11 = vsel %vm92_vm0, %v390_v10, %v389_v9  ;;  %v401_v12 = vld [vmem:[%s904_s0 + $0xc3] ss:$8 sm:$0xf]   ;;  %v407_v18 = vld [vmem:[%s904_s0 + $0xc7] ss:$8 sm:$0xf]  }
   0x6   :  { %v402_v13 = vld [vmem:[%s904_s0 + $0xc3] ss:$8 sm:$0xf0]   ;;  %v408_v19 = vld [vmem:[%s904_s0 + $0xc7] ss:$8 sm:$0xf0]  }
   0x7   :  { %v398_v14 = vld [vmem:[%s904_s0 + $0x43] ss:$8 sm:$0xf]   ;;  %v147_v16 = vsel %vm92_vm0, %v402_v13, %v401_v12  ;;  %v404_v20 = vld [vmem:[%s904_s0 + $0x47] ss:$8 sm:$0xf]   ;;  %v169_v22 = vsel %vm92_vm0, %v408_v19, %v407_v18 }
   0x8   :  { %v399_v15 = vld [vmem:[%s904_s0 + $0x43] ss:$8 sm:$0xf0]   ;;  %126 = vrot.lane.b32.xlu1 %v125_v8, %s459_s14  ;;  %104 = vrot.lane.b32.xlu0 %v103_v11, %s459_s14  ;;  %v405_v21 = vld [vmem:[%s904_s0 + $0x47] ss:$8 sm:$0xf0]  }
   0x9   :  { %v136_v17 = vsel %vm92_vm0, %v399_v15, %v398_v14  ;;  %v158_v23 = vsel %vm92_vm0, %v405_v21, %v404_v20  ;;  %v412_v24 = vld [vmem:[%s904_s0 + $0x82] ss:$8 sm:$0xf]   ;;  %v418_v30 = vld [vmem:[%s904_s0 + $0x86] ss:$8 sm:$0xf]  }
   0xa   :  { %v413_v25 = vld [vmem:[%s904_s0 + $0x82] ss:$8 sm:$0xf0]   ;;  %v419_v31 = vld [vmem:[%s904_s0 + $0x86] ss:$8 sm:$0xf0]  }
   0xb   :  { %v410_v26 = vld [vmem:[%s904_s0 + $0x2] ss:$8 sm:$0xf]   ;;  %v190_v28 = vsel %vm92_vm0, %v413_v25, %v412_v24  ;;  %v415_v32 = vld [vmem:[%s904_s0 + $0x6] ss:$8 sm:$0xf]   ;;  %v212_v34 = vsel %vm92_vm0, %v419_v31, %v418_v30 }
   0xc   :  { %148 = vrot.lane.b32.xlu1 %v147_v16, %s459_s14  ;;  %137 = vrot.lane.b32.xlu0 %v136_v17, %s459_s14  ;;  %v411_v27 = vld [vmem:[%s904_s0 + $0x2] ss:$8 sm:$0xf0]   ;;  %v416_v33 = vld [vmem:[%s904_s0 + $0x6] ss:$8 sm:$0xf0]  }
   0xd   :  { %v180_v29 = vsel %vm92_vm0, %v411_v27, %v410_v26  ;;  %v201_v35 = vsel %vm92_vm0, %v416_v33, %v415_v32  ;;  %v424_v36 = vld [vmem:[%s904_s0 + $0xc2] ss:$8 sm:$0xf]   ;;  %v430_v40 = vld [vmem:[%s904_s0 + $0xc6] ss:$8 sm:$0xf]  }
   0xe   :  { %v425_v37 = vld [vmem:[%s904_s0 + $0xc2] ss:$8 sm:$0xf0]   ;;  %v431_v42 = vld [vmem:[%s904_s0 + $0xc6] ss:$8 sm:$0xf0]  }
   0xf   :  { %v421_v38 = vld [vmem:[%s904_s0 + $0x42] ss:$8 sm:$0xf]   ;;  %v234_v41 = vsel %vm92_vm0, %v425_v37, %v424_v36  ;;  %v427_v43 = vld [vmem:[%s904_s0 + $0x46] ss:$8 sm:$0xf]   ;;  %v256_v53 = vsel %vm92_vm0, %v431_v42, %v430_v40 }
  0x10   :  { %170 = vrot.lane.b32.xlu1 %v169_v22, %s459_s14  ;;  %159 = vrot.lane.b32.xlu0 %v158_v23, %s459_s14  ;;  %v422_v39 = vld [vmem:[%s904_s0 + $0x42] ss:$8 sm:$0xf0]   ;;  %v428_v45 = vld [vmem:[%s904_s0 + $0x46] ss:$8 sm:$0xf0]  }
  0x11   :  { %v223_v44 = vsel %vm92_vm0, %v422_v39, %v421_v38  ;;  %v367_v46 = vld [vmem:[%s904_s0 + $0x80] ss:$4 sm:$0xff]   ;;  %v245_v55 = vsel %vm92_vm0, %v428_v45, %v427_v43  ;;  %v435_v56 = vld [vmem:[%s904_s0 + $0x81] ss:$8 sm:$0xf]   ;;  %s461_s25 = smov 32  }
  0x12   :  { %368 = vst.msk [vmem:[%s905_s1 + $0x20] ss:$8 sm:$0x3] %vm3_vm1, %v367_v46   ;;  %369 = vst.msk [vmem:[%s905_s1 + $0x11] ss:$8 sm:$0xc] %vm3_vm1, %v367_v46  }
  0x13   :  { %370 = vst.msk [vmem:[%s905_s1 + $0x2] ss:$8 sm:$0x30] %vm3_vm1, %v367_v46   ;;  %371 = vst.msk [vmem:[%s905_s1 - $0xd] ss:$8 sm:$0xc0] %vm3_vm1, %v367_v46  }
  0x14   :  { %191 = vrot.lane.b32.xlu1 %v190_v28, %s460_s26  ;;  %181 = vrot.lane.b32.xlu0 %v180_v29, %s460_s26  ;;  %v372_v47 = vld [vmem:[%s904_s0 + $0xa0] ss:$4 sm:$0xff]   ;;  %v436_v57 = vld [vmem:[%s904_s0 + $0x81] ss:$8 sm:$0xf0]   ;;  %vm270_vm4 = vcmask 523520  }
  0x15   :  { %v2_v48 = vld [vmem:[%s904_s0] ss:$4 sm:$0xff]   ;;  %373 = vst.msk [vmem:[%s905_s1 + $0x24] ss:$8 sm:$0x3] %vm3_vm1, %v372_v47   ;;  %v277_v60 = vsel %vm92_vm0, %v436_v57, %v435_v56 }
  0x16   :  { %v352_v49 = vld [vmem:[%s904_s0 + $0x20] ss:$4 sm:$0xff]   ;;  %374 = vst.msk [vmem:[%s905_s1 + $0x15] ss:$8 sm:$0xc] %vm3_vm1, %v372_v47  }
  0x17   :  { %375 = vst.msk [vmem:[%s905_s1 + $0x6] ss:$8 sm:$0x30] %vm3_vm1, %v372_v47   ;;  %376 = vst.msk [vmem:[%s905_s1 - $0x9] ss:$8 sm:$0xc0] %vm3_vm1, %v372_v47  }
  0x18   :  { %213 = vrot.lane.b32.xlu1 %v212_v34, %s460_s26  ;;  %202 = vrot.lane.b32.xlu0 %v201_v35, %s460_s26  ;;  %4 = vst.msk [vmem:[%s905_s1] ss:$8 sm:$0x3] %vm3_vm1, %v2_v48   ;;  %349 = vst.msk [vmem:[%s905_s1 - $0xf] ss:$8 sm:$0xc] %vm3_vm1, %v2_v48  }
  0x19   :  { %350 = vst.msk [vmem:[%s905_s1 - $0x1e] ss:$8 sm:$0x30] %vm3_vm1, %v2_v48   ;;  %351 = vst.msk [vmem:[%s905_s1 - $0x2d] ss:$8 sm:$0xc0] %vm3_vm1, %v2_v48  }
  0x1a   :  { %353 = vst.msk [vmem:[%s905_s1 + $0x4] ss:$8 sm:$0x3] %vm3_vm1, %v352_v49   ;;  %354 = vst.msk [vmem:[%s905_s1 - $0xb] ss:$8 sm:$0xc] %vm3_vm1, %v352_v49  }
  0x1b   :  { %355 = vst.msk [vmem:[%s905_s1 - $0x1a] ss:$8 sm:$0x30] %vm3_vm1, %v352_v49   ;;  %356 = vst.msk [vmem:[%s905_s1 - $0x29] ss:$8 sm:$0xc0] %vm3_vm1, %v352_v49  }
  0x1c   :  { %235 = vrot.lane.b32.xlu1 %v234_v41, %s460_s26  ;;  %v377_v50 = vld [vmem:[%s904_s0 + $0xc0] ss:$4 sm:$0xff]   ;;  %224 = vrot.lane.b32.xlu0 %v223_v44, %s460_s26  ;;  %v433_v58 = vld [vmem:[%s904_s0 + $0x1] ss:$8 sm:$0xf]  }
  0x1d   :  { %v382_v51 = vld [vmem:[%s904_s0 + $0xe0] ss:$4 sm:$0xff]   ;;  %378 = vst.msk [vmem:[%s905_s1 + $0x30] ss:$8 sm:$0x3] %vm3_vm1, %v377_v50  }
  0x1e   :  { %v357_v52 = vld [vmem:[%s904_s0 + $0x40] ss:$4 sm:$0xff]   ;;  %379 = vst.msk [vmem:[%s905_s1 + $0x21] ss:$8 sm:$0xc] %vm3_vm1, %v377_v50  }
  0x1f   :  { %380 = vst.msk [vmem:[%s905_s1 + $0x12] ss:$8 sm:$0x30] %vm3_vm1, %v377_v50   ;;  %381 = vst.msk [vmem:[%s905_s1 + $0x3] ss:$8 sm:$0xc0] %vm3_vm1, %v377_v50  }
  0x20   :  { %383 = vst.msk [vmem:[%s905_s1 + $0x34] ss:$8 sm:$0x3] %vm3_vm1, %v382_v51   ;;  %384 = vst.msk [vmem:[%s905_s1 + $0x25] ss:$8 sm:$0xc] %vm3_vm1, %v382_v51   ;;  %257 = vrot.lane.b32.xlu1 %v256_v53, %s460_s26  ;;  %246 = vrot.lane.b32.xlu0 %v245_v55, %s460_s26 }
  0x21   :  { %385 = vst.msk [vmem:[%s905_s1 + $0x16] ss:$8 sm:$0x30] %vm3_vm1, %v382_v51   ;;  %386 = vst.msk [vmem:[%s905_s1 + $0x7] ss:$8 sm:$0xc0] %vm3_vm1, %v382_v51  }
  0x22   :  { %358 = vst.msk [vmem:[%s905_s1 + $0x10] ss:$8 sm:$0x3] %vm3_vm1, %v357_v52   ;;  %359 = vst.msk [vmem:[%s905_s1 + $0x1] ss:$8 sm:$0xc] %vm3_vm1, %v357_v52  }
  0x23   :  { %360 = vst.msk [vmem:[%s905_s1 - $0xe] ss:$8 sm:$0x30] %vm3_vm1, %v357_v52   ;;  %361 = vst.msk [vmem:[%s905_s1 - $0x1d] ss:$8 sm:$0xc0] %vm3_vm1, %v357_v52  }
  0x24   :  { %v362_v54 = vld [vmem:[%s904_s0 + $0x60] ss:$4 sm:$0xff]   ;;  %v434_v59 = vld [vmem:[%s904_s0 + $0x1] ss:$8 sm:$0xf0]   ;;  %278 = vrot.lane.b32.xlu1 %v277_v60, %s461_s25 }
  0x25   :  { %363 = vst.msk [vmem:[%s905_s1 + $0x14] ss:$8 sm:$0x3] %vm3_vm1, %v362_v54   ;;  %364 = vst.msk [vmem:[%s905_s1 + $0x5] ss:$8 sm:$0xc] %vm3_vm1, %v362_v54   ;;  %v267_v61 = vsel %vm92_vm0, %v434_v59, %v433_v58 }
  0x26   :  { %365 = vst.msk [vmem:[%s905_s1 - $0xa] ss:$8 sm:$0x30] %vm3_vm1, %v362_v54   ;;  %366 = vst.msk [vmem:[%s905_s1 - $0x19] ss:$8 sm:$0xc0] %vm3_vm1, %v362_v54   ;;  %268 = vrot.lane.b32.xlu0 %v267_v61, %s461_s25 }
  0x27   :  { %v441_v62 = vld [vmem:[%s904_s0 + $0x85] ss:$8 sm:$0xf]   ;;  %v447_v4 = vld [vmem:[%s904_s0 + $0xc1] ss:$8 sm:$0xf]  }
  0x28   :  { %v442_v63 = vld [vmem:[%s904_s0 + $0x85] ss:$8 sm:$0xf0]   ;;  %v448_v5 = vld [vmem:[%s904_s0 + $0xc1] ss:$8 sm:$0xf0]  }
  0x29   :  { %v438_v0 = vld [vmem:[%s904_s0 + $0x5] ss:$8 sm:$0xf]   ;;  %v299_v2 = vsel %vm92_vm0, %v442_v63, %v441_v62  ;;  %v444_v6 = vld [vmem:[%s904_s0 + $0x41] ss:$8 sm:$0xf]   ;;  %v321_v8 = vsel %vm92_vm0, %v448_v5, %v447_v4 }
  0x2a   :  { %v439_v1 = vld [vmem:[%s904_s0 + $0x5] ss:$8 sm:$0xf0]   ;;  %v445_v7 = vld [vmem:[%s904_s0 + $0x41] ss:$8 sm:$0xf0]   ;;  %300 = vrot.lane.b32.xlu1 %v299_v2, %s461_s25 }
  0x2b   :  { %v288_v3 = vsel %vm92_vm0, %v439_v1, %v438_v0  ;;  %v310_v9 = vsel %vm92_vm0, %v445_v7, %v444_v6  ;;  %v453_v10 = vld [vmem:[%s904_s0 + $0xc5] ss:$8 sm:$0xf]  }
  0x2c   :  { %289 = vrot.lane.b32.xlu0 %v288_v3, %s461_s25  ;;  %v454_v11 = vld [vmem:[%s904_s0 + $0xc5] ss:$8 sm:$0xf0]  }
  0x2d   :  { %v450_v12 = vld [vmem:[%s904_s0 + $0x45] ss:$8 sm:$0xf]   ;;  %v343_v14 = vsel %vm92_vm0, %v454_v11, %v453_v10 }
  0x2e   :  { %v451_v13 = vld [vmem:[%s904_s0 + $0x45] ss:$8 sm:$0xf0]   ;;  %322 = vrot.lane.b32.xlu1 %v321_v8, %s461_s25 }
  0x2f   :  { %v332_v15 = vsel %vm92_vm0, %v451_v13, %v450_v12 }
  0x30   :  { %311 = vrot.lane.b32.xlu0 %v310_v9, %s461_s25 }
  0x32   :  { %344 = vrot.lane.b32.xlu1 %v343_v14, %s461_s25 }
  0x34   :  { %333 = vrot.lane.b32.xlu0 %v332_v15, %s461_s25 }
  0x76   :  { %v116_v16 = vpop.permute.xlu1 %115   ;;  %v95_v17 = vpop.permute.xlu0 %94  }
  0x77   :  { %394 = vst.msk [vmem:[%s905_s1 + $0x8] sm:$0xff] %vm96_vm2, %v116_v16   ;;  %97 = vst.msk [vmem:[%s905_s1] sm:$0xff] %vm96_vm2, %v95_v17  }
  0x7a   :  { %v127_v18 = vpop.permute.xlu1 %126   ;;  %v105_v19 = vpop.permute.xlu0 %104  }
  0x7b   :  { %397 = vst.msk [vmem:[%s905_s1 + $0x28] sm:$0xff] %vm96_vm2, %v127_v18   ;;  %391 = vst.msk [vmem:[%s905_s1 + $0x20] sm:$0xff] %vm96_vm2, %v105_v19  }
  0x7e   :  { %v149_v20 = vpop.permute.xlu1 %148   ;;  %v138_v21 = vpop.permute.xlu0 %137  }
  0x7f   :  { %403 = vst.msk [vmem:[%s905_s1 + $0x30] sm:$0xff] %vm96_vm2, %v149_v20   ;;  %400 = vst.msk [vmem:[%s905_s1 + $0x10] sm:$0xff] %vm96_vm2, %v138_v21  }
  0x82   :  { %v171_v22 = vpop.permute.xlu1 %170   ;;  %v160_v23 = vpop.permute.xlu0 %159  }
  0x83   :  { %409 = vst.msk [vmem:[%s905_s1 + $0x38] sm:$0xff] %vm96_vm2, %v171_v22   ;;  %406 = vst.msk [vmem:[%s905_s1 + $0x18] sm:$0xff] %vm96_vm2, %v160_v23  }
  0x86   :  { %v192_v24 = vpop.permute.xlu1 %191   ;;  %v182_v25 = vpop.permute.xlu0 %181  }
  0x87   :  { %414 = vst.msk [vmem:[%s905_s1 + $0x20] sm:$0xff] %vm183_vm3, %v192_v24   ;;  %184 = vst.msk [vmem:[%s905_s1] sm:$0xff] %vm183_vm3, %v182_v25  }
  0x8a   :  { %v214_v26 = vpop.permute.xlu1 %213   ;;  %v203_v27 = vpop.permute.xlu0 %202  }
  0x8b   :  { %420 = vst.msk [vmem:[%s905_s1 + $0x28] sm:$0xff] %vm183_vm3, %v214_v26   ;;  %417 = vst.msk [vmem:[%s905_s1 + $0x8] sm:$0xff] %vm183_vm3, %v203_v27  }
  0x8e   :  { %v236_v28 = vpop.permute.xlu1 %235   ;;  %v225_v29 = vpop.permute.xlu0 %224  }
  0x8f   :  { %426 = vst.msk [vmem:[%s905_s1 + $0x30] sm:$0xff] %vm183_vm3, %v236_v28   ;;  %423 = vst.msk [vmem:[%s905_s1 + $0x10] sm:$0xff] %vm183_vm3, %v225_v29  }
  0x92   :  { %v258_v30 = vpop.permute.xlu1 %257   ;;  %v247_v31 = vpop.permute.xlu0 %246  }
  0x93   :  { %432 = vst.msk [vmem:[%s905_s1 + $0x38] sm:$0xff] %vm183_vm3, %v258_v30   ;;  %429 = vst.msk [vmem:[%s905_s1 + $0x18] sm:$0xff] %vm183_vm3, %v247_v31  }
  0x96   :  { %v279_v32 = vpop.permute.xlu1 %278  }
  0x97   :  { %437 = vst.msk [vmem:[%s905_s1 + $0x20] sm:$0xff] %vm270_vm4, %v279_v32  }
  0x98   :  { %v269_v33 = vpop.permute.xlu0 %268  }
  0x99   :  { %271 = vst.msk [vmem:[%s905_s1] sm:$0xff] %vm270_vm4, %v269_v33  }
  0x9c   :  { %v301_v34 = vpop.permute.xlu1 %300  }
  0x9d   :  { %443 = vst.msk [vmem:[%s905_s1 + $0x28] sm:$0xff] %vm270_vm4, %v301_v34  }
  0x9e   :  { %v290_v35 = vpop.permute.xlu0 %289  }
  0x9f   :  { %440 = vst.msk [vmem:[%s905_s1 + $0x8] sm:$0xff] %vm270_vm4, %v290_v35  }
  0xa0   :  { %v323_v36 = vpop.permute.xlu1 %322  }
  0xa1   :  { %449 = vst.msk [vmem:[%s905_s1 + $0x30] sm:$0xff] %vm270_vm4, %v323_v36  }
  0xa2   :  { %v312_v37 = vpop.permute.xlu0 %311  }
  0xa3   :  { %446 = vst.msk [vmem:[%s905_s1 + $0x10] sm:$0xff] %vm270_vm4, %v312_v37  }
  0xa4   :  { %v345_v38 = vpop.permute.xlu1 %344  }
  0xa5   :  { %455 = vst.msk [vmem:[%s905_s1 + $0x38] sm:$0xff] %vm270_vm4, %v345_v38  }
  0xa6   :  { %v334_v39 = vpop.permute.xlu0 %333  }
  0xa7   :  { %452 = vst.msk [vmem:[%s905_s1 + $0x18] sm:$0xff] %vm270_vm4, %v334_v39  }

// kernel: forward.1
= control target key start
LH: loop header
LB: loop body
LE: loop exit
PB: predicated region body
PF: predicated region fallthrough
CT: control target
= control target key end

     0   :  { %s7504_s0 = inlined_call_operand.vmem [shape: s32[32,1], index: 0, kind: input, shape index: {}]   ;;  %s7505_s1 = inlined_call_operand.vmem [shape: f32[32,128], index: 1, kind: input, shape index: {}]   ;;  %s7506_s2 = inlined_call_operand.vmem [shape: f32[32,1], index: 2, kind: input, shape index: {}]   ;;  %s7507_s3 = inlined_call_operand.vmem [shape: f32[32,1], index: 3, kind: input, shape index: {}]   ;;  %s7508_s4 = inlined_call_operand.vmem [shape: f32[32,1], index: 4, kind: input, shape index: {}]   ;;  %s7509_s5 = inlined_call_operand.vmem [shape: f32[3,128], index: 5, kind: input, shape index: {}]   ;;  %s7510_s6 = inlined_call_operand.vmem [shape: f32[1,128], index: 6, kind: input, shape index: {}]   ;;  %s7511_s7 = inlined_call_operand.vmem [shape: bf16[128,128], index: 7, kind: input, shape index: {}]   ;;  %s7512_s8 = inlined_call_operand.vmem [shape: f32[1,128], index: 8, kind: input, shape index: {}]   ;;  %s7513_s9 = inlined_call_operand.vmem [shape: bf16[128,128], index: 9, kind: input, shape index: {}]   ;;  %s7514_s10 = inlined_call_operand.vmem [shape: f32[1,128], index: 10, kind: input, shape index: {}]   ;;  %s7515_s11 = inlined_call_operand.vmem [shape: f32[32,128], index: 11, kind: input, shape index: {}]   ;;  %s7516_s12 = inlined_call_operand.vmem [shape: f32[32,128], index: 12, kind: input, shape index: {}]   ;;  %s7517_s13 = inlined_call_operand.vmem [shape: f32[32,256], index: 13, kind: input, shape index: {}]   ;;  %s7518_s14 = inlined_call_operand.vmem [shape: f32[32,256], index: 14, kind: input, shape index: {}]   ;;  %s7519_s15 = inlined_call_operand.vmem [shape: bf16[256,256], index: 15, kind: input, shape index: {}]   ;;  %s7520_s16 = inlined_call_operand.vmem [shape: f32[1,128], index: 16, kind: input, shape index: {}]   ;;  %s7521_s17 = inlined_call_operand.vmem [shape: f32[2,1,128], index: 17, kind: input, shape index: {}]   ;;  %s7522_s18 = inlined_call_operand.vmem [shape: bf16[2,128,384], index: 18, kind: input, shape index: {}]   ;;  %s7523_s19 = inlined_call_operand.vmem [shape: bf16[2,128,128], index: 19, kind: input, shape index: {}]   ;;  %s7524_s20 = inlined_call_operand.vmem [shape: f32[2,1,128], index: 20, kind: input, shape index: {}]   ;;  %s7525_s21 = inlined_call_operand.vmem [shape: bf16[2,128,512], index: 21, kind: input, shape index: {}]   ;;  %s7526_s22 = inlined_call_operand.vmem [shape: bf16[2,256,128], index: 22, kind: input, shape index: {}]   ;;  %s7527_s23 = inlined_call_operand.hbm [shape: f32[32,128], index: 23, kind: output, shape index: {}]  }
   0x1   :  { %7535 = sst [smem:[#allocation5_spill]] %s7504_s0 }
   0x2   :  { %7536 = sst [smem:[#allocation6_spill]] %s7505_s1 }
   0x3   :  { %7537 = sst [smem:[#allocation7_spill]] %s7506_s2 }
   0x4   :  { %7538 = sst [smem:[#allocation8_spill]] %s7507_s3 }
   0x5   :  { %7539 = sst [smem:[#allocation9_spill]] %s7508_s4 }
   0x6   :  { %7540 = sst [smem:[#allocation10_spill]] %s7509_s5 }
   0x7   :  { %7541 = sst [smem:[#allocation11_spill]] %s7510_s6 }
   0x8   :  { %7542 = sst [smem:[#allocation12_spill]] %s7511_s7 }
   0x9   :  { %s7543_s24 = sld [smem:[#allocation7_spill]]  ;;  %v5846_v2 = vmov 0   ;;  %s7544_s28 = sld [smem:[#allocation12_spill]]  ;;  %v5847_v16 = vmov 0.0   ;;  %v5278_v38 = vld [vmem:[%s7513_s9] sm:$0xff]   ;;  %v5279_v39 = vld [vmem:[%s7513_s9 + $0x8] sm:$0xff]  }
   0xa   :  { %5249 = vset.pattern.permute.xlu1 %v5846_v2  ;;  %5248 = vset.pattern.permute.xlu0 %v5846_v2  ;;  %s7545_s0 = sld [smem:[#allocation5_spill]]  ;;  %s7546_s1 = sld [smem:[#allocation8_spill]]  ;;  %v5280_v40 = vld [vmem:[%s7513_s9 + $0x10] sm:$0xff]   ;;  %v5281_v41 = vld [vmem:[%s7513_s9 + $0x18] sm:$0xff]   ;;  %v5282_v42 = vld [vmem:[%s7513_s9 + $0x20] sm:$0xff]  }
   0xb   :  { %s7547_s6 = sld [smem:[#allocation9_spill]]  ;;  %4991 = vmatprep.subr.bf16.mxu1 %v5278_v38  ;;  %v5283_v43 = vld [vmem:[%s7513_s9 + $0x28] sm:$0xff]  }
   0xc   :  { %4992 = vmatpush3.bf16.msra.mxu1 %v5278_v38 }
   0xd   :  { %4993 = vmatprep.subr.bf16.mxu1 %v5279_v39 }
   0xf   :  { %v107_v0 = vld [vmem:[%s7543_s24 + $0x10] sm:$0xff]  ;;  %v105_v1 = vld [vmem:[%s7543_s24] sm:$0xff]  ;;  %v108_v3 = vld [vmem:[%s7543_s24 + $0x18] sm:$0xff] }
  0x10   :  { %122 = vperm.xlu1 %5249, %v107_v0   ;;  %112 = vperm.xlu0 %5248, %v105_v1   ;;  %v106_v4 = vld [vmem:[%s7543_s24 + $0x8] sm:$0xff]  ;;  %v5270_v5 = vld [vmem:[%s7544_s28] sm:$0xff]   ;;  %v151_v10 = vld [vmem:[%s7546_s1 + $0x18] sm:$0xff] }
  0x11   :  { %v76_v6 = vld [vmem:[%s7545_s0] sm:$0xff]  ;;  %v77_v7 = vld [vmem:[%s7545_s0 + $0x8] sm:$0xff]  ;;  %4971 = vmatprep.subr.bf16.mxu0 %v5270_v5  ;;  %v150_v11 = vld [vmem:[%s7546_s1 + $0x10] sm:$0xff]  ;;  %4994 = vmatpush3.bf16.msra.mxu1 %v5279_v39 }
  0x12   :  { %v149_v8 = vld [vmem:[%s7546_s1 + $0x8] sm:$0xff]  ;;  %v148_v9 = vld [vmem:[%s7546_s1] sm:$0xff]  ;;  %4972 = vmatpush3.bf16.msra.mxu0 %v5270_v5  ;;  %vm92_vm0 = vcmp.eq.s32.totalorder %v76_v6, 4294967293  ;;  %vm93_vm1 = vcmp.eq.s32.totalorder %v77_v7, 4294967293  ;;  %vm80_vm2 = vcmp.gt.s32.totalorder %v76_v6, 0  ;;  %vm81_vm3 = vcmp.gt.s32.totalorder %v77_v7, 0  ;;  %4995 = vmatprep.subr.bf16.mxu1 %v5280_v40 }
  0x13   :  { %v5271_v12 = vld [vmem:[%s7544_s28 + $0x8] sm:$0xff]   ;;  %v78_v13 = vld [vmem:[%s7545_s0 + $0x10] sm:$0xff]  ;;  %v79_v14 = vld [vmem:[%s7545_s0 + $0x18] sm:$0xff]  ;;  %v4418_v17 = vsel %vm92_vm0, 1.0, %v5847_v16  ;;  %v4419_v18 = vsel %vm93_vm1, 1.0, %v5847_v16  ;;  %v4414_v21 = vsel %vm80_vm2, 1.0, %v5847_v16 }
  0x14   :  { %127 = vperm.xlu1 %5249, %v108_v3   ;;  %117 = vperm.xlu0 %5248, %v106_v4   ;;  %v5272_v15 = vld [vmem:[%s7544_s28 + $0x10] sm:$0xff]   ;;  %v186_v19 = vld [vmem:[%s7547_s6 + $0x8] sm:$0xff]  ;;  %v185_v20 = vld [vmem:[%s7547_s6] sm:$0xff]  ;;  %v4415_v23 = vsel %vm81_vm3, 1.0, %v5847_v16  ;;  %vm94_vm4 = vcmp.eq.s32.totalorder %v78_v13, 4294967293  ;;  %vm95_vm5 = vcmp.eq.s32.totalorder %v79_v14, 4294967293  ;;  %v5255_v27 = vpack.i.bf16 %v4419_v18, %v4418_v17 }
  0x15   :  { %4973 = vmatprep.subr.bf16.mxu0 %v5271_v12  ;;  %v5273_v22 = vld [vmem:[%s7544_s28 + $0x18] sm:$0xff]   ;;  %vm82_vm6 = vcmp.gt.s32.totalorder %v78_v13, 0  ;;  %v187_v25 = vld [vmem:[%s7547_s6 + $0x10] sm:$0xff]  ;;  %v5274_v26 = vld [vmem:[%s7544_s28 + $0x20] sm:$0xff]   ;;  %vm83_vm7 = vcmp.gt.s32.totalorder %v79_v14, 0  ;;  %v5250_v29 = vpack.i.bf16 %v4415_v23, %v4414_v21  ;;  %v4420_v30 = vsel %vm94_vm4, 1.0, %v5847_v16  ;;  %4996 = vmatpush3.bf16.msra.mxu1 %v5280_v40 }
  0x16   :  { %4974 = vmatpush3.bf16.msra.mxu0 %v5271_v12  ;;  %v188_v24 = vld [vmem:[%s7547_s6 + $0x18] sm:$0xff]  ;;  %v5275_v28 = vld [vmem:[%s7544_s28 + $0x28] sm:$0xff]   ;;  %v4421_v31 = vsel %vm95_vm5, 1.0, %v5847_v16  ;;  %v4416_v32 = vsel %vm82_vm6, 1.0, %v5847_v16  ;;  %v4417_v33 = vsel %vm83_vm7, 1.0, %v5847_v16  ;;  %v5276_v36 = vld [vmem:[%s7544_s28 + $0x30] sm:$0xff]   ;;  %4997 = vmatprep.subr.bf16.mxu1 %v5281_v41 }
  0x17   :  { %4975 = vmatprep.subr.bf16.mxu0 %v5272_v15  ;;  %v5265_v34 = vpack.i.bf16 %v4421_v31, %v4420_v30  ;;  %v5260_v35 = vpack.i.bf16 %v4417_v33, %v4416_v32  ;;  %v5277_v37 = vld [vmem:[%s7544_s28 + $0x38] sm:$0xff]  }
  0x18   :  { %160 = vperm.xlu1 %5249, %v149_v8   ;;  %155 = vperm.xlu0 %5248, %v148_v9  }
  0x19   :  { %4998 = vmatpush3.bf16.msra.mxu1 %v5281_v41 }
  0x1a   :  { %4976 = vmatpush3.bf16.msra.mxu0 %v5272_v15  ;;  %4999 = vmatprep.subr.bf16.mxu1 %v5282_v42 }
  0x1b   :  { %4977 = vmatprep.subr.bf16.mxu0 %v5273_v22 }
  0x1c   :  { %170 = vperm.xlu1 %5249, %v151_v10   ;;  %165 = vperm.xlu0 %5248, %v150_v11  }
  0x1d   :  { %5000 = vmatpush3.bf16.msra.mxu1 %v5282_v42 }
  0x1e   :  { %4978 = vmatpush3.bf16.msra.mxu0 %v5273_v22  ;;  %5001 = vmatprep.subr.bf16.mxu1 %v5283_v43 }
  0x1f   :  { %4979 = vmatprep.subr.bf16.mxu0 %v5274_v26 }
  0x20   :  { %197 = vperm.xlu1 %5249, %v186_v19   ;;  %192 = vperm.xlu0 %5248, %v185_v20  }
  0x21   :  { %5002 = vmatpush3.bf16.msra.mxu1 %v5283_v43 }
  0x22   :  { %4980 = vmatpush3.bf16.msra.mxu0 %v5274_v26 }
  0x23   :  { %4981 = vmatprep.subr.bf16.mxu0 %v5275_v28 }
  0x24   :  { %207 = vperm.xlu1 %5249, %v188_v24   ;;  %202 = vperm.xlu0 %5248, %v187_v25  }
  0x26   :  { %4982 = vmatpush3.bf16.msra.mxu0 %v5275_v28 }
  0x27   :  { %4983 = vmatprep.subr.bf16.mxu0 %v5276_v36 }
  0x28   :  { %5256 = vperm.xlu1 %5249, %v5255_v27   ;;  %5251 = vperm.xlu0 %5248, %v5250_v29  }
  0x2a   :  { %4984 = vmatpush3.bf16.msra.mxu0 %v5276_v36 }
  0x2b   :  { %4985 = vmatprep.subr.bf16.mxu0 %v5277_v37 }
  0x2c   :  { %5266 = vperm.xlu1 %5249, %v5265_v34   ;;  %5261 = vperm.xlu0 %5248, %v5260_v35  }
  0x2e   :  { %4986 = vmatpush3.bf16.msra.mxu0 %v5277_v37 }
  0x2f   :  { %28 = vsyncpa [#allocation3], 0  ;;  %s7548_s7 = sld [smem:[#allocation10_spill]]  ;;  %s7549_s30 = sld [smem:[#allocation11_spill]]  ;;  %v5284_v28 = vld [vmem:[%s7513_s9 + $0x30] sm:$0xff]   ;;  %v5285_v29 = vld [vmem:[%s7513_s9 + $0x38] sm:$0xff]  }
  0x30   :  { %5003 = vmatprep.subr.bf16.mxu1 %v5284_v28  ;;  %v4426_v30 = vld [vmem:[%s7512_s8] ss:$0 sm:$0xff]  ;;  %s7550_s27 = sld [smem:[#allocation6_spill]]  ;;  %vm1235_vm1 = vcmask 261120  }
  0x31   :  { %5004 = vmatpush3.bf16.msra.mxu1 %v5284_v28  ;;  %v538_v28 = vld [vmem:[%s7516_s12] sm:$0xff] }
  0x32   :  { %5005 = vmatprep.subr.bf16.mxu1 %v5285_v29 }
  0x35   :  { %v4422_v48 = vld [vmem:[%s7548_s7] ss:$0 sm:$0xff]  ;;  %v4424_v51 = vld [vmem:[%s7548_s7 + $0x1] ss:$0 sm:$0xff]  ;;  %v4425_v61 = vld [vmem:[%s7548_s7 + $0x2] ss:$0 sm:$0xff]  ;;  %5006 = vmatpush3.bf16.msra.mxu1 %v5285_v29 }
  0x36   :  { %v4423_v54 = vld [vmem:[%s7549_s30] ss:$0 sm:$0xff]  ;;  %s5848_s30 = smov [#allocation2]  }
  0x37   :  { %s4403_s25 = sshll.u32 %s5848_s30, 4  ;;  %s4404_s25 = int_to_ptr.vmem [resolvable:$true] %s4403_s25 }
  0x38   :  { %p5827_p1 = scmp.lt.s32.totalorder %s4404_s25, %s4404_s25 }
  0x8f   :  { %v123_v44 = vpop.permute.xlu1 %122  ;;  %v113_v45 = vpop.permute.xlu0 %112 }
  0x90   :  { %v134_v52 = vmul.f32 %v4422_v48, %v113_v45  ;;  %v136_v59 = vmul.f32 %v4422_v48, %v123_v44  ;;  %v5286_v45 = vld [vmem:[%s7522_s18] ss:$12 sps:$4 sm:$0xff]  }
  0x92   :  { %v144_v62 = vadd.f32 %v4423_v54, %v134_v52  ;;  %v146_v9 = vadd.f32 %v4423_v54, %v136_v59  ;;  %v476_v59 = vld [vmem:[%s7550_s27 + $0x10] sm:$0xff] }
  0x93   :  { %v128_v46 = vpop.permute.xlu1 %127  ;;  %v118_v47 = vpop.permute.xlu0 %117 }
  0x94   :  { %v135_v53 = vmul.f32 %v4422_v48, %v118_v47  ;;  %v137_v60 = vmul.f32 %v4422_v48, %v128_v46  ;;  %v5288_v46 = vld [vmem:[%s7522_s18 + $0x4] ss:$12 sps:$4 sm:$0xff]   ;;  %v5291_v47 = vld [vmem:[%s7522_s18 + $0x1c] ss:$12 sps:$4 sm:$0xff]  }
  0x95   :  { %v5292_v48 = vld [vmem:[%s7522_s18 + $0x8] ss:$12 sps:$4 sm:$0xff]   ;;  %827 = vmatprep.subr.bf16.mxu0 %v5288_v46 }
  0x96   :  { %v145_v63 = vadd.f32 %v4423_v54, %v135_v53  ;;  %v147_v10 = vadd.f32 %v4423_v54, %v137_v60  ;;  %5011 = vmatprep.subr.bf16.mxu1 %v5292_v48 }
  0x97   :  { %v161_v49 = vpop.permute.xlu1 %160  ;;  %v156_v50 = vpop.permute.xlu0 %155 }
  0x98   :  { %v178_v57 = vmul.f32 %v4424_v51, %v161_v49  ;;  %v177_v58 = vmul.f32 %v4424_v51, %v156_v50  ;;  %v5289_v49 = vld [vmem:[%s7522_s18 + $0x18] ss:$12 sps:$4 sm:$0xff]   ;;  %v5295_v50 = vld [vmem:[%s7522_s18 + $0x34] ss:$12 sps:$4 sm:$0xff]  }
  0x9a   :  { %v182_v5 = vadd.f32 %v178_v57, %v145_v63  ;;  %v181_v6 = vadd.f32 %v177_v58, %v144_v62 }
  0x9b   :  { %v171_v55 = vpop.permute.xlu1 %170  ;;  %v166_v56 = vpop.permute.xlu0 %165 }
  0x9c   :  { %v180_v0 = vmul.f32 %v4424_v51, %v171_v55  ;;  %v179_v1 = vmul.f32 %v4424_v51, %v166_v56  ;;  %v5293_v51 = vld [vmem:[%s7522_s18 + $0x30] ss:$12 sps:$4 sm:$0xff]   ;;  %v4435_v56 = vld [vmem:[%s7514_s10] ss:$0 sm:$0xff] }
  0x9e   :  { %v184_v13 = vadd.f32 %v180_v0, %v147_v10  ;;  %v183_v14 = vadd.f32 %v179_v1, %v146_v9  ;;  %v477_v9 = vld [vmem:[%s7550_s27 + $0x18] sm:$0xff] }
  0x9f   :  { %v198_v3 = vpop.permute.xlu1 %197  ;;  %v193_v4 = vpop.permute.xlu0 %192 }
  0xa0   :  { %v215_v7 = vmul.f32 %v4425_v61, %v198_v3  ;;  %v214_v8 = vmul.f32 %v4425_v61, %v193_v4 }
  0xa2   :  { %v218_v11 = vadd.f32 %v214_v8, %v181_v6  ;;  %v219_v12 = vadd.f32 %v215_v7, %v182_v5  ;;  %v475_v7 = vld [vmem:[%s7550_s27 + $0x8] sm:$0xff] }
  0xa3   :  { %v208_v15 = vpop.permute.xlu1 %207  ;;  %v203_v17 = vpop.permute.xlu0 %202 }
  0xa4   :  { %v217_v18 = vmul.f32 %v4425_v61, %v208_v15  ;;  %v216_v19 = vmul.f32 %v4425_v61, %v203_v17  ;;  %v222_v20 = vmax.f32 %v218_v11, 0.0  ;;  %v223_v21 = vmax.f32 %v219_v12, 0.0  ;;  %v474_v61 = vld [vmem:[%s7550_s27] sm:$0xff] }
  0xa6   :  { %v221_v22 = vadd.f32 %v217_v18, %v184_v13  ;;  %v220_v23 = vadd.f32 %v216_v19, %v183_v14  ;;  %v226_v24 = vpack.c.bf16 %v223_v21, %v222_v20  ;;  %v532_v20 = vld [vmem:[%s7515_s11 + $0x10] sm:$0xff]  ;;  %v530_v21 = vld [vmem:[%s7515_s11] sm:$0xff] }
  0xa7   :  { %v5252_v52 = vpop.permute.xlu0 %5251  ;;  %v5257_v53 = vpop.permute.xlu1 %5256 }
  0xa8   :  { %v225_v25 = vmax.f32 %v221_v22, 0.0  ;;  %v224_v26 = vmax.f32 %v220_v23, 0.0  ;;  %4987 = vmatprep.mubr.bf16.mxu0 %v226_v24  ;;  %v5253_v58 = vunpack.i.l.bf16 %v5252_v52  ;;  %v5258_v1 = vunpack.i.l.bf16 %v5257_v53 }
  0xa9   :  { %v5254_v3 = vunpack.i.h.bf16 %v5252_v52  ;;  %v5259_v14 = vunpack.i.h.bf16 %v5257_v53  ;;  %v5301_v52 = vld [vmem:[%s7522_s18 + $0x60] ss:$12 sps:$4 sm:$0xff]   ;;  %v5304_v53 = vld [vmem:[%s7522_s18 + $0x50] ss:$12 sps:$4 sm:$0xff]  }
  0xaa   :  { %v227_v27 = vpack.c.bf16 %v225_v25, %v224_v26  ;;  %v498_v15 = vmul.f32 %v5253_v58, %v474_v61  ;;  %v5309_v58 = vld [vmem:[%s7522_s18 + $0x90] ss:$12 sps:$4 sm:$0xff]   ;;  %v5316_v61 = vld [vmem:[%s7522_s18 + $0x98] ss:$12 sps:$4 sm:$0xff]  }
  0xab   :  { %v5262_v54 = vpop.permute.xlu0 %5261  ;;  %v5267_v55 = vpop.permute.xlu1 %5266  ;;  %v499_v23 = vmul.f32 %v5254_v3, %v475_v7 }
  0xac   :  { %4988 = vmatmul.mubr.bf16.vlgmr.msra.gmra.mrb[0].mxu0 %v227_v27  ;;  %v5263_v57 = vunpack.i.l.bf16 %v5262_v54  ;;  %v5268_v62 = vunpack.i.l.bf16 %v5267_v55  ;;  %v5264_v4 = vunpack.i.h.bf16 %v5262_v54  ;;  %v5269_v8 = vunpack.i.h.bf16 %v5267_v55  ;;  %v531_v27 = vld [vmem:[%s7515_s11 + $0x8] sm:$0xff]  ;;  %v5305_v55 = vld [vmem:[%s7522_s18 + $0x78] ss:$12 sps:$4 sm:$0xff]  }
  0xad   :  { %859 = vmatprep.mubr.bf16.mxu0 %v5846_v2  ;;  %828 = vmatpush1.bf16.msra.mxu0 %v5286_v45  ;;  %v5307_v54 = vld [vmem:[%s7522_s18 + $0x7c] ss:$12 sps:$4 sm:$0xff]  }
  0xae   :  { %829 = vmatprep.subr.bf16.mxu0 %v5291_v47  ;;  %v500_v10 = vmul.f32 %v5263_v57, %v476_v59  ;;  %v501_v24 = vmul.f32 %v5264_v4, %v477_v9  ;;  %v5296_v47 = vld [vmem:[%s7522_s18 + $0x20] ss:$12 sps:$4 sm:$0xff]  }
  0xaf   :  { %v5311_v57 = vld [vmem:[%s7522_s18 + $0x94] ss:$12 sps:$4 sm:$0xff]  }
  0xb0   :  { %v5312_v59 = vld [vmem:[%s7522_s18 + $0x80] ss:$12 sps:$4 sm:$0xff]  }
  0xb1   :  { %830 = vmatpush1.bf16.msra.mxu0 %v5289_v49  ;;  %v5297_v49 = vld [vmem:[%s7522_s18 + $0x48] ss:$12 sps:$4 sm:$0xff]  }
  0xb2   :  { %831 = vmatprep.subr.bf16.mxu0 %v5295_v50  ;;  %v5300_v50 = vld [vmem:[%s7522_s18 + $0x38] ss:$12 sps:$4 sm:$0xff]  }
  0xb5   :  { %832 = vmatpush1.bf16.msra.mxu0 %v5293_v51  ;;  %v5303_v51 = vld [vmem:[%s7522_s18 + $0x64] ss:$12 sps:$4 sm:$0xff]  }
 0x17f   :  { %v4989_v31 = vpop.f32.mrb[0].mxu0 }
 0x180   :  { %v342_v32 = vadd.f32 %v4989_v31, %v4426_v30  ;;  %v333_v33 = vpop.f32.mrb[1].mxu0 }
 0x181   :  { %v334_v34 = vadd.f32 %v4426_v30, %v333_v33  ;;  %v4990_v35 = vpop.f32.mrb[2].mxu0  ;;  %v533_v33 = vld [vmem:[%s7515_s11 + $0x18] sm:$0xff] }
 0x182   :  { %v345_v36 = vadd.f32 %v4990_v35, %v4426_v30  ;;  %v336_v37 = vpop.f32.mrb[3].mxu0  ;;  %v350_v39 = vmax.f32 %v342_v32, 0.0  ;;  %v540_v35 = vld [vmem:[%s7516_s12 + $0x10] sm:$0xff] }
 0x183   :  { %v337_v38 = vadd.f32 %v4426_v30, %v336_v37  ;;  %v348_v41 = vmax.f32 %v334_v34, 0.0  ;;  %v539_v34 = vld [vmem:[%s7516_s12 + $0x8] sm:$0xff] }
 0x184   :  { %v351_v40 = vmax.f32 %v345_v36, 0.0 }
 0x185   :  { %v349_v42 = vmax.f32 %v337_v38, 0.0 }
 0x186   :  { %v353_v43 = vpack.c.bf16 %v351_v40, %v350_v39 }
 0x187   :  { %v352_v44 = vpack.c.bf16 %v349_v42, %v348_v41  ;;  %v541_v42 = vld [vmem:[%s7516_s12 + $0x18] sm:$0xff] }
 0x189   :  { %5007 = vmatprep.mubr.bf16.mxu1 %v352_v44 }
 0x18a   :  { %5008 = vmatmul.mubr.bf16.vlgmr.msra.gmra.mrb[0].mxu1 %v353_v43 }
 0x18b   :  { %5012 = vmatpush3.bf16.msra.mxu1 %v5292_v48  ;;  %v5299_v48 = vld [vmem:[%s7522_s18 + $0x4c] ss:$12 sps:$4 sm:$0xff]  }
 0x18c   :  { %5013 = vmatprep.subr.bf16.mxu1 %v5296_v47  ;;  %833 = vmatprep.subr.bf16.mxu0 %v5299_v48  ;;  %v5339_v48 = vld [vmem:[%s7519_s15 + $0x70] ss:$8 sps:$4 sm:$0xff]  }
 0x18d   :  { %834 = vmatpush1.bf16.msra.mxu0 %v5297_v49  ;;  %v5344_v49 = vld [vmem:[%s7519_s15 + $0x84] ss:$8 sps:$4 sm:$0xff]  }
 0x18e   :  { %835 = vmatprep.subr.bf16.mxu0 %v5303_v51  ;;  %v5347_v51 = vld [vmem:[%s7519_s15 + $0x94] ss:$8 sps:$4 sm:$0xff]  }
 0x18f   :  { %5014 = vmatpush3.bf16.msra.mxu1 %v5296_v47  ;;  %v5341_v47 = vld [vmem:[%s7519_s15 + $0x74] ss:$8 sps:$4 sm:$0xff]  }
 0x190   :  { %5015 = vmatprep.subr.bf16.mxu1 %v5300_v50 }
 0x191   :  { %836 = vmatpush1.bf16.msra.mxu0 %v5301_v52  ;;  %v5345_v52 = vld [vmem:[%s7519_s15 + $0x90] ss:$8 sps:$4 sm:$0xff]  }
 0x192   :  { %837 = vmatprep.subr.bf16.mxu0 %v5307_v54  ;;  %v5348_v54 = vld [vmem:[%s7519_s15 + $0xa0] ss:$8 sps:$4 sm:$0xff]  }
 0x193   :  { %5016 = vmatpush3.bf16.msra.mxu1 %v5300_v50  ;;  %v5342_v50 = vld [vmem:[%s7519_s15 + $0x80] ss:$8 sps:$4 sm:$0xff]  }
 0x194   :  { %5017 = vmatprep.subr.bf16.mxu1 %v5304_v53 }
 0x195   :  { %838 = vmatpush1.bf16.msra.mxu0 %v5305_v55  ;;  %v5353_v55 = vld [vmem:[%s7519_s15 + $0xb4] ss:$8 sps:$4 sm:$0xff]  }
 0x196   :  { %839 = vmatprep.subr.bf16.mxu0 %v5311_v57  ;;  %v5356_v57 = vld [vmem:[%s7519_s15 + $0xc4] ss:$8 sps:$4 sm:$0xff]  }
 0x197   :  { %5018 = vmatpush3.bf16.msra.mxu1 %v5304_v53  ;;  %v5350_v53 = vld [vmem:[%s7519_s15 + $0xa4] ss:$8 sps:$4 sm:$0xff]  }
 0x199   :  { %840 = vmatpush1.bf16.msra.mxu0 %v5309_v58  ;;  %v5354_v58 = vld [vmem:[%s7519_s15 + $0xc0] ss:$8 sps:$4 sm:$0xff]  }
 0x25d   :  { %v5009_v60 = vpop.f32.mrb[0].mxu1 }
 0x25e   :  { %v468_v63 = vadd.f32 %v5009_v60, %v4435_v56  ;;  %v459_v0 = vpop.f32.mrb[1].mxu1  ;;  %v5315_v60 = vld [vmem:[%s7522_s18 + $0xac] ss:$12 sps:$4 sm:$0xff]  }
 0x25f   :  { %v460_v5 = vadd.f32 %v4435_v56, %v459_v0  ;;  %v5010_v6 = vpop.f32.mrb[2].mxu1  ;;  %841 = vmatprep.subr.bf16.mxu0 %v5315_v60  ;;  %v5320_v0 = vld [vmem:[%s7519_s15 + $0x4] ss:$8 sps:$4 sm:$0xff]   ;;  %v5357_v60 = vld [vmem:[%s7519_s15 + $0xd0] ss:$8 sps:$4 sm:$0xff]  }
 0x260   :  { %v524_v11 = vmul.f32 %v5268_v62, %v468_v63  ;;  %v471_v12 = vadd.f32 %v5010_v6, %v4435_v56  ;;  %v462_v13 = vpop.f32.mrb[3].mxu1  ;;  %v5313_v62 = vld [vmem:[%s7522_s18 + $0xa8] ss:$12 sps:$4 sm:$0xff]   ;;  %v5317_v63 = vld [vmem:[%s7522_s18 + $0xb0] ss:$12 sps:$4 sm:$0xff]  }
 0x261   :  { %v522_v17 = vmul.f32 %v5258_v1, %v460_v5  ;;  %v463_v18 = vadd.f32 %v4435_v56, %v462_v13  ;;  %v5308_v56 = vld [vmem:[%s7522_s18 + $0x68] ss:$12 sps:$4 sm:$0xff]   ;;  %842 = vmatpush1.bf16.msra.mxu0 %v5313_v62 }
 0x262   :  { %v528_v19 = vadd.f32 %v524_v11, %v500_v10  ;;  %v525_v22 = vmul.f32 %v5269_v8, %v471_v12  ;;  %5019 = vmatprep.subr.bf16.mxu1 %v5308_v56  ;;  %1101 = vmatprep.subr.bf16.mxu0 %v5320_v0  ;;  %v5360_v62 = vld [vmem:[%s7519_s15 + $0xe0] ss:$8 sps:$4 sm:$0xff]   ;;  %v5363_v0 = vld [vmem:[%s7519_s15 + $0xf0] ss:$8 sps:$4 sm:$0xff]  }
 0x263   :  { %v526_v25 = vadd.f32 %v522_v17, %v498_v15  ;;  %v523_v26 = vmul.f32 %v5259_v14, %v463_v18  ;;  %5020 = vmatpush3.bf16.msra.mxu1 %v5308_v56  ;;  %v4448_v18 = vld [vmem:[%s7521_s17] ss:$0 sm:$0xff]  ;;  %v5351_v56 = vld [vmem:[%s7519_s15 + $0xb0] ss:$8 sps:$4 sm:$0xff]  }
 0x264   :  { %v536_v29 = vadd.f32 %v532_v20, %v528_v19  ;;  %v529_v31 = vadd.f32 %v525_v22, %v501_v24  ;;  %5021 = vmatprep.subr.bf16.mxu1 %v5312_v59 }
 0x265   :  { %v534_v30 = vadd.f32 %v530_v21, %v526_v25  ;;  %v527_v32 = vadd.f32 %v523_v26, %v499_v23  ;;  %v5318_v23 = vld [vmem:[%s7519_s15] ss:$8 sps:$4 sm:$0xff]   ;;  %v5323_v26 = vld [vmem:[%s7519_s15 + $0x14] ss:$8 sps:$4 sm:$0xff]  }
 0x266   :  { %v537_v38 = vadd.f32 %v533_v33, %v529_v31  ;;  %v6160_v41 = vadd.f32 %v540_v35, %v536_v29  ;;  %v5321_v29 = vld [vmem:[%s7519_s15 + $0x10] ss:$8 sps:$4 sm:$0xff]   ;;  %v5329_v35 = vld [vmem:[%s7519_s15 + $0x34] ss:$8 sps:$4 sm:$0xff]  }
 0x267   :  { %v535_v36 = vadd.f32 %v531_v27, %v527_v32  ;;  %v6154_v37 = vadd.f32 %v538_v28, %v534_v30  ;;  %5022 = vmatpush3.bf16.msra.mxu1 %v5312_v59  ;;  %v5326_v32 = vld [vmem:[%s7519_s15 + $0x24] ss:$8 sps:$4 sm:$0xff]   ;;  %v5359_v59 = vld [vmem:[%s7519_s15 + $0xd4] ss:$8 sps:$4 sm:$0xff]  }
 0x268   :  { %v628_v44 = vmul.f32 %v6160_v41, %v6160_v41  ;;  %v6169_v45 = vadd.f32 %v541_v42, %v537_v38  ;;  %5023 = vmatprep.subr.bf16.mxu1 %v5316_v61  ;;  %v5332_v38 = vld [vmem:[%s7519_s15 + $0x44] ss:$8 sps:$4 sm:$0xff]   ;;  %v5335_v42 = vld [vmem:[%s7519_s15 + $0x54] ss:$8 sps:$4 sm:$0xff]  }
 0x269   :  { %v626_v39 = vmul.f32 %v6154_v37, %v6154_v37  ;;  %v6158_v40 = vadd.f32 %v539_v34, %v535_v36  ;;  %v5324_v34 = vld [vmem:[%s7519_s15 + $0x20] ss:$8 sps:$4 sm:$0xff]   ;;  %v5327_v36 = vld [vmem:[%s7519_s15 + $0x30] ss:$8 sps:$4 sm:$0xff]  }
 0x26a   :  { %v629_v46 = vmul.f32 %v6169_v45, %v6169_v45 }
 0x26b   :  { %630 = vadd.xlane.f32.xlu0 %v626_v39  ;;  %v627_v43 = vmul.f32 %v6158_v40, %v6158_v40  ;;  %5024 = vmatpush3.bf16.msra.mxu1 %v5316_v61  ;;  %v5330_v39 = vld [vmem:[%s7519_s15 + $0x40] ss:$8 sps:$4 sm:$0xff]   ;;  %v5362_v61 = vld [vmem:[%s7519_s15 + $0xe4] ss:$8 sps:$4 sm:$0xff]  }
 0x26c   :  { %5025 = vmatprep.subr.bf16.mxu1 %v5317_v63 }
 0x26d   :  { %632 = vadd.xlane.f32.xlu1 %v627_v43  ;;  %v5333_v43 = vld [vmem:[%s7519_s15 + $0x50] ss:$8 sps:$4 sm:$0xff]  }
 0x26f   :  { %634 = vadd.xlane.f32.xlu0 %v628_v44  ;;  %5026 = vmatpush3.bf16.msra.mxu1 %v5317_v63  ;;  %v5338_v44 = vld [vmem:[%s7519_s15 + $0x64] ss:$8 sps:$4 sm:$0xff]   ;;  %v5365_v63 = vld [vmem:[%s7519_s15 + $0xf4] ss:$8 sps:$4 sm:$0xff]  }
 0x273   :  { %636 = vadd.xlane.f32.xlu0 %v629_v46  ;;  %v5336_v46 = vld [vmem:[%s7519_s15 + $0x60] ss:$8 sps:$4 sm:$0xff]  }
 0x2f8   :  { %v631_v1 = vpop.xlane.xlu0 %630 }
 0x2f9   :  { %v639_v3 = vmul.f32 0.0078125, %v631_v1  ;;  %v546_v1 = vlaneseq }
 0x2fa   :  { %v633_v4 = vpop.xlane.xlu1 %632 }
 0x2fb   :  { %v643_v5 = vadd.f32 1e-05, %v639_v3  ;;  %v640_v6 = vmul.f32 0.0078125, %v633_v4  ;;  %v6329_v3 = vand.u32 127, %v546_v1 }
 0x2fc   :  { %v635_v7 = vpop.xlane.xlu0 %634 }
 0x2fd   :  { %5542 = vrsqrt.f32 %v643_v5  ;;  %v644_v8 = vadd.f32 1e-05, %v640_v6  ;;  %v641_v9 = vmul.f32 0.0078125, %v635_v7  ;;  %vm562_vm8 = vcmp.ge.s32.totalorder %v6329_v3, 32 }
 0x2fe   :  { %vm563_vm9 = vcmp.lt.s32.totalorder %v6329_v3, 64  ;;  %vm567_vm10 = vcmp.ge.s32.totalorder %v6329_v3, 64  ;;  %vm568_vm11 = vcmp.lt.s32.totalorder %v6329_v3, 96  ;;  %vm558_vm13 = vcmp.lt.s32.totalorder %v6329_v3, 32 }
 0x2ff   :  { %5544 = vrsqrt.f32 %v644_v8  ;;  %v645_v10 = vadd.f32 1e-05, %v641_v9  ;;  %vm564_vm12 = vmand %vm562_vm8, %vm563_vm9  ;;  %vm572_vm15 = vcmp.ge.s32.totalorder %v6329_v3, 96 }
 0x300   :  { %v637_v11 = vpop.xlane.xlu0 %636  ;;  %vm569_vm14 = vmand %vm567_vm10, %vm568_vm11 }
 0x301   :  { %5546 = vrsqrt.f32 %v645_v10  ;;  %v642_v12 = vmul.f32 0.0078125, %v637_v11  ;;  %v6347_v10 = vsel %vm558_vm13, 1.0, %v5847_v16  ;;  %v6350_v11 = vsel %vm564_vm12, 1.0, %v5847_v16 }
 0x303   :  { %v646_v13 = vadd.f32 1e-05, %v642_v12  ;;  %v6353_v12 = vsel %vm569_vm14, 1.0, %v5847_v16 }
 0x305   :  { %5548 = vrsqrt.f32 %v646_v13  ;;  %v6356_v13 = vsel %vm572_vm15, 1.0, %v5847_v16 }
 0x307   :  { %v5543_v14 = vpop.eup %5542 }
 0x308   :  { %v651_v15 = vmul.f32 %v5543_v14, %v6154_v37 }
 0x309   :  { %v5545_v17 = vpop.eup %5544 }
 0x30a   :  { %v652_v19 = vmul.f32 %v5545_v17, %v6158_v40  ;;  %v661_v21 = vmul.f32 %v4448_v18, %v651_v15 }
 0x30b   :  { %v5547_v20 = vpop.eup %5546 }
 0x30c   :  { %v662_v22 = vmul.f32 %v4448_v18, %v652_v19  ;;  %v653_v25 = vmul.f32 %v5547_v20, %v6160_v41 }
 0x30e   :  { %v665_v24 = vpack.c.bf16 %v662_v22, %v661_v21  ;;  %v663_v30 = vmul.f32 %v4448_v18, %v653_v25 }
 0x30f   :  { %v5549_v27 = vpop.eup %5548 }
 0x310   :  { %860 = vmatmul.mubr.bf16.vlgmr.msra.gmra.mrb[4].mxu0 %v665_v24  ;;  %5027 = vmatprep.mubr.bf16.mxu1 %v665_v24  ;;  %v654_v28 = vmul.f32 %v5549_v27, %v6169_v45 }
 0x311   :  { %869 = vmatprep.mubr.bf16.mxu0 %v5846_v2  ;;  %1102 = vmatpush1.bf16.msra.mxu0 %v5318_v23 }
 0x312   :  { %v664_v31 = vmul.f32 %v4448_v18, %v654_v28  ;;  %1103 = vmatprep.subr.bf16.mxu0 %v5323_v26 }
 0x314   :  { %v666_v33 = vpack.c.bf16 %v664_v31, %v663_v30 }
 0x315   :  { %1104 = vmatpush1.bf16.msra.mxu0 %v5321_v29 }
 0x316   :  { %5028 = vmatmul.mubr.bf16.vlgmr.msra.gmra.mrb[4].mxu1 %v666_v33  ;;  %1105 = vmatprep.subr.bf16.mxu0 %v5326_v32 }
 0x318   :  { %870 = vmatmul.mubr.bf16.gmra.mrb[8].mxu0 %v666_v33 }
 0x319   :  { %1106 = vmatpush1.bf16.msra.mxu0 %v5324_v34 }
 0x31a   :  { %1107 = vmatprep.subr.bf16.mxu0 %v5329_v35 }
 0x31d   :  { %1108 = vmatpush1.bf16.msra.mxu0 %v5327_v36 }
 0x31e   :  { %1109 = vmatprep.subr.bf16.mxu0 %v5332_v38 }
 0x321   :  { %1110 = vmatpush1.bf16.msra.mxu0 %v5330_v39 }
 0x322   :  { %1111 = vmatprep.subr.bf16.mxu0 %v5335_v42 }
 0x325   :  { %1112 = vmatpush1.bf16.msra.mxu0 %v5333_v43 }
 0x326   :  { %1113 = vmatprep.subr.bf16.mxu0 %v5338_v44 }
 0x329   :  { %1114 = vmatpush1.bf16.msra.mxu0 %v5336_v46 }
 0x32a   :  { %1115 = vmatprep.subr.bf16.mxu0 %v5341_v47 }
 0x32d   :  { %1116 = vmatpush1.bf16.msra.mxu0 %v5339_v48 }
 0x32e   :  { %1117 = vmatprep.subr.bf16.mxu0 %v5344_v49 }
 0x331   :  { %1118 = vmatpush1.bf16.msra.mxu0 %v5342_v50 }
 0x332   :  { %1119 = vmatprep.subr.bf16.mxu0 %v5347_v51 }
 0x335   :  { %1120 = vmatpush1.bf16.msra.mxu0 %v5345_v52  ;;  %v577_v52 = vld [vmem:[%s7517_s13] sm:$0xff] }
 0x336   :  { %1121 = vmatprep.subr.bf16.mxu0 %v5350_v53  ;;  %v585_v53 = vld [vmem:[%s7518_s14] sm:$0xff] }
 0x339   :  { %1122 = vmatpush1.bf16.msra.mxu0 %v5348_v54  ;;  %v578_v54 = vld [vmem:[%s7517_s13 + $0x8] sm:$0xff] }
 0x33a   :  { %1123 = vmatprep.subr.bf16.mxu0 %v5353_v55  ;;  %v586_v55 = vld [vmem:[%s7518_s14 + $0x8] sm:$0xff] }
 0x33d   :  { %1124 = vmatpush1.bf16.msra.mxu0 %v5351_v56  ;;  %v579_v56 = vld [vmem:[%s7517_s13 + $0x10] sm:$0xff] }
 0x33e   :  { %1125 = vmatprep.subr.bf16.mxu0 %v5356_v57 }
 0x341   :  { %1126 = vmatpush1.bf16.msra.mxu0 %v5354_v58  ;;  %v587_v58 = vld [vmem:[%s7518_s14 + $0x10] sm:$0xff] }
 0x342   :  { %1127 = vmatprep.subr.bf16.mxu0 %v5359_v59 }
 0x345   :  { %1128 = vmatpush1.bf16.msra.mxu0 %v5357_v60  ;;  %v580_v60 = vld [vmem:[%s7517_s13 + $0x18] sm:$0xff] }
 0x346   :  { %1129 = vmatprep.subr.bf16.mxu0 %v5362_v61 }
 0x349   :  { %1130 = vmatpush1.bf16.msra.mxu0 %v5360_v62 }
 0x34a   :  { %1131 = vmatprep.subr.bf16.mxu0 %v5365_v63  ;;  %v588_v63 = vld [vmem:[%s7518_s14 + $0x18] sm:$0xff] }
 0x34d   :  { %1132 = vmatpush1.bf16.msra.mxu0 %v5363_v0 }
 0x3e3   :  { %v861_v4 = vpop.f32.mrb[4].mxu0 }
 0x3e4   :  { %v6335_v5 = vpop.f32.mrb[5].mxu0  ;;  %v929_v59 = vmul.f32 %v861_v4, %v577_v52 }
 0x3e5   :  { %v6337_v6 = vpop.f32.mrb[6].mxu0  ;;  %v930_v0 = vmul.f32 %v6335_v5, %v578_v54  ;;  %v592_v54 = vld [vmem:[%s7518_s14 + $0x38] sm:$0xff] }
 0x3e6   :  { %v937_v7 = vpack.c.bf16 %v6337_v6, %v861_v4  ;;  %v6342_v8 = vpop.f32.mrb[7].mxu0  ;;  %v581_v4 = vld [vmem:[%s7517_s13 + $0x20] sm:$0xff] }
 0x3e7   :  { %v938_v9 = vpack.c.bf16 %v6342_v8, %v6335_v5  ;;  %v582_v5 = vld [vmem:[%s7517_s13 + $0x28] sm:$0xff] }
 0x3e9   :  { %v5029_v14 = vpop.f32.mrb[4].mxu1  ;;  %1133 = vmatprep.mubr.bf16.mxu0 %v938_v9 }
 0x3ea   :  { %v914_v15 = vpop.f32.mrb[5].mxu1  ;;  %1134 = vmatmul.mubr.bf16.vlgmr.msra.gmra.mrb[12].mxu0 %v937_v7  ;;  %v1284_v17 = vmul.f32 %v5029_v14, %v6347_v10  ;;  %v1399_v18 = vmul.f32 %v5029_v14, %v6350_v11  ;;  %v1624_v19 = vmul.f32 %v5029_v14, %v6353_v12  ;;  %v1798_v20 = vmul.f32 %v5029_v14, %v6356_v13 }
 0x3eb   :  { %v871_v21 = vpop.f32.mrb[8].mxu0  ;;  %v5030_v22 = vpop.f32.mrb[6].mxu1  ;;  %v1282_v23 = vmul.f32 %v6347_v10, %v914_v15  ;;  %v1397_v28 = vmul.f32 %v6350_v11, %v914_v15  ;;  %v1622_v33 = vmul.f32 %v6353_v12, %v914_v15  ;;  %v1796_v39 = vmul.f32 %v6356_v13, %v914_v15 }
 0x3ec   :  { %v1285_v24 = vmul.f32 %v5030_v22, %v6347_v10  ;;  %v1400_v16 = vmul.f32 %v5030_v22, %v6350_v11  ;;  %v1625_v25 = vmul.f32 %v5030_v22, %v6353_v12  ;;  %v6366_v26 = vpop.f32.mrb[9].mxu0  ;;  %v917_v27 = vpop.f32.mrb[7].mxu1  ;;  %v1799_v29 = vmul.f32 %v5030_v22, %v6356_v13 }
 0x3ed   :  { %v1283_v30 = vmul.f32 %v6347_v10, %v917_v27  ;;  %v1398_v31 = vmul.f32 %v6350_v11, %v917_v27  ;;  %v6372_v32 = vpop.f32.mrb[10].mxu0  ;;  %v1623_v34 = vmul.f32 %v6353_v12, %v917_v27  ;;  %v1797_v35 = vmul.f32 %v6356_v13, %v917_v27  ;;  %v590_v27 = vld [vmem:[%s7518_s14 + $0x28] sm:$0xff] }
 0x3ee   :  { %v939_v36 = vpack.c.bf16 %v6372_v32, %v871_v21  ;;  %v6378_v38 = vpop.f32.mrb[11].mxu0  ;;  %v6385_v44 = vpack.c.bf16 %v1400_v16, %v1399_v18  ;;  %v6389_v47 = vpack.c.bf16 %v1285_v24, %v1284_v17  ;;  %v6393_v49 = vpack.c.bf16 %v1625_v25, %v1624_v19 }
 0x3ef   :  { %v940_v42 = vpack.c.bf16 %v6378_v38, %v6366_v26  ;;  %v6383_v43 = vpack.c.bf16 %v1398_v31, %v1397_v28  ;;  %v6387_v46 = vpack.c.bf16 %v1283_v30, %v1282_v23  ;;  %v6391_v48 = vpack.c.bf16 %v1623_v34, %v1622_v33  ;;  %v591_v31 = vld [vmem:[%s7518_s14 + $0x30] sm:$0xff] }
 0x3f0   :  { %v6395_v50 = vpack.c.bf16 %v1797_v35, %v1796_v39  ;;  %v6397_v51 = vpack.c.bf16 %v1799_v29, %v1798_v20  ;;  %v931_v14 = vmul.f32 %v6337_v6, %v579_v56  ;;  %v932_v19 = vmul.f32 %v6342_v8, %v580_v60  ;;  %v589_v6 = vld [vmem:[%s7518_s14 + $0x20] sm:$0xff]  ;;  %v583_v29 = vld [vmem:[%s7517_s13 + $0x30] sm:$0xff] }
 0x3f1   :  { %1143 = vmatprep.mubr.bf16.mxu0 %v940_v42  ;;  %v933_v24 = vmul.f32 %v871_v21, %v581_v4  ;;  %v934_v39 = vmul.f32 %v6366_v26, %v582_v5  ;;  %v584_v42 = vld [vmem:[%s7517_s13 + $0x38] sm:$0xff]  ;;  %v935_v60 = vmul.f32 %v6372_v32, %v583_v29 }
 0x3f2   :  { %1144 = vmatmul.mubr.bf16.gmra.mrb[16].mxu0 %v939_v36 }
 0x4bd   :  { %v1135_v57 = vpop.f32.mrb[12].mxu0 }
 0x4be   :  { %v1154_v61 = vmul.f32 %v1135_v57, %v585_v53  ;;  %v1137_v62 = vpop.f32.mrb[13].mxu0 }
 0x4bf   :  { %v1155_v7 = vmul.f32 %v1137_v62, %v586_v55  ;;  %v1139_v9 = vpop.f32.mrb[14].mxu0 }
 0x4c0   :  { %v1162_v15 = vadd.f32 %v1154_v61, %v929_v59  ;;  %v1156_v17 = vmul.f32 %v1139_v9, %v587_v58  ;;  %v1141_v18 = vpop.f32.mrb[15].mxu0 }
 0x4c1   :  { %v1163_v20 = vadd.f32 %v1155_v7, %v930_v0  ;;  %v1157_v22 = vmul.f32 %v1141_v18, %v588_v63  ;;  %v936_v7 = vmul.f32 %v6378_v38, %v584_v42 }
 0x4c2   :  { %v1164_v23 = vadd.f32 %v1156_v17, %v931_v14 }
 0x4c3   :  { %v1165_v16 = vadd.f32 %v1157_v22, %v932_v19  ;;  %v1172_v8 = vmul.f32 %v6347_v10, %v1163_v20  ;;  %v1687_v28 = vmul.f32 %v6356_v13, %v1163_v20  ;;  %v1288_v21 = vmul.f32 %v6350_v11, %v1163_v20 }
 0x4c4   :  { %v6435_v25 = vpack.c.bf16 %v1164_v23, %v1162_v15  ;;  %v1513_v55 = vmul.f32 %v6353_v12, %v1163_v20 }
 0x4c5   :  { %v1145_v30 = vpop.f32.mrb[16].mxu0  ;;  %v1173_v33 = vmul.f32 %v6347_v10, %v1165_v16  ;;  %v1688_v34 = vmul.f32 %v6356_v13, %v1165_v16  ;;  %v1289_v35 = vmul.f32 %v6350_v11, %v1165_v16  ;;  %v1514_v36 = vmul.f32 %v6353_v12, %v1165_v16 }
 0x4c6   :  { %v1158_v52 = vmul.f32 %v1145_v30, %v589_v6  ;;  %v1147_v53 = vpop.f32.mrb[17].mxu0  ;;  %5035 = vmatprep.mubr.bf16.mxu1 %v6435_v25  ;;  %5083 = vmatprep.mubr.bf16.mxu0 %v6435_v25 }
 0x4c7   :  { %v1159_v56 = vmul.f32 %v1147_v53, %v590_v27  ;;  %v1149_v57 = vpop.f32.mrb[18].mxu0  ;;  %v1176_v58 = vpack.c.bf16 %v1173_v33, %v1172_v8  ;;  %v1691_v26 = vpack.c.bf16 %v1688_v34, %v1687_v28  ;;  %v1292_v59 = vpack.c.bf16 %v1289_v35, %v1288_v21 }
 0x4c8   :  { %v1166_v61 = vadd.f32 %v1158_v52, %v933_v24  ;;  %v1160_v62 = vmul.f32 %v1149_v57, %v591_v31  ;;  %v1151_v63 = vpop.f32.mrb[19].mxu0  ;;  %v6464_v0 = vpack.c.bf16 %v1514_v36, %v1513_v55 }
 0x4c9   :  { %v1167_v9 = vadd.f32 %v1159_v56, %v934_v39  ;;  %v1161_v14 = vmul.f32 %v1151_v63, %v592_v54  ;;  %5031 = vmatprep.subr.bf16.mxu1 %v1176_v58  ;;  %5079 = vmatprep.subr.bf16.mxu0 %v1691_v26 }
 0x4ca   :  { %v1168_v4 = vadd.f32 %v1160_v62, %v935_v60  ;;  %5032 = vmatpush3.bf16.xpose.msra.mxu1 %v1176_v58  ;;  %5080 = vmatpush3.bf16.xpose.msra.mxu0 %v1691_v26 }
 0x4cb   :  { %v1169_v15 = vadd.f32 %v1161_v14, %v936_v7  ;;  %v1174_v17 = vmul.f32 %v6347_v10, %v1167_v9  ;;  %v1689_v32 = vmul.f32 %v6356_v13, %v1167_v9  ;;  %v1290_v19 = vmul.f32 %v6350_v11, %v1167_v9 }
 0x4cc   :  { %v6468_v18 = vpack.c.bf16 %v1168_v4, %v1166_v61  ;;  %v1515_v20 = vmul.f32 %v6353_v12, %v1167_v9 }
 0x4cd   :  { %v1175_v38 = vmul.f32 %v6347_v10, %v1169_v15  ;;  %v1690_v22 = vmul.f32 %v6356_v13, %v1169_v15  ;;  %v1291_v23 = vmul.f32 %v6350_v11, %v1169_v15  ;;  %v1516_v24 = vmul.f32 %v6353_v12, %v1169_v15 }
 0x4cf   :  { %v1177_v5 = vpack.c.bf16 %v1175_v38, %v1174_v17  ;;  %v1692_v16 = vpack.c.bf16 %v1690_v22, %v1689_v32  ;;  %v1293_v6 = vpack.c.bf16 %v1291_v23, %v1290_v19  ;;  %v6477_v27 = vpack.c.bf16 %v1516_v24, %v1515_v20 }
 0x4d1   :  { %5033 = vmatprep.subr.bf16.mxu1 %v1177_v5  ;;  %5081 = vmatprep.subr.bf16.mxu0 %v1692_v16 }
 0x4d2   :  { %5034 = vmatpush3.bf16.xpose.msra.mxu1 %v1177_v5  ;;  %5082 = vmatpush3.bf16.xpose.msra.mxu0 %v1692_v16 }
 0x4d3   :  { %5039 = vmatprep.subr.bf16.mxu1 %v1292_v59 }
 0x4d9   :  { %5036 = vmatmul.mubr.bf16.vlgmr.msra.gmra.mrb[8].mxu1 %v6468_v18  ;;  %5084 = vmatmul.mubr.bf16.vlgmr.msra.gmra.mrb[20].mxu0 %v6468_v18 }
 0x4da   :  { %5040 = vmatpush3.bf16.xpose.msra.mxu1 %v1292_v59  ;;  %5043 = vmatprep.mubr.bf16.mxu1 %v6435_v25 }
 0x4db   :  { %5041 = vmatprep.subr.bf16.mxu1 %v1293_v6 }
 0x4e2   :  { %5042 = vmatpush3.bf16.xpose.msra.mxu1 %v1293_v6 }
 0x4e3   :  { %5047 = vmatprep.subr.bf16.mxu1 %v6383_v43 }
 0x4e9   :  { %5044 = vmatmul.mubr.bf16.vlgmr.msra.gmra.mrb[12].mxu1 %v6468_v18 }
 0x4ea   :  { %5048 = vmatpush3.bf16.msra.mxu1 %v6383_v43  ;;  %v547_v43 = vshrl.u32 %v546_v1, 7 }
 0x4eb   :  { %5049 = vmatprep.subr.bf16.mxu1 %v6385_v44 }
 0x4ec   :  { %v548_v39 = vadd.s32 8, %v547_v43  ;;  %vm6498_vm0 = vcmp.ge.s32.totalorder %v547_v43, %v6329_v3  ;;  %v550_v56 = vadd.s32 24, %v547_v43 }
 0x4ee   :  { %5050 = vmatpush3.bf16.msra.mxu1 %v6385_v44  ;;  %v549_v44 = vadd.s32 16, %v547_v43  ;;  %vm6506_vm2 = vcmp.ge.s32.totalorder %v548_v39, %v6329_v3  ;;  %vm6521_vm4 = vcmp.ge.s32.totalorder %v550_v56, %v6329_v3 }
 0x4ef   :  { %5055 = vmatprep.subr.bf16.mxu1 %v6387_v46 }
 0x4f0   :  { %vm6511_vm3 = vcmp.ge.s32.totalorder %v549_v44, %v6329_v3 }
 0x5ac   :  { %v5037_v8 = vpop.f32.mrb[8].mxu1  ;;  %v6488_v28 = vpop.f32.mrb[20].mxu0 }
 0x5ad   :  { %v1212_v21 = vpop.f32.mrb[9].mxu1  ;;  %v6490_v29 = vpop.f32.mrb[21].mxu0  ;;  %v1229_v17 = vmul.f32 0.17677669, %v5037_v8 }
 0x5ae   :  { %v5038_v30 = vpop.f32.mrb[10].mxu1  ;;  %v6492_v31 = vpop.f32.mrb[22].mxu0  ;;  %v1227_v61 = vmul.f32 0.17677669, %v1212_v21 }
 0x5af   :  { %v1215_v33 = vpop.f32.mrb[11].mxu1  ;;  %v6494_v34 = vpop.f32.mrb[23].mxu0  ;;  %v1230_v20 = vmul.f32 0.17677669, %v5038_v30  ;;  %v1233_v22 = vsel %vm6511_vm3, %v1229_v17, -1e+30 }
 0x5b0   :  { %v1228_v14 = vmul.f32 0.17677669, %v1215_v33  ;;  %v1231_v32 = vsel %vm6498_vm0, %v1227_v61, -1e+30  ;;  %v1242_v5 = vsel %vm1235_vm1, %v1233_v22, -inf }
 0x5b1   :  { %v1236_v38 = vsel %vm1235_vm1, %v1231_v32, -inf  ;;  %v1234_v24 = vsel %vm6521_vm4, %v1230_v20, -1e+30 }
 0x5b2   :  { %v1232_v3 = vsel %vm6506_vm2, %v1228_v14, -1e+30  ;;  %v1245_v16 = vsel %vm1235_vm1, %v1234_v24, -inf }
 0x5b3   :  { %v1239_v23 = vsel %vm1235_vm1, %v1232_v3, -inf }
 0x5bc   :  { %v5045_v35 = vpop.f32.mrb[12].mxu1 }
 0x5bd   :  { %v1328_v36 = vpop.f32.mrb[13].mxu1  ;;  %v1345_v42 = vmul.f32 0.17677669, %v5045_v35 }
 0x5be   :  { %v1343_v52 = vmul.f32 0.17677669, %v1328_v36  ;;  %v5046_v53 = vpop.f32.mrb[14].mxu1 }
 0x5bf   :  { %v1331_v54 = vpop.f32.mrb[15].mxu1  ;;  %v1346_v57 = vmul.f32 0.17677669, %v5046_v53  ;;  %v1349_v63 = vsel %vm6511_vm3, %v1345_v42, -1e+30 }
 0x5c0   :  { %v1344_v58 = vmul.f32 0.17677669, %v1331_v54  ;;  %v1347_v1 = vsel %vm6498_vm0, %v1343_v52, -1e+30  ;;  %v1357_v15 = vsel %vm1235_vm1, %v1349_v63, -inf }
 0x5c1   :  { %v1351_v26 = vsel %vm1235_vm1, %v1347_v1, -inf  ;;  %v1350_v4 = vsel %vm6521_vm4, %v1346_v57, -1e+30 }
 0x5c2   :  { %1352 = vmax.xlane.f32.xlu1 %v1351_v26  ;;  %v1348_v62 = vsel %vm6506_vm2, %v1344_v58, -1e+30  ;;  %v1360_v19 = vsel %vm1235_vm1, %v1350_v4, -inf }
 0x5c3   :  { %v1354_v7 = vsel %vm1235_vm1, %v1348_v62, -inf }
 0x5c4   :  { %1355 = vmax.xlane.f32.xlu0 %v1354_v7 }
 0x5c6   :  { %1358 = vmax.xlane.f32.xlu1 %v1357_v15 }
 0x5c8   :  { %1361 = vmax.xlane.f32.xlu0 %v1360_v19 }
 0x5ca   :  { %1237 = vmax.xlane.f32.xlu1 %v1236_v38 }
 0x5cc   :  { %1240 = vmax.xlane.f32.xlu0 %v1239_v23 }
 0x5ce   :  { %1243 = vmax.xlane.f32.xlu1 %v1242_v5 }
 0x5d0   :  { %1246 = vmax.xlane.f32.xlu0 %v1245_v16 }
 0x64f   :  { %v1353_v6 = vpop.xlane.xlu1 %1352 }
 0x650   :  { %v1363_v8 = vsub.f32 %v1347_v1, %v1353_v6 }
 0x651   :  { %v1356_v21 = vpop.xlane.xlu0 %1355 }
 0x652   :  { %v1367_v30 = vmul.f32 1.442695, %v1363_v8  ;;  %v1364_v33 = vsub.f32 %v1348_v62, %v1356_v21 }
 0x653   :  { %v1359_v43 = vpop.xlane.xlu1 %1358 }
 0x654   :  { %5550 = vpow2.f32 %v1367_v30  ;;  %v1369_v35 = vmul.f32 1.442695, %v1364_v33  ;;  %v1365_v36 = vsub.f32 %v1349_v63, %v1359_v43 }
 0x655   :  { %v1362_v39 = vpop.xlane.xlu0 %1361 }
 0x656   :  { %5552 = vpow2.f32 %v1369_v35  ;;  %v1371_v44 = vmul.f32 1.442695, %v1365_v36  ;;  %v1366_v42 = vsub.f32 %v1350_v4, %v1362_v39 }
 0x657   :  { %v1238_v52 = vpop.xlane.xlu1 %1237 }
 0x658   :  { %5554 = vpow2.f32 %v1371_v44  ;;  %v1373_v53 = vmul.f32 1.442695, %v1366_v42  ;;  %v1248_v54 = vsub.f32 %v1231_v32, %v1238_v52 }
 0x659   :  { %v1241_v56 = vpop.xlane.xlu0 %1240 }
 0x65a   :  { %5556 = vpow2.f32 %v1373_v53  ;;  %v1252_v57 = vmul.f32 1.442695, %v1248_v54  ;;  %v1249_v58 = vsub.f32 %v1232_v3, %v1241_v56 }
 0x65b   :  { %v1244_v1 = vpop.xlane.xlu1 %1243 }
 0x65c   :  { %5558 = vpow2.f32 %v1252_v57  ;;  %v1254_v26 = vmul.f32 1.442695, %v1249_v58  ;;  %v1250_v61 = vsub.f32 %v1233_v22, %v1244_v1 }
 0x65d   :  { %v1247_v62 = vpop.xlane.xlu0 %1246 }
 0x65e   :  { %v5551_v7 = vpop.eup %5550  ;;  %5560 = vpow2.f32 %v1254_v26  ;;  %v1256_v63 = vmul.f32 1.442695, %v1250_v61  ;;  %v1251_v14 = vsub.f32 %v1234_v24, %v1247_v62 }
 0x65f   :  { %v1375_v15 = vsel %vm1235_vm1, %v5551_v7, 0.0 }
 0x660   :  { %v5553_v4 = vpop.eup %5552  ;;  %5562 = vpow2.f32 %v1256_v63  ;;  %v1258_v17 = vmul.f32 1.442695, %v1251_v14  ;;  %1376 = vadd.xlane.f32.xlu1 %v1375_v15 }
 0x661   :  { %v1378_v32 = vsel %vm1235_vm1, %v5553_v4, 0.0 }
 0x662   :  { %v5555_v19 = vpop.eup %5554  ;;  %5564 = vpow2.f32 %v1258_v17  ;;  %1379 = vadd.xlane.f32.xlu0 %v1378_v32 }
 0x663   :  { %v1381_v20 = vsel %vm1235_vm1, %v5555_v19, 0.0 }
 0x664   :  { %v5557_v3 = vpop.eup %5556  ;;  %1382 = vadd.xlane.f32.xlu1 %v1381_v20 }
 0x665   :  { %v1384_v38 = vsel %vm1235_vm1, %v5557_v3, 0.0 }
 0x666   :  { %v5559_v22 = vpop.eup %5558  ;;  %1385 = vadd.xlane.f32.xlu0 %v1384_v38 }
 0x667   :  { %v1260_v23 = vsel %vm1235_vm1, %v5559_v22, 0.0 }
 0x668   :  { %v5561_v24 = vpop.eup %5560  ;;  %1261 = vadd.xlane.f32.xlu1 %v1260_v23 }
 0x669   :  { %v1263_v5 = vsel %vm1235_vm1, %v5561_v24, 0.0 }
 0x66a   :  { %v5563_v16 = vpop.eup %5562  ;;  %1264 = vadd.xlane.f32.xlu0 %v1263_v5 }
 0x66b   :  { %v1266_v6 = vsel %vm1235_vm1, %v5563_v16, 0.0 }
 0x66c   :  { %v5565_v8 = vpop.eup %5564  ;;  %1267 = vadd.xlane.f32.xlu1 %v1266_v6  ;;  %v1743_v6 = vmul.f32 0.17677669, %v6494_v34 }
 0x66d   :  { %v1269_v21 = vsel %vm1235_vm1, %v5565_v8, 0.0 }
 0x66e   :  { %1270 = vadd.xlane.f32.xlu0 %v1269_v21  ;;  %v1747_v34 = vsel %vm6506_vm2, %v1743_v6, -1e+30 }
 0x6ed   :  { %v1377_v30 = vpop.xlane.xlu1 %1376 }
 0x6ee   :  { %5566 = vrcp.f32 %v1377_v30  ;;  %v1744_v30 = vmul.f32 0.17677669, %v6488_v28  ;;  %v1753_v28 = vsel %vm1235_vm1, %v1747_v34, -inf }
 0x6ef   :  { %v1380_v33 = vpop.xlane.xlu0 %1379 }
 0x6f0   :  { %5568 = vrcp.f32 %v1380_v33 }
 0x6f1   :  { %v1383_v43 = vpop.xlane.xlu1 %1382 }
 0x6f2   :  { %5570 = vrcp.f32 %v1383_v43  ;;  %v1745_v43 = vmul.f32 0.17677669, %v6492_v31 }
 0x6f3   :  { %v1386_v35 = vpop.xlane.xlu0 %1385 }
 0x6f4   :  { %5572 = vrcp.f32 %v1386_v35 }
 0x6f5   :  { %v1262_v36 = vpop.xlane.xlu1 %1261 }
 0x6f6   :  { %5574 = vrcp.f32 %v1262_v36  ;;  %v1748_v36 = vsel %vm6511_vm3, %v1744_v30, -1e+30 }
 0x6f7   :  { %v1265_v39 = vpop.xlane.xlu0 %1264 }
 0x6f8   :  { %v5567_v44 = vpop.eup %5566  ;;  %5576 = vrcp.f32 %v1265_v39  ;;  %v1749_v39 = vsel %vm6521_vm4, %v1745_v43, -1e+30  ;;  %v5367_v43 = vld [vmem:[%s7523_s19 + $0x8] sm:$0xff]  }
 0x6f9   :  { %v1268_v52 = vpop.xlane.xlu1 %1267  ;;  %v1391_v54 = vmul.f32 %v5567_v44, %v5551_v7  ;;  %v1756_v44 = vsel %vm1235_vm1, %v1748_v36, -inf  ;;  %v1759_v31 = vsel %vm1235_vm1, %v1749_v39, -inf }
 0x6fa   :  { %v5569_v42 = vpop.eup %5568 }
 0x6fb   :  { %v1271_v53 = vpop.xlane.xlu0 %1270  ;;  %v1392_v56 = vmul.f32 %v5569_v42, %v5553_v4 }
 0x6fc   :  { %v5571_v57 = vpop.eup %5570  ;;  %5578 = vrcp.f32 %v1271_v53 }
 0x6fd   :  { %v1395_v58 = vpack.c.bf16 %v1392_v56, %v1391_v54  ;;  %5580 = vrcp.f32 %v1268_v52  ;;  %v1393_v26 = vmul.f32 %v5571_v57, %v5555_v19 }
 0x6fe   :  { %v5573_v1 = vpop.eup %5572 }
 0x6ff   :  { %v1394_v61 = vmul.f32 %v5573_v1, %v5557_v3  ;;  %5051 = vmatprep.mubr.msk.bf16.mxu1 %vm1235_vm1, %v1395_v58 }
 0x700   :  { %v5575_v62 = vpop.eup %5574 }
 0x701   :  { %v1396_v63 = vpack.c.bf16 %v1394_v61, %v1393_v26  ;;  %v1276_v15 = vmul.f32 %v5575_v62, %v5559_v22 }
 0x702   :  { %v5577_v14 = vpop.eup %5576 }
 0x703   :  { %5052 = vmatmul.mubr.msk.bf16.vlgmr.msra.gmra.mrb[16].mxu1 %vm1235_vm1, %v1396_v63  ;;  %v1277_v17 = vmul.f32 %v5577_v14, %v5561_v24 }
 0x704   :  { %5056 = vmatpush3.bf16.msra.mxu1 %v6387_v46 }
 0x705   :  { %5057 = vmatprep.subr.bf16.mxu1 %v6389_v47  ;;  %v1280_v7 = vpack.c.bf16 %v1277_v17, %v1276_v15 }
 0x706   :  { %v5579_v4 = vpop.eup %5578 }
 0x707   :  { %5059 = vmatprep.mubr.msk.bf16.mxu1 %vm1235_vm1, %v1280_v7  ;;  %v5581_v32 = vpop.eup %5580  ;;  %v1279_v19 = vmul.f32 %v5579_v4, %v5565_v8 }
 0x708   :  { %5058 = vmatpush3.bf16.msra.mxu1 %v6389_v47  ;;  %v1278_v20 = vmul.f32 %v5581_v32, %v5563_v16 }
 0x709   :  { %5063 = vmatprep.subr.bf16.mxu1 %v6464_v0 }
 0x70a   :  { %v1281_v3 = vpack.c.bf16 %v1279_v19, %v1278_v20 }
 0x70f   :  { %5060 = vmatmul.mubr.msk.bf16.vlgmr.msra.gmra.mrb[16].mxu1 %vm1235_vm1, %v1281_v3 }
 0x710   :  { %5067 = vmatprep.mubr.bf16.mxu1 %v6435_v25 }
 0x711   :  { %5064 = vmatpush3.bf16.xpose.msra.mxu1 %v6464_v0 }
 0x712   :  { %5065 = vmatprep.subr.bf16.mxu1 %v6477_v27 }
 0x719   :  { %5066 = vmatpush3.bf16.xpose.msra.mxu1 %v6477_v27 }
 0x71a   :  { %5071 = vmatprep.subr.bf16.mxu1 %v6391_v48 }
 0x720   :  { %5068 = vmatmul.mubr.bf16.vlgmr.msra.gmra.mrb[20].mxu1 %v6468_v18 }
 0x721   :  { %5072 = vmatpush3.bf16.msra.mxu1 %v6391_v48  ;;  %v1742_v48 = vmul.f32 0.17677669, %v6490_v29 }
 0x722   :  { %5073 = vmatprep.subr.bf16.mxu1 %v6393_v49 }
 0x723   :  { %v1746_v29 = vsel %vm6498_vm0, %v1742_v48, -1e+30 }
 0x724   :  { %v1750_v35 = vsel %vm1235_vm1, %v1746_v29, -inf }
 0x725   :  { %5074 = vmatpush3.bf16.msra.mxu1 %v6393_v49 }
 0x726   :  { %5087 = vmatprep.subr.bf16.mxu1 %v6395_v50 }
 0x7f3   :  { %v5069_v46 = vpop.f32.mrb[20].mxu1 }
 0x7f4   :  { %v1553_v47 = vpop.f32.mrb[21].mxu1  ;;  %v1570_v25 = vmul.f32 0.17677669, %v5069_v46 }
 0x7f5   :  { %v1568_v0 = vmul.f32 0.17677669, %v1553_v47  ;;  %v5070_v38 = vpop.f32.mrb[22].mxu1 }
 0x7f6   :  { %v1556_v22 = vpop.f32.mrb[23].mxu1  ;;  %v1571_v23 = vmul.f32 0.17677669, %v5070_v38  ;;  %v1574_v5 = vsel %vm6511_vm3, %v1570_v25, -1e+30 }
 0x7f7   :  { %v1569_v27 = vmul.f32 0.17677669, %v1556_v22  ;;  %v1572_v24 = vsel %vm6498_vm0, %v1568_v0, -1e+30  ;;  %v1582_v21 = vsel %vm1235_vm1, %v1574_v5, -inf }
 0x7f8   :  { %v1576_v18 = vsel %vm1235_vm1, %v1572_v24, -inf  ;;  %v1575_v8 = vsel %vm6521_vm4, %v1571_v23, -1e+30 }
 0x7f9   :  { %1577 = vmax.xlane.f32.xlu1 %v1576_v18  ;;  %v1573_v49 = vsel %vm6506_vm2, %v1569_v27, -1e+30  ;;  %v1585_v33 = vsel %vm1235_vm1, %v1575_v8, -inf }
 0x7fa   :  { %v1579_v16 = vsel %vm1235_vm1, %v1573_v49, -inf }
 0x7fb   :  { %1580 = vmax.xlane.f32.xlu0 %v1579_v16 }
 0x7fd   :  { %1583 = vmax.xlane.f32.xlu1 %v1582_v21 }
 0x7ff   :  { %1586 = vmax.xlane.f32.xlu0 %v1585_v33  ;;  %v5366_v33 = vld [vmem:[%s7523_s19] sm:$0xff]  }
 0x800   :  { %5095 = vmatprep.subr.bf16.mxu0 %v5366_v33 }
 0x801   :  { %1751 = vmax.xlane.f32.xlu1 %v1750_v35  ;;  %5096 = vmatpush3.bf16.msra.mxu0 %v5366_v33  ;;  %v5369_v35 = vld [vmem:[%s7523_s19 + $0x18] sm:$0xff]  }
 0x802   :  { %5097 = vmatprep.subr.bf16.mxu0 %v5367_v43  ;;  %v5391_v33 = vld [vmem:[%s7525_s21 + $0x4c] ss:$16 sps:$4 sm:$0xff]  }
 0x803   :  { %1754 = vmax.xlane.f32.xlu0 %v1753_v28  ;;  %v5371_v28 = vld [vmem:[%s7523_s19 + $0x28] sm:$0xff]  }
 0x805   :  { %1757 = vmax.xlane.f32.xlu1 %v1756_v44  ;;  %5098 = vmatpush3.bf16.msra.mxu0 %v5367_v43  ;;  %v5386_v43 = vld [vmem:[%s7525_s21 + $0x40] ss:$16 sps:$4 sm:$0xff]  }
 0x807   :  { %1760 = vmax.xlane.f32.xlu0 %v1759_v31 }
 0x886   :  { %v1578_v42 = vpop.xlane.xlu1 %1577 }
 0x887   :  { %v1588_v52 = vsub.f32 %v1572_v24, %v1578_v42 }
 0x888   :  { %v1581_v53 = vpop.xlane.xlu0 %1580 }
 0x889   :  { %v1592_v54 = vmul.f32 1.442695, %v1588_v52  ;;  %v1589_v56 = vsub.f32 %v1573_v49, %v1581_v53 }
 0x88a   :  { %v1584_v57 = vpop.xlane.xlu1 %1583 }
 0x88b   :  { %5582 = vpow2.f32 %v1592_v54  ;;  %v1594_v58 = vmul.f32 1.442695, %v1589_v56  ;;  %v1590_v1 = vsub.f32 %v1574_v5, %v1584_v57 }
 0x88c   :  { %v1587_v26 = vpop.xlane.xlu0 %1586 }
 0x88d   :  { %5584 = vpow2.f32 %v1594_v58  ;;  %v1596_v61 = vmul.f32 1.442695, %v1590_v1  ;;  %v1591_v62 = vsub.f32 %v1575_v8, %v1587_v26 }
 0x88e   :  { %v1752_v63 = vpop.xlane.xlu1 %1751 }
 0x88f   :  { %5586 = vpow2.f32 %v1596_v61  ;;  %v1598_v14 = vmul.f32 1.442695, %v1591_v62  ;;  %v1762_v15 = vsub.f32 %v1746_v29, %v1752_v63 }
 0x890   :  { %v1755_v17 = vpop.xlane.xlu0 %1754 }
 0x891   :  { %5588 = vpow2.f32 %v1598_v14  ;;  %v1766_v7 = vmul.f32 1.442695, %v1762_v15  ;;  %v1763_v4 = vsub.f32 %v1747_v34, %v1755_v17  ;;  %v5368_v34 = vld [vmem:[%s7523_s19 + $0x10] sm:$0xff]  }
 0x892   :  { %v1758_v32 = vpop.xlane.xlu1 %1757  ;;  %5099 = vmatprep.subr.bf16.mxu0 %v5368_v34 }
 0x893   :  { %5590 = vpow2.f32 %v1766_v7  ;;  %v1768_v19 = vmul.f32 1.442695, %v1763_v4  ;;  %v1764_v20 = vsub.f32 %v1748_v36, %v1758_v32  ;;  %5100 = vmatpush3.bf16.msra.mxu0 %v5368_v34  ;;  %v5370_v36 = vld [vmem:[%s7523_s19 + $0x20] sm:$0xff]   ;;  %v5389_v34 = vld [vmem:[%s7525_s21 + $0x48] ss:$16 sps:$4 sm:$0xff]  }
 0x894   :  { %v1761_v3 = vpop.xlane.xlu0 %1760  ;;  %5101 = vmatprep.subr.bf16.mxu0 %v5369_v35 }
 0x895   :  { %v6595_v46 = vpop.eup %5582  ;;  %5592 = vpow2.f32 %v1768_v19  ;;  %v1770_v47 = vmul.f32 1.442695, %v1764_v20  ;;  %v1765_v25 = vsub.f32 %v1749_v39, %v1761_v3  ;;  %v5372_v39 = vld [vmem:[%s7523_s19 + $0x30] sm:$0xff]  }
 0x896   :  { %v1600_v0 = vsel %vm1235_vm1, %v6595_v46, 0.0 }
 0x897   :  { %v6599_v38 = vpop.eup %5584  ;;  %5594 = vpow2.f32 %v1770_v47  ;;  %v1772_v22 = vmul.f32 1.442695, %v1765_v25  ;;  %1601 = vadd.xlane.f32.xlu1 %v1600_v0  ;;  %5102 = vmatpush3.bf16.msra.mxu0 %v5369_v35 }
 0x898   :  { %v1603_v23 = vsel %vm1235_vm1, %v6599_v38, 0.0  ;;  %5103 = vmatprep.subr.bf16.mxu0 %v5370_v36 }
 0x899   :  { %v6603_v27 = vpop.eup %5586  ;;  %5596 = vpow2.f32 %v1772_v22  ;;  %1604 = vadd.xlane.f32.xlu0 %v1603_v23 }
 0x89a   :  { %v1606_v24 = vsel %vm1235_vm1, %v6603_v27, 0.0 }
 0x89b   :  { %v5589_v18 = vpop.eup %5588  ;;  %1607 = vadd.xlane.f32.xlu1 %v1606_v24  ;;  %5104 = vmatpush3.bf16.msra.mxu0 %v5370_v36 }
 0x89c   :  { %v1609_v48 = vsel %vm1235_vm1, %v5589_v18, 0.0  ;;  %5105 = vmatprep.subr.bf16.mxu0 %v5371_v28 }
 0x89d   :  { %v6608_v49 = vpop.eup %5590  ;;  %1610 = vadd.xlane.f32.xlu0 %v1609_v48  ;;  %v5374_v48 = vld [vmem:[%s7525_s21] ss:$16 sps:$4 sm:$0xff]  }
 0x89e   :  { %v1774_v5 = vsel %vm1235_vm1, %v6608_v49, 0.0 }
 0x89f   :  { %v5593_v16 = vpop.eup %5592  ;;  %1775 = vadd.xlane.f32.xlu1 %v1774_v5  ;;  %5106 = vmatpush3.bf16.msra.mxu0 %v5371_v28  ;;  %v5377_v5 = vld [vmem:[%s7525_s21 + $0x8] ss:$16 sps:$4 sm:$0xff]  }
 0x8a0   :  { %v1777_v6 = vsel %vm1235_vm1, %v5593_v16, 0.0  ;;  %5107 = vmatprep.subr.bf16.mxu0 %v5372_v39 }
 0x8a1   :  { %v6613_v8 = vpop.eup %5594  ;;  %1778 = vadd.xlane.f32.xlu0 %v1777_v6  ;;  %v5382_v6 = vld [vmem:[%s7525_s21 + $0x24] ss:$16 sps:$4 sm:$0xff]  }
 0x8a2   :  { %v1780_v21 = vsel %vm1235_vm1, %v6613_v8, 0.0 }
 0x8a3   :  { %v6617_v30 = vpop.eup %5596  ;;  %1781 = vadd.xlane.f32.xlu1 %v1780_v21  ;;  %5108 = vmatpush3.bf16.msra.mxu0 %v5372_v39  ;;  %v5380_v21 = vld [vmem:[%s7525_s21 + $0x20] ss:$16 sps:$4 sm:$0xff]  }
 0x8a4   :  { %v1783_v29 = vsel %vm1235_vm1, %v6617_v30, 0.0 }
 0x8a5   :  { %1784 = vadd.xlane.f32.xlu0 %v1783_v29  ;;  %v5388_v29 = vld [vmem:[%s7525_s21 + $0x44] ss:$16 sps:$4 sm:$0xff]  }
 0x924   :  { %v1602_v44 = vpop.xlane.xlu1 %1601 }
 0x925   :  { %5598 = vrcp.f32 %v1602_v44 }
 0x926   :  { %v1605_v31 = vpop.xlane.xlu0 %1604 }
 0x927   :  { %5600 = vrcp.f32 %v1605_v31 }
 0x928   :  { %v1608_v42 = vpop.xlane.xlu1 %1607 }
 0x929   :  { %5602 = vrcp.f32 %v1608_v42 }
 0x92a   :  { %v1611_v52 = vpop.xlane.xlu0 %1610 }
 0x92b   :  { %5604 = vrcp.f32 %v1611_v52 }
 0x92c   :  { %v1776_v53 = vpop.xlane.xlu1 %1775 }
 0x92d   :  { %5606 = vrcp.f32 %v1776_v53 }
 0x92e   :  { %v1779_v54 = vpop.xlane.xlu0 %1778 }
 0x92f   :  { %v5599_v56 = vpop.eup %5598  ;;  %5608 = vrcp.f32 %v1779_v54 }
 0x930   :  { %v1782_v58 = vpop.xlane.xlu1 %1781  ;;  %v1616_v26 = vmul.f32 %v5599_v56, %v6595_v46  ;;  %v5392_v56 = vld [vmem:[%s7525_s21 + $0x60] ss:$16 sps:$4 sm:$0xff]  }
 0x931   :  { %v5601_v57 = vpop.eup %5600 }
 0x932   :  { %v1785_v1 = vpop.xlane.xlu0 %1784  ;;  %v1617_v61 = vmul.f32 %v5601_v57, %v6599_v38  ;;  %v5395_v57 = vld [vmem:[%s7525_s21 + $0x68] ss:$16 sps:$4 sm:$0xff]  }
 0x933   :  { %v5603_v62 = vpop.eup %5602  ;;  %5610 = vrcp.f32 %v1785_v1  ;;  %v5403_v1 = vld [vmem:[%s7525_s21 + $0x8c] ss:$16 sps:$4 sm:$0xff]  }
 0x934   :  { %v1620_v63 = vpack.c.bf16 %v1617_v61, %v1616_v26  ;;  %5612 = vrcp.f32 %v1782_v58  ;;  %v1618_v15 = vmul.f32 %v5603_v62, %v6603_v27  ;;  %v5400_v58 = vld [vmem:[%s7525_s21 + $0x84] ss:$16 sps:$4 sm:$0xff]   ;;  %v5398_v26 = vld [vmem:[%s7525_s21 + $0x80] ss:$16 sps:$4 sm:$0xff]   ;;  %v5401_v61 = vld [vmem:[%s7525_s21 + $0x88] ss:$16 sps:$4 sm:$0xff]  }
 0x935   :  { %v5605_v14 = vpop.eup %5604  ;;  %v5406_v62 = vld [vmem:[%s7525_s21 + $0xa4] ss:$16 sps:$4 sm:$0xff]  }
 0x936   :  { %v1619_v17 = vmul.f32 %v5605_v14, %v5589_v18  ;;  %5075 = vmatprep.mubr.msk.bf16.mxu1 %vm1235_vm1, %v1620_v63  ;;  %v5404_v63 = vld [vmem:[%s7525_s21 + $0xa0] ss:$16 sps:$4 sm:$0xff]   ;;  %v5407_v14 = vld [vmem:[%s7525_s21 + $0xa8] ss:$16 sps:$4 sm:$0xff]  }
 0x937   :  { %v5607_v7 = vpop.eup %5606 }
 0x938   :  { %v1621_v4 = vpack.c.bf16 %v1619_v17, %v1618_v15  ;;  %v1790_v19 = vmul.f32 %v5607_v7, %v6608_v49  ;;  %v5376_v49 = vld [vmem:[%s7525_s21 + $0x4] ss:$16 sps:$4 sm:$0xff]   ;;  %v5409_v15 = vld [vmem:[%s7525_s21 + $0xac] ss:$16 sps:$4 sm:$0xff]  }
 0x939   :  { %v5609_v32 = vpop.eup %5608  ;;  %v5412_v17 = vld [vmem:[%s7525_s21 + $0xc4] ss:$16 sps:$4 sm:$0xff]   ;;  %v5415_v7 = vld [vmem:[%s7525_s21 + $0xcc] ss:$16 sps:$4 sm:$0xff]  }
 0x93a   :  { %5076 = vmatmul.mubr.msk.bf16.vlgmr.msra.gmra.mrb[16].mxu1 %vm1235_vm1, %v1621_v4  ;;  %v1791_v20 = vmul.f32 %v5609_v32, %v5593_v16  ;;  %v5379_v16 = vld [vmem:[%s7525_s21 + $0xc] ss:$16 sps:$4 sm:$0xff]   ;;  %v5410_v4 = vld [vmem:[%s7525_s21 + $0xc0] ss:$16 sps:$4 sm:$0xff]   ;;  %v5413_v32 = vld [vmem:[%s7525_s21 + $0xc8] ss:$16 sps:$4 sm:$0xff]  }
 0x93b   :  { %5088 = vmatpush3.bf16.msra.mxu1 %v6395_v50  ;;  %v5373_v50 = vld [vmem:[%s7523_s19 + $0x38] sm:$0xff]  }
 0x93c   :  { %5089 = vmatprep.subr.bf16.mxu1 %v6397_v51  ;;  %v1794_v3 = vpack.c.bf16 %v1791_v20, %v1790_v19  ;;  %5109 = vmatprep.subr.bf16.mxu0 %v5373_v50  ;;  %v5418_v19 = vld [vmem:[%s7525_s21 + $0xe4] ss:$16 sps:$4 sm:$0xff]   ;;  %v5421_v20 = vld [vmem:[%s7525_s21 + $0xec] ss:$16 sps:$4 sm:$0xff]  }
 0x93d   :  { %v5611_v46 = vpop.eup %5610  ;;  %5110 = vmatpush3.bf16.msra.mxu0 %v5373_v50 }
 0x93e   :  { %5091 = vmatprep.mubr.msk.bf16.mxu1 %vm1235_vm1, %v1794_v3  ;;  %v5613_v47 = vpop.eup %5612  ;;  %v1793_v25 = vmul.f32 %v5611_v46, %v6617_v30  ;;  %2266 = vmatprep.subr.bf16.mxu0 %v5379_v16  ;;  %v5383_v30 = vld [vmem:[%s7525_s21 + $0x28] ss:$16 sps:$4 sm:$0xff]   ;;  %v5416_v3 = vld [vmem:[%s7525_s21 + $0xe0] ss:$16 sps:$4 sm:$0xff]  }
 0x93f   :  { %5090 = vmatpush3.bf16.msra.mxu1 %v6397_v51  ;;  %v1792_v0 = vmul.f32 %v5613_v47, %v6613_v8  ;;  %v5385_v8 = vld [vmem:[%s7525_s21 + $0x2c] ss:$16 sps:$4 sm:$0xff]   ;;  %v5419_v46 = vld [vmem:[%s7525_s21 + $0xe8] ss:$16 sps:$4 sm:$0xff]  }
 0x940   :  { %2213 = vmatprep.subr.bf16.mxu1 %v5376_v49 }
 0x941   :  { %v1795_v38 = vpack.c.bf16 %v1793_v25, %v1792_v0 }
 0x946   :  { %5092 = vmatmul.mubr.msk.bf16.vlgmr.msra.gmra.mrb[16].mxu1 %vm1235_vm1, %v1795_v38 }
 0x947   :  { %2245 = vmatprep.mubr.bf16.mxu1 %v5846_v2  ;;  %2214 = vmatpush1.bf16.msra.mxu1 %v5374_v48 }
 0x948   :  { %2215 = vmatprep.subr.bf16.mxu1 %v5382_v6  ;;  %v4521_v6 = vld [vmem:[%s7524_s20] ss:$0 sm:$0xff] }
 0x94b   :  { %2216 = vmatpush1.bf16.msra.mxu1 %v5380_v21 }
 0x94c   :  { %2217 = vmatprep.subr.bf16.mxu1 %v5388_v29 }
 0x94f   :  { %2218 = vmatpush1.bf16.msra.mxu1 %v5386_v43 }
 0xa19   :  { %v5093_v22 = vpop.f32.mrb[16].mxu1 }
 0xa1a   :  { %v1842_v23 = vpop.f32.mrb[17].mxu1 }
 0xa1b   :  { %v5094_v27 = vpop.f32.mrb[18].mxu1 }
 0xa1c   :  { %v1862_v24 = vpack.c.bf16 %v5094_v27, %v5093_v22  ;;  %v1845_v51 = vpop.f32.mrb[19].mxu1 }
 0xa1d   :  { %v1861_v18 = vpack.c.bf16 %v1845_v51, %v1842_v23 }
 0xa1f   :  { %5111 = vmatprep.mubr.bf16.mxu0 %v1861_v18 }
 0xa20   :  { %5112 = vmatmul.mubr.bf16.vlgmr.msra.gmra.mrb[24].mxu0 %v1862_v24 }
 0xa21   :  { %2298 = vmatprep.mubr.bf16.mxu0 %v5846_v2  ;;  %2267 = vmatpush1.bf16.msra.mxu0 %v5377_v5 }
 0xa22   :  { %2268 = vmatprep.subr.bf16.mxu0 %v5385_v8 }
 0xa25   :  { %2269 = vmatpush1.bf16.msra.mxu0 %v5383_v30 }
 0xa26   :  { %2270 = vmatprep.subr.bf16.mxu0 %v5391_v33 }
 0xa29   :  { %2271 = vmatpush1.bf16.msra.mxu0 %v5389_v34 }
 0xaf3   :  { %v5113_v35 = vpop.f32.mrb[24].mxu0 }
 0xaf4   :  { %v1961_v36 = vpop.f32.mrb[25].mxu0  ;;  %v6700_v31 = vadd.f32 %v5113_v35, %v6160_v41 }
 0xaf5   :  { %v6697_v28 = vadd.f32 %v1961_v36, %v6154_v37  ;;  %v5114_v39 = vpop.f32.mrb[26].mxu0 }
 0xaf6   :  { %v1964_v44 = vpop.f32.mrb[27].mxu0  ;;  %v6708_v53 = vadd.f32 %v5114_v39, %v6169_v45  ;;  %v1983_v37 = vmul.f32 %v6700_v31, %v6700_v31  ;;  %v5397_v45 = vld [vmem:[%s7525_s21 + $0x6c] ss:$16 sps:$4 sm:$0xff]  }
 0xaf7   :  { %v6703_v42 = vadd.f32 %v1964_v44, %v6158_v40  ;;  %v1981_v52 = vmul.f32 %v6697_v28, %v6697_v28  ;;  %v5394_v40 = vld [vmem:[%s7525_s21 + $0x64] ss:$16 sps:$4 sm:$0xff]   ;;  %2272 = vmatprep.subr.bf16.mxu0 %v5397_v45 }
 0xaf8   :  { %v1984_v41 = vmul.f32 %v6708_v53, %v6708_v53  ;;  %2219 = vmatprep.subr.bf16.mxu1 %v5394_v40  ;;  %2273 = vmatpush1.bf16.msra.mxu0 %v5395_v57  ;;  %v5426_v40 = vld [vmem:[%s7526_s22 + $0x50] sm:$0xff]   ;;  %v5429_v57 = vld [vmem:[%s7526_s22 + $0x18] sm:$0xff]  }
 0xaf9   :  { %1985 = vadd.xlane.f32.xlu1 %v1981_v52  ;;  %v1982_v54 = vmul.f32 %v6703_v42, %v6703_v42  ;;  %2220 = vmatpush1.bf16.msra.mxu1 %v5392_v56  ;;  %v5422_v52 = vld [vmem:[%s7526_s22 + $0x40] sm:$0xff]   ;;  %v5427_v45 = vld [vmem:[%s7526_s22 + $0x10] sm:$0xff]   ;;  %v5428_v56 = vld [vmem:[%s7526_s22 + $0x58] sm:$0xff]  }
 0xafa   :  { %2221 = vmatprep.subr.bf16.mxu1 %v5400_v58  ;;  %2274 = vmatprep.subr.bf16.mxu0 %v5403_v1  ;;  %v5430_v58 = vld [vmem:[%s7526_s22 + $0x60] sm:$0xff]  }
 0xafb   :  { %1987 = vadd.xlane.f32.xlu0 %v1982_v54  ;;  %v5423_v54 = vld [vmem:[%s7526_s22] sm:$0xff]  }
 0xafc   :  { %2275 = vmatpush1.bf16.msra.mxu0 %v5401_v61  ;;  %v5431_v1 = vld [vmem:[%s7526_s22 + $0x20] sm:$0xff]   ;;  %v5433_v61 = vld [vmem:[%s7526_s22 + $0x28] sm:$0xff]  }
 0xafd   :  { %1989 = vadd.xlane.f32.xlu1 %v1983_v37  ;;  %2222 = vmatpush1.bf16.msra.mxu1 %v5398_v26  ;;  %v5424_v37 = vld [vmem:[%s7526_s22 + $0x48] sm:$0xff]  }
 0xafe   :  { %2223 = vmatprep.subr.bf16.mxu1 %v5406_v62  ;;  %2276 = vmatprep.subr.bf16.mxu0 %v5409_v15  ;;  %v5432_v26 = vld [vmem:[%s7526_s22 + $0x68] sm:$0xff]   ;;  %v5434_v62 = vld [vmem:[%s7526_s22 + $0x70] sm:$0xff]   ;;  %v5437_v15 = vld [vmem:[%s7526_s22 + $0x38] sm:$0xff]  }
 0xaff   :  { %1991 = vadd.xlane.f32.xlu0 %v1984_v41  ;;  %v5425_v41 = vld [vmem:[%s7526_s22 + $0x8] sm:$0xff]  }
 0xb00   :  { %2277 = vmatpush1.bf16.msra.mxu0 %v5407_v14  ;;  %v5436_v14 = vld [vmem:[%s7526_s22 + $0x78] sm:$0xff]  }
 0xb01   :  { %2224 = vmatpush1.bf16.msra.mxu1 %v5404_v63  ;;  %2278 = vmatprep.subr.bf16.mxu0 %v5415_v7  ;;  %v5435_v63 = vld [vmem:[%s7526_s22 + $0x30] sm:$0xff]  }
 0xb02   :  { %2225 = vmatprep.subr.bf16.mxu1 %v5412_v17 }
 0xb04   :  { %2279 = vmatpush1.bf16.msra.mxu0 %v5413_v32 }
 0xb05   :  { %2226 = vmatpush1.bf16.msra.mxu1 %v5410_v4  ;;  %2280 = vmatprep.subr.bf16.mxu0 %v5421_v20 }
 0xb06   :  { %2227 = vmatprep.subr.bf16.mxu1 %v5418_v19 }
 0xb08   :  { %2281 = vmatpush1.bf16.msra.mxu0 %v5419_v46 }
 0xb09   :  { %2228 = vmatpush1.bf16.msra.mxu1 %v5416_v3 }
 0xb0a   :  { %4863 = vmatprep.subr.bf16.mxu1 %v5422_v52 }
 0xb86   :  { %v1986_v47 = vpop.xlane.xlu1 %1985 }
 0xb87   :  { %v1993_v25 = vmul.f32 0.0078125, %v1986_v47 }
 0xb88   :  { %v1988_v0 = vpop.xlane.xlu0 %1987 }
 0xb89   :  { %v1997_v38 = vadd.f32 1e-05, %v1993_v25  ;;  %v1994_v50 = vmul.f32 0.0078125, %v1988_v0 }
 0xb8a   :  { %v1990_v22 = vpop.xlane.xlu1 %1989 }
 0xb8b   :  { %5614 = vrsqrt.f32 %v1997_v38  ;;  %v1998_v23 = vadd.f32 1e-05, %v1994_v50  ;;  %v1995_v27 = vmul.f32 0.0078125, %v1990_v22 }
 0xb8c   :  { %v1992_v24 = vpop.xlane.xlu0 %1991 }
 0xb8d   :  { %5616 = vrsqrt.f32 %v1998_v23  ;;  %v1999_v51 = vadd.f32 1e-05, %v1995_v27  ;;  %v1996_v18 = vmul.f32 0.0078125, %v1992_v24 }
 0xb8f   :  { %v2000_v48 = vadd.f32 1e-05, %v1996_v18  ;;  %5618 = vrsqrt.f32 %v1999_v51 }
 0xb91   :  { %5620 = vrsqrt.f32 %v2000_v48 }
 0xb95   :  { %v5615_v49 = vpop.eup %5614 }
 0xb96   :  { %v2005_v5 = vmul.f32 %v5615_v49, %v6697_v28 }
 0xb97   :  { %v5617_v16 = vpop.eup %5616 }
 0xb98   :  { %v2006_v8 = vmul.f32 %v5617_v16, %v6703_v42  ;;  %v2015_v30 = vmul.f32 %v4521_v6, %v2005_v5 }
 0xb99   :  { %v5619_v21 = vpop.eup %5618 }
 0xb9a   :  { %v2016_v29 = vmul.f32 %v4521_v6, %v2006_v8  ;;  %v2007_v35 = vmul.f32 %v5619_v21, %v6700_v31 }
 0xb9b   :  { %v5621_v33 = vpop.eup %5620 }
 0xb9c   :  { %v2019_v43 = vpack.c.bf16 %v2016_v29, %v2015_v30  ;;  %v2008_v34 = vmul.f32 %v5621_v33, %v6708_v53  ;;  %v2017_v39 = vmul.f32 %v4521_v6, %v2007_v35 }
 0xb9e   :  { %2246 = vmatmul.mubr.bf16.vlgmr.msra.gmra.mrb[24].mxu1 %v2019_v43  ;;  %2299 = vmatmul.mubr.bf16.vlgmr.msra.gmra.mrb[28].mxu0 %v2019_v43  ;;  %v2018_v36 = vmul.f32 %v4521_v6, %v2008_v34 }
 0xb9f   :  { %2255 = vmatprep.mubr.bf16.mxu1 %v5846_v2  ;;  %2308 = vmatprep.mubr.bf16.mxu0 %v5846_v2 }
 0xba0   :  { %v2020_v44 = vpack.c.bf16 %v2018_v36, %v2017_v39  ;;  %4864 = vmatpush3.bf16.msra.mxu1 %v5423_v54 }
 0xba1   :  { %4865 = vmatprep.subr.bf16.mxu1 %v5424_v37 }
 0xba4   :  { %4866 = vmatpush3.bf16.msra.mxu1 %v5425_v41 }
 0xba5   :  { %4867 = vmatprep.subr.bf16.mxu1 %v5426_v40 }
 0xba6   :  { %2256 = vmatmul.mubr.bf16.gmra.mrb[28].mxu1 %v2020_v44  ;;  %2309 = vmatmul.mubr.bf16.gmra.mrb[32].mxu0 %v2020_v44 }
 0xba7   :  { %2803 = vmatprep.mubr.bf16.mxu0 %v5846_v2 }
 0xba8   :  { %4868 = vmatpush3.bf16.msra.mxu1 %v5427_v45 }
 0xba9   :  { %4869 = vmatprep.subr.bf16.mxu1 %v5428_v56 }
 0xbac   :  { %4870 = vmatpush3.bf16.msra.mxu1 %v5429_v57 }
 0xbad   :  { %4871 = vmatprep.subr.bf16.mxu1 %v5430_v58 }
 0xbb0   :  { %4872 = vmatpush3.bf16.msra.mxu1 %v5431_v1 }
 0xbb1   :  { %4873 = vmatprep.subr.bf16.mxu1 %v5432_v26 }
 0xbb4   :  { %4874 = vmatpush3.bf16.msra.mxu1 %v5433_v61 }
 0xbb5   :  { %4875 = vmatprep.subr.bf16.mxu1 %v5434_v62 }
 0xbb8   :  { %4876 = vmatpush3.bf16.msra.mxu1 %v5435_v63 }
 0xbb9   :  { %4877 = vmatprep.subr.bf16.mxu1 %v5436_v14 }
 0xbbc   :  { %4878 = vmatpush3.bf16.msra.mxu1 %v5437_v15 }
 0xc71   :  { %v2247_v17 = vpop.f32.mrb[24].mxu1  ;;  %v2300_v7 = vpop.f32.mrb[28].mxu0 }
 0xc72   :  { %v4554_v4 = vmul.f32 -1.442695, %v2247_v17  ;;  %v2249_v32 = vpop.f32.mrb[25].mxu1  ;;  %v2302_v19 = vpop.f32.mrb[29].mxu0 }
 0xc73   :  { %v4555_v20 = vmul.f32 -1.442695, %v2249_v32  ;;  %v2251_v3 = vpop.f32.mrb[26].mxu1  ;;  %v2304_v46 = vpop.f32.mrb[30].mxu0 }
 0xc74   :  { %5622 = vpow2.f32 %v4554_v4  ;;  %v4556_v47 = vmul.f32 -1.442695, %v2251_v3  ;;  %v2253_v25 = vpop.f32.mrb[27].mxu1  ;;  %v2306_v0 = vpop.f32.mrb[31].mxu0 }
 0xc75   :  { %5624 = vpow2.f32 %v4555_v20  ;;  %v4557_v38 = vmul.f32 -1.442695, %v2253_v25 }
 0xc76   :  { %5626 = vpow2.f32 %v4556_v47 }
 0xc77   :  { %5628 = vpow2.f32 %v4557_v38 }
 0xc79   :  { %v2257_v50 = vpop.f32.mrb[28].mxu1  ;;  %v2310_v22 = vpop.f32.mrb[32].mxu0 }
 0xc7a   :  { %v4558_v23 = vmul.f32 -1.442695, %v2257_v50  ;;  %v2259_v27 = vpop.f32.mrb[29].mxu1  ;;  %v2312_v24 = vpop.f32.mrb[33].mxu0 }
 0xc7b   :  { %v4559_v51 = vmul.f32 -1.442695, %v2259_v27  ;;  %v2261_v18 = vpop.f32.mrb[30].mxu1  ;;  %v2314_v48 = vpop.f32.mrb[34].mxu0 }
 0xc7c   :  { %5630 = vpow2.f32 %v4558_v23  ;;  %v4560_v49 = vmul.f32 -1.442695, %v2261_v18  ;;  %v2263_v5 = vpop.f32.mrb[31].mxu1  ;;  %v2316_v16 = vpop.f32.mrb[35].mxu0 }
 0xc7d   :  { %5632 = vpow2.f32 %v4559_v51  ;;  %v4561_v6 = vmul.f32 -1.442695, %v2263_v5 }
 0xc7e   :  { %v5623_v8 = vpop.eup %5622  ;;  %5634 = vpow2.f32 %v4560_v49 }
 0xc7f   :  { %v5625_v21 = vpop.eup %5624  ;;  %v2343_v30 = vadd.f32 1.0, %v5623_v8  ;;  %5636 = vpow2.f32 %v4561_v6 }
 0xc80   :  { %v5627_v29 = vpop.eup %5626  ;;  %v2344_v33 = vadd.f32 1.0, %v5625_v21 }
 0xc81   :  { %v5629_v43 = vpop.eup %5628  ;;  %5638 = vrcp.f32 %v2343_v30  ;;  %v2345_v34 = vadd.f32 1.0, %v5627_v29 }
 0xc82   :  { %5640 = vrcp.f32 %v2344_v33  ;;  %v2346_v35 = vadd.f32 1.0, %v5629_v43 }
 0xc83   :  { %5642 = vrcp.f32 %v2345_v34 }
 0xc84   :  { %5644 = vrcp.f32 %v2346_v35 }
 0xc86   :  { %v5631_v36 = vpop.eup %5630 }
 0xc87   :  { %v5633_v39 = vpop.eup %5632  ;;  %v2347_v44 = vadd.f32 1.0, %v5631_v36 }
 0xc88   :  { %v5635_v52 = vpop.eup %5634  ;;  %v2348_v54 = vadd.f32 1.0, %v5633_v39 }
 0xc89   :  { %v5637_v37 = vpop.eup %5636  ;;  %5646 = vrcp.f32 %v2347_v44  ;;  %v2349_v41 = vadd.f32 1.0, %v5635_v52 }
 0xc8a   :  { %5648 = vrcp.f32 %v2348_v54  ;;  %v2350_v40 = vadd.f32 1.0, %v5637_v37 }
 0xc8b   :  { %v5639_v45 = vpop.eup %5638  ;;  %5650 = vrcp.f32 %v2349_v41 }
 0xc8c   :  { %v5641_v56 = vpop.eup %5640  ;;  %v2367_v57 = vmul.f32 %v5639_v45, %v2247_v17  ;;  %5652 = vrcp.f32 %v2350_v40 }
 0xc8d   :  { %v5643_v58 = vpop.eup %5642  ;;  %v2368_v1 = vmul.f32 %v5641_v56, %v2249_v32 }
 0xc8e   :  { %v5645_v26 = vpop.eup %5644  ;;  %v2375_v61 = vmul.f32 %v2367_v57, %v2300_v7  ;;  %v2369_v62 = vmul.f32 %v5643_v58, %v2251_v3  ;;  %v5450_v57 = vld [vmem:[%s7522_s18 + $0x10c] ss:$12 sps:$4 sm:$0xff]   ;;  %v5454_v58 = vld [vmem:[%s7522_s18 + $0x124] ss:$12 sps:$4 sm:$0xff]  }
 0xc8f   :  { %v2376_v63 = vmul.f32 %v2368_v1, %v2302_v19  ;;  %v2370_v14 = vmul.f32 %v5645_v26, %v2253_v25  ;;  %v5455_v1 = vld [vmem:[%s7522_s18 + $0xf8] ss:$12 sps:$4 sm:$0xff]   ;;  %v5452_v26 = vld [vmem:[%s7522_s18 + $0x120] ss:$12 sps:$4 sm:$0xff]  }
 0xc90   :  { %v2377_v15 = vmul.f32 %v2369_v62, %v2304_v46  ;;  %v5438_v46 = vld [vmem:[%s7522_s18 + $0xc0] ss:$12 sps:$4 sm:$0xff]   ;;  %v5459_v62 = vld [vmem:[%s7522_s18 + $0x110] ss:$12 sps:$4 sm:$0xff]  }
 0xc91   :  { %v2378_v4 = vmul.f32 %v2370_v14, %v2306_v0  ;;  %v5440_v0 = vld [vmem:[%s7522_s18 + $0xc4] ss:$12 sps:$4 sm:$0xff]   ;;  %v5462_v14 = vld [vmem:[%s7522_s18 + $0x154] ss:$12 sps:$4 sm:$0xff]  }
 0xc92   :  { %v2383_v20 = vpack.c.bf16 %v2377_v15, %v2375_v61  ;;  %2771 = vmatprep.subr.bf16.mxu0 %v5440_v0  ;;  %v5458_v61 = vld [vmem:[%s7522_s18 + $0x13c] ss:$12 sps:$4 sm:$0xff]  }
 0xc93   :  { %v5647_v47 = vpop.eup %5646  ;;  %v2384_v38 = vpack.c.bf16 %v2378_v4, %v2376_v63  ;;  %2772 = vmatpush1.bf16.msra.mxu0 %v5438_v46  ;;  %v5456_v63 = vld [vmem:[%s7522_s18 + $0x138] ss:$12 sps:$4 sm:$0xff]   ;;  %v5463_v15 = vld [vmem:[%s7522_s18 + $0x128] ss:$12 sps:$4 sm:$0xff]   ;;  %v5460_v4 = vld [vmem:[%s7522_s18 + $0x150] ss:$12 sps:$4 sm:$0xff]  }
 0xc94   :  { %v5649_v23 = vpop.eup %5648  ;;  %v2371_v51 = vmul.f32 %v5647_v47, %v2257_v50  ;;  %v5443_v50 = vld [vmem:[%s7522_s18 + $0xdc] ss:$12 sps:$4 sm:$0xff]   ;;  %v5467_v47 = vld [vmem:[%s7522_s18 + $0x140] ss:$12 sps:$4 sm:$0xff]  }
 0xc95   :  { %v5651_v49 = vpop.eup %5650  ;;  %v2372_v6 = vmul.f32 %v5649_v23, %v2259_v27  ;;  %2547 = vmatprep.mubr.bf16.mxu1 %v2384_v38  ;;  %v5441_v27 = vld [vmem:[%s7522_s18 + $0xd8] ss:$12 sps:$4 sm:$0xff]   ;;  %2773 = vmatprep.subr.bf16.mxu0 %v5443_v50  ;;  %v5464_v38 = vld [vmem:[%s7522_s18 + $0x168] ss:$12 sps:$4 sm:$0xff]  }
 0xc96   :  { %v5653_v8 = vpop.eup %5652  ;;  %v2379_v17 = vmul.f32 %v2371_v51, %v2310_v22  ;;  %v2373_v21 = vmul.f32 %v5651_v49, %v2261_v18  ;;  %2548 = vmatmul.mubr.bf16.vlgmr.msra.gmra.mrb[32].mxu1 %v2383_v20  ;;  %v5447_v22 = vld [vmem:[%s7522_s18 + $0xc8] ss:$12 sps:$4 sm:$0xff]   ;;  %v5444_v18 = vld [vmem:[%s7522_s18 + $0xf0] ss:$12 sps:$4 sm:$0xff]   ;;  %v5466_v20 = vld [vmem:[%s7522_s18 + $0x16c] ss:$12 sps:$4 sm:$0xff]  }
 0xc97   :  { %v2380_v32 = vmul.f32 %v2372_v6, %v2312_v24  ;;  %v2374_v30 = vmul.f32 %v5653_v8, %v2263_v5  ;;  %v5446_v24 = vld [vmem:[%s7522_s18 + $0xf4] ss:$12 sps:$4 sm:$0xff]   ;;  %5115 = vmatprep.subr.bf16.mxu1 %v5447_v22  ;;  %2774 = vmatpush1.bf16.msra.mxu0 %v5441_v27  ;;  %v5468_v23 = vld [vmem:[%s7522_s18 + $0x158] ss:$12 sps:$4 sm:$0xff]   ;;  %v5469_v51 = vld [vmem:[%s7522_s18 + $0x170] ss:$12 sps:$4 sm:$0xff]  }
 0xc98   :  { %v2381_v7 = vmul.f32 %v2373_v21, %v2314_v48  ;;  %5116 = vmatpush3.bf16.msra.mxu1 %v5447_v22  ;;  %2775 = vmatprep.subr.bf16.mxu0 %v5446_v24  ;;  %v5774_v49 = vld [vmem:[%s7519_s15 + $0x4] ss:$8 sps:$4 sm:$0xff]   ;;  %v4579_v24 = vld [vmem:[%s7521_s17 + $0x1] ss:$0 sm:$0xff] }
 0xc99   :  { %v2382_v3 = vmul.f32 %v2374_v30, %v2316_v16 }
 0xc9a   :  { %v2385_v19 = vpack.c.bf16 %v2381_v7, %v2379_v17 }
 0xc9b   :  { %v2386_v25 = vpack.c.bf16 %v2382_v3, %v2380_v32  ;;  %2776 = vmatpush1.bf16.msra.mxu0 %v5444_v18 }
 0xc9c   :  { %2777 = vmatprep.subr.bf16.mxu0 %v5450_v57  ;;  %v5781_v57 = vld [vmem:[%s7519_s15 + $0x30] ss:$8 sps:$4 sm:$0xff]  }
 0xc9d   :  { %2555 = vmatprep.mubr.bf16.mxu1 %v2386_v25 }
 0xc9e   :  { %2556 = vmatmul.mubr.bf16.gmra.mrb[36].mxu1 %v2385_v19 }
 0xd69   :  { %v4879_v48 = vpop.f32.mrb[32].mxu1 }
 0xd6a   :  { %v4880_v5 = vpop.f32.mrb[33].mxu1 }
 0xd6b   :  { %v4881_v16 = vadd.f32 %v4880_v5, %v4879_v48  ;;  %v4882_v29 = vpop.f32.mrb[34].mxu1 }
 0xd6c   :  { %v4883_v33 = vpop.f32.mrb[35].mxu1 }
 0xd6d   :  { %v6856_v43 = vadd.f32 %v4881_v16, %v6697_v28  ;;  %v4884_v34 = vadd.f32 %v4883_v33, %v4882_v29 }
 0xd6f   :  { %v6859_v35 = vadd.f32 %v4884_v34, %v6703_v42  ;;  %v2570_v36 = vmul.f32 %v6856_v43, %v6856_v43 }
 0xd71   :  { %2574 = vadd.xlane.f32.xlu1 %v2570_v36  ;;  %v4885_v39 = vpop.f32.mrb[36].mxu1  ;;  %v2571_v44 = vmul.f32 %v6859_v35, %v6859_v35  ;;  %v5775_v36 = vld [vmem:[%s7519_s15] ss:$8 sps:$4 sm:$0xff]  }
 0xd72   :  { %v4886_v52 = vpop.f32.mrb[37].mxu1 }
 0xd73   :  { %v4887_v54 = vadd.f32 %v4886_v52, %v4885_v39  ;;  %2576 = vadd.xlane.f32.xlu0 %v2571_v44  ;;  %v4888_v37 = vpop.f32.mrb[38].mxu1  ;;  %v5776_v44 = vld [vmem:[%s7519_s15 + $0x14] ss:$8 sps:$4 sm:$0xff]  }
 0xd74   :  { %v4889_v41 = vpop.f32.mrb[39].mxu1 }
 0xd75   :  { %v6866_v28 = vadd.f32 %v4887_v54, %v6700_v31  ;;  %v4890_v40 = vadd.f32 %v4889_v41, %v4888_v37  ;;  %v5451_v31 = vld [vmem:[%s7522_s18 + $0xe0] ss:$12 sps:$4 sm:$0xff]   ;;  %v5777_v37 = vld [vmem:[%s7519_s15 + $0x10] ss:$8 sps:$4 sm:$0xff]  }
 0xd76   :  { %5117 = vmatprep.subr.bf16.mxu1 %v5451_v31 }
 0xd77   :  { %v6869_v42 = vadd.f32 %v4890_v40, %v6708_v53  ;;  %v2572_v45 = vmul.f32 %v6866_v28, %v6866_v28  ;;  %v5448_v53 = vld [vmem:[%s7522_s18 + $0x108] ss:$12 sps:$4 sm:$0xff]   ;;  %5118 = vmatpush3.bf16.msra.mxu1 %v5451_v31  ;;  %v5778_v40 = vld [vmem:[%s7519_s15 + $0x24] ss:$8 sps:$4 sm:$0xff]  }
 0xd78   :  { %2778 = vmatpush1.bf16.msra.mxu0 %v5448_v53  ;;  %5119 = vmatprep.subr.bf16.mxu1 %v5455_v1  ;;  %v5782_v31 = vld [vmem:[%s7519_s15 + $0x44] ss:$8 sps:$4 sm:$0xff]   ;;  %v5783_v53 = vld [vmem:[%s7519_s15 + $0x40] ss:$8 sps:$4 sm:$0xff]  }
 0xd79   :  { %2578 = vadd.xlane.f32.xlu1 %v2572_v45  ;;  %v2573_v56 = vmul.f32 %v6869_v42, %v6869_v42  ;;  %2779 = vmatprep.subr.bf16.mxu0 %v5454_v58  ;;  %v5779_v45 = vld [vmem:[%s7519_s15 + $0x20] ss:$8 sps:$4 sm:$0xff]   ;;  %v5784_v58 = vld [vmem:[%s7519_s15 + $0x54] ss:$8 sps:$4 sm:$0xff]  }
 0xd7b   :  { %2580 = vadd.xlane.f32.xlu0 %v2573_v56  ;;  %5120 = vmatpush3.bf16.msra.mxu1 %v5455_v1  ;;  %v5780_v56 = vld [vmem:[%s7519_s15 + $0x34] ss:$8 sps:$4 sm:$0xff]   ;;  %v5785_v1 = vld [vmem:[%s7519_s15 + $0x50] ss:$8 sps:$4 sm:$0xff]  }
 0xd7c   :  { %2780 = vmatpush1.bf16.msra.mxu0 %v5452_v26  ;;  %5121 = vmatprep.subr.bf16.mxu1 %v5459_v62  ;;  %v5786_v26 = vld [vmem:[%s7519_s15 + $0x64] ss:$8 sps:$4 sm:$0xff]  }
 0xd7d   :  { %2781 = vmatprep.subr.bf16.mxu0 %v5458_v61  ;;  %v5787_v61 = vld [vmem:[%s7519_s15 + $0x60] ss:$8 sps:$4 sm:$0xff]  }
 0xd7f   :  { %5122 = vmatpush3.bf16.msra.mxu1 %v5459_v62  ;;  %v5788_v62 = vld [vmem:[%s7519_s15 + $0x74] ss:$8 sps:$4 sm:$0xff]  }
 0xd80   :  { %2782 = vmatpush1.bf16.msra.mxu0 %v5456_v63  ;;  %5123 = vmatprep.subr.bf16.mxu1 %v5463_v15  ;;  %v5789_v63 = vld [vmem:[%s7519_s15 + $0x70] ss:$8 sps:$4 sm:$0xff]  }
 0xd81   :  { %2783 = vmatprep.subr.bf16.mxu0 %v5462_v14  ;;  %v5790_v14 = vld [vmem:[%s7519_s15 + $0x84] ss:$8 sps:$4 sm:$0xff]  }
 0xd83   :  { %5124 = vmatpush3.bf16.msra.mxu1 %v5463_v15  ;;  %v5791_v15 = vld [vmem:[%s7519_s15 + $0x80] ss:$8 sps:$4 sm:$0xff]  }
 0xd84   :  { %2784 = vmatpush1.bf16.msra.mxu0 %v5460_v4  ;;  %5125 = vmatprep.subr.bf16.mxu1 %v5467_v47  ;;  %v5792_v4 = vld [vmem:[%s7519_s15 + $0x94] ss:$8 sps:$4 sm:$0xff]  }
 0xd85   :  { %2785 = vmatprep.subr.bf16.mxu0 %v5466_v20  ;;  %v5793_v20 = vld [vmem:[%s7519_s15 + $0x90] ss:$8 sps:$4 sm:$0xff]  }
 0xd87   :  { %5126 = vmatpush3.bf16.msra.mxu1 %v5467_v47  ;;  %v5794_v47 = vld [vmem:[%s7519_s15 + $0xa4] ss:$8 sps:$4 sm:$0xff]  }
 0xd88   :  { %2786 = vmatpush1.bf16.msra.mxu0 %v5464_v38  ;;  %5127 = vmatprep.subr.bf16.mxu1 %v5468_v23  ;;  %v5795_v38 = vld [vmem:[%s7519_s15 + $0xa0] ss:$8 sps:$4 sm:$0xff]  }
 0xd89   :  { %2885 = vmatprep.subr.bf16.mxu0 %v5774_v49  ;;  %v5798_v49 = vld [vmem:[%s7519_s15 + $0xc4] ss:$8 sps:$4 sm:$0xff]  }
 0xd8b   :  { %5128 = vmatpush3.bf16.msra.mxu1 %v5468_v23  ;;  %v5796_v23 = vld [vmem:[%s7519_s15 + $0xb4] ss:$8 sps:$4 sm:$0xff]  }
 0xd8c   :  { %5129 = vmatprep.subr.bf16.mxu1 %v5469_v51 }
 0xd8f   :  { %5130 = vmatpush3.bf16.msra.mxu1 %v5469_v51  ;;  %v5797_v51 = vld [vmem:[%s7519_s15 + $0xb0] ss:$8 sps:$4 sm:$0xff]  }
 0xdfe   :  { %v2575_v6 = vpop.xlane.xlu1 %2574 }
 0xdff   :  { %v2582_v8 = vmul.f32 0.0078125, %v2575_v6  ;;  %v5799_v6 = vld [vmem:[%s7519_s15 + $0xc0] ss:$8 sps:$4 sm:$0xff]  }
 0xe00   :  { %v2577_v17 = vpop.xlane.xlu0 %2576 }
 0xe01   :  { %v2586_v21 = vadd.f32 1e-05, %v2582_v8  ;;  %v2583_v32 = vmul.f32 0.0078125, %v2577_v17  ;;  %v5800_v8 = vld [vmem:[%s7519_s15 + $0xd4] ss:$8 sps:$4 sm:$0xff]  }
 0xe02   :  { %v5801_v17 = vld [vmem:[%s7519_s15 + $0xd0] ss:$8 sps:$4 sm:$0xff]  }
 0xe03   :  { %5654 = vrsqrt.f32 %v2586_v21  ;;  %v2587_v30 = vadd.f32 1e-05, %v2583_v32  ;;  %v5802_v21 = vld [vmem:[%s7519_s15 + $0xe4] ss:$8 sps:$4 sm:$0xff]   ;;  %v5803_v32 = vld [vmem:[%s7519_s15 + $0xe0] ss:$8 sps:$4 sm:$0xff]  }
 0xe05   :  { %5656 = vrsqrt.f32 %v2587_v30  ;;  %v5804_v30 = vld [vmem:[%s7519_s15 + $0xf4] ss:$8 sps:$4 sm:$0xff]  }
 0xe06   :  { %v2579_v7 = vpop.xlane.xlu1 %2578 }
 0xe07   :  { %v2584_v3 = vmul.f32 0.0078125, %v2579_v7  ;;  %v5805_v7 = vld [vmem:[%s7519_s15 + $0xf0] ss:$8 sps:$4 sm:$0xff]  }
 0xe08   :  { %v2581_v19 = vpop.xlane.xlu0 %2580 }
 0xe09   :  { %v2588_v25 = vadd.f32 1e-05, %v2584_v3  ;;  %v2585_v46 = vmul.f32 0.0078125, %v2581_v19 }
 0xe0b   :  { %5658 = vrsqrt.f32 %v2588_v25  ;;  %v2589_v0 = vadd.f32 1e-05, %v2585_v46 }
 0xe0d   :  { %v5655_v50 = vpop.eup %5654  ;;  %5660 = vrsqrt.f32 %v2589_v0 }
 0xe0e   :  { %v2594_v22 = vmul.f32 %v5655_v50, %v6856_v43 }
 0xe0f   :  { %v5657_v27 = vpop.eup %5656 }
 0xe10   :  { %v2595_v18 = vmul.f32 %v5657_v27, %v6859_v35  ;;  %v2604_v48 = vmul.f32 %v4579_v24, %v2594_v22 }
 0xe12   :  { %v2605_v5 = vmul.f32 %v4579_v24, %v2595_v18 }
 0xe14   :  { %v2608_v16 = vpack.c.bf16 %v2605_v5, %v2604_v48 }
 0xe15   :  { %v5659_v29 = vpop.eup %5658 }
 0xe16   :  { %2804 = vmatmul.mubr.bf16.vlgmr.msra.gmra.mrb[36].mxu0 %v2608_v16  ;;  %5131 = vmatprep.mubr.bf16.mxu1 %v2608_v16  ;;  %v2596_v33 = vmul.f32 %v5659_v29, %v6866_v28 }
 0xe17   :  { %v5661_v34 = vpop.eup %5660  ;;  %2813 = vmatprep.mubr.bf16.mxu0 %v5846_v2  ;;  %2886 = vmatpush1.bf16.msra.mxu0 %v5775_v36 }
 0xe18   :  { %v2597_v39 = vmul.f32 %v5661_v34, %v6869_v42  ;;  %2887 = vmatprep.subr.bf16.mxu0 %v5776_v44  ;;  %v2606_v52 = vmul.f32 %v4579_v24, %v2596_v33 }
 0xe1a   :  { %v2607_v54 = vmul.f32 %v4579_v24, %v2597_v39 }
 0xe1b   :  { %2888 = vmatpush1.bf16.msra.mxu0 %v5777_v37 }
 0xe1c   :  { %v2609_v41 = vpack.c.bf16 %v2607_v54, %v2606_v52  ;;  %2889 = vmatprep.subr.bf16.mxu0 %v5778_v40 }
 0xe1e   :  { %2814 = vmatmul.mubr.bf16.gmra.mrb[40].mxu0 %v2609_v41  ;;  %5132 = vmatmul.mubr.bf16.vlgmr.msra.gmra.mrb[40].mxu1 %v2609_v41 }
 0xe1f   :  { %2890 = vmatpush1.bf16.msra.mxu0 %v5779_v45 }
 0xe20   :  { %2891 = vmatprep.subr.bf16.mxu0 %v5780_v56 }
 0xe23   :  { %2892 = vmatpush1.bf16.msra.mxu0 %v5781_v57 }
 0xe24   :  { %2893 = vmatprep.subr.bf16.mxu0 %v5782_v31 }
 0xe27   :  { %2894 = vmatpush1.bf16.msra.mxu0 %v5783_v53 }
 0xe28   :  { %2895 = vmatprep.subr.bf16.mxu0 %v5784_v58 }
 0xe2b   :  { %2896 = vmatpush1.bf16.msra.mxu0 %v5785_v1 }
 0xe2c   :  { %2897 = vmatprep.subr.bf16.mxu0 %v5786_v26 }
 0xe2f   :  { %2898 = vmatpush1.bf16.msra.mxu0 %v5787_v61 }
 0xe30   :  { %2899 = vmatprep.subr.bf16.mxu0 %v5788_v62 }
 0xe33   :  { %2900 = vmatpush1.bf16.msra.mxu0 %v5789_v63 }
 0xe34   :  { %2901 = vmatprep.subr.bf16.mxu0 %v5790_v14 }
 0xe37   :  { %2902 = vmatpush1.bf16.msra.mxu0 %v5791_v15 }
 0xe38   :  { %2903 = vmatprep.subr.bf16.mxu0 %v5792_v4 }
 0xe3b   :  { %2904 = vmatpush1.bf16.msra.mxu0 %v5793_v20 }
 0xe3c   :  { %2905 = vmatprep.subr.bf16.mxu0 %v5794_v47 }
 0xe3f   :  { %2906 = vmatpush1.bf16.msra.mxu0 %v5795_v38 }
 0xe40   :  { %2907 = vmatprep.subr.bf16.mxu0 %v5796_v23  ;;  %v5806_v23 = vld [vmem:[%s7517_s13] sm:$0xff] }
 0xe43   :  { %2908 = vmatpush1.bf16.msra.mxu0 %v5797_v51 }
 0xe44   :  { %2909 = vmatprep.subr.bf16.mxu0 %v5798_v49  ;;  %v5807_v49 = vld [vmem:[%s7518_s14] sm:$0xff] }
 0xe47   :  { %2910 = vmatpush1.bf16.msra.mxu0 %v5799_v6 }
 0xe48   :  { %2911 = vmatprep.subr.bf16.mxu0 %v5800_v8 }
 0xe4b   :  { %2912 = vmatpush1.bf16.msra.mxu0 %v5801_v17  ;;  %v5808_v17 = vld [vmem:[%s7517_s13 + $0x8] sm:$0xff] }
 0xe4c   :  { %2913 = vmatprep.subr.bf16.mxu0 %v5802_v21 }
 0xe4f   :  { %2914 = vmatpush1.bf16.msra.mxu0 %v5803_v32  ;;  %v5809_v32 = vld [vmem:[%s7518_s14 + $0x8] sm:$0xff] }
 0xe50   :  { %2915 = vmatprep.subr.bf16.mxu0 %v5804_v30 }
 0xe53   :  { %2916 = vmatpush1.bf16.msra.mxu0 %v5805_v7 }
 0xee9   :  { %v2805_v3 = vpop.f32.mrb[36].mxu0 }
 0xeea   :  { %v2807_v19 = vpop.f32.mrb[37].mxu0  ;;  %v2873_v51 = vmul.f32 %v5806_v23, %v2805_v3 }
 0xeeb   :  { %v2809_v25 = vpop.f32.mrb[38].mxu0  ;;  %v2874_v21 = vmul.f32 %v5808_v17, %v2807_v19 }
 0xeec   :  { %v2881_v46 = vpack.c.bf16 %v2809_v25, %v2805_v3  ;;  %v2811_v0 = vpop.f32.mrb[39].mxu0  ;;  %v5810_v3 = vld [vmem:[%s7517_s13 + $0x10] sm:$0xff] }
 0xeed   :  { %v2882_v50 = vpack.c.bf16 %v2811_v0, %v2807_v19  ;;  %v5812_v19 = vld [vmem:[%s7517_s13 + $0x18] sm:$0xff] }
 0xeef   :  { %2917 = vmatprep.mubr.bf16.mxu0 %v2882_v50 }
 0xef0   :  { %2918 = vmatmul.mubr.bf16.vlgmr.msra.gmra.mrb[44].mxu0 %v2881_v46  ;;  %v2875_v46 = vmul.f32 %v5810_v3, %v2809_v25  ;;  %v5819_v3 = vld [vmem:[%s7518_s14 + $0x30] sm:$0xff] }
 0xef1   :  { %v7030_v22 = vpop.f32.mrb[40].mxu0  ;;  %v5133_v27 = vpop.f32.mrb[40].mxu1 }
 0xef2   :  { %v7032_v24 = vpop.f32.mrb[41].mxu0  ;;  %v2858_v18 = vpop.f32.mrb[41].mxu1  ;;  %v3067_v48 = vmul.f32 %v5133_v27, %v6347_v10  ;;  %v3182_v5 = vmul.f32 %v5133_v27, %v6350_v11  ;;  %v3407_v16 = vmul.f32 %v5133_v27, %v6353_v12  ;;  %v3581_v29 = vmul.f32 %v5133_v27, %v6356_v13  ;;  %v5811_v27 = vld [vmem:[%s7518_s14 + $0x10] sm:$0xff] }
 0xef3   :  { %v7038_v33 = vpop.f32.mrb[42].mxu0  ;;  %v5134_v34 = vpop.f32.mrb[42].mxu1  ;;  %v3065_v36 = vmul.f32 %v6347_v10, %v2858_v18  ;;  %v3180_v39 = vmul.f32 %v6350_v11, %v2858_v18  ;;  %v3405_v44 = vmul.f32 %v6353_v12, %v2858_v18  ;;  %v3579_v57 = vmul.f32 %v6356_v13, %v2858_v18 }
 0xef4   :  { %v2883_v52 = vpack.c.bf16 %v7038_v33, %v7030_v22  ;;  %v7045_v54 = vpop.f32.mrb[43].mxu0  ;;  %v2861_v37 = vpop.f32.mrb[43].mxu1  ;;  %v3068_v41 = vmul.f32 %v5134_v34, %v6347_v10  ;;  %v3183_v40 = vmul.f32 %v5134_v34, %v6350_v11  ;;  %v3408_v45 = vmul.f32 %v5134_v34, %v6353_v12 }
 0xef5   :  { %v3582_v56 = vmul.f32 %v5134_v34, %v6356_v13  ;;  %v2884_v31 = vpack.c.bf16 %v7045_v54, %v7032_v24  ;;  %v3066_v53 = vmul.f32 %v6347_v10, %v2861_v37  ;;  %v3181_v58 = vmul.f32 %v6350_v11, %v2861_v37 }
 0xef6   :  { %v3406_v1 = vmul.f32 %v6353_v12, %v2861_v37  ;;  %v3580_v26 = vmul.f32 %v6356_v13, %v2861_v37  ;;  %v7058_v61 = vpack.c.bf16 %v3183_v40, %v3182_v5  ;;  %v7060_v62 = vpack.c.bf16 %v3068_v41, %v3067_v48 }
 0xef7   :  { %2927 = vmatprep.mubr.bf16.mxu0 %v2884_v31  ;;  %v7062_v63 = vpack.c.bf16 %v3181_v58, %v3180_v39  ;;  %v7064_v14 = vpack.c.bf16 %v3066_v53, %v3065_v36  ;;  %v7066_v15 = vpack.c.bf16 %v3408_v45, %v3407_v16  ;;  %v7068_v4 = vpack.c.bf16 %v3582_v56, %v3581_v29  ;;  %v5813_v29 = vld [vmem:[%s7518_s14 + $0x18] sm:$0xff]  ;;  %v5814_v56 = vld [vmem:[%s7517_s13 + $0x20] sm:$0xff] }
 0xef8   :  { %2928 = vmatmul.mubr.bf16.gmra.mrb[48].mxu0 %v2883_v52  ;;  %v7070_v20 = vpack.c.bf16 %v3406_v1, %v3405_v44  ;;  %v7072_v47 = vpack.c.bf16 %v3580_v26, %v3579_v57  ;;  %v2876_v5 = vmul.f32 %v5812_v19, %v2811_v0  ;;  %v2877_v57 = vmul.f32 %v5814_v56, %v7030_v22  ;;  %v5815_v58 = vld [vmem:[%s7518_s14 + $0x20] sm:$0xff]  ;;  %v5816_v22 = vld [vmem:[%s7517_s13 + $0x28] sm:$0xff] }
 0xfc3   :  { %v2919_v38 = vpop.f32.mrb[44].mxu0 }
 0xfc4   :  { %v2938_v6 = vmul.f32 %v5807_v49, %v2919_v38  ;;  %v2921_v8 = vpop.f32.mrb[45].mxu0  ;;  %v2878_v49 = vmul.f32 %v5816_v22, %v7032_v24 }
 0xfc5   :  { %v2939_v30 = vmul.f32 %v5809_v32, %v2921_v8  ;;  %v2923_v7 = vpop.f32.mrb[46].mxu0  ;;  %v5818_v32 = vld [vmem:[%s7517_s13 + $0x30] sm:$0xff] }
 0xfc6   :  { %v2946_v50 = vadd.f32 %v2938_v6, %v2873_v51  ;;  %v2940_v18 = vmul.f32 %v5811_v27, %v2923_v7  ;;  %v2925_v48 = vpop.f32.mrb[47].mxu0  ;;  %v5817_v6 = vld [vmem:[%s7518_s14 + $0x28] sm:$0xff] }
 0xfc7   :  { %v2947_v16 = vadd.f32 %v2939_v30, %v2874_v21  ;;  %v2941_v34 = vmul.f32 %v5813_v29, %v2925_v48  ;;  %v2879_v30 = vmul.f32 %v5818_v32, %v7038_v33  ;;  %v5821_v33 = vld [vmem:[%s7518_s14 + $0x38] sm:$0xff] }
 0xfc8   :  { %v2948_v36 = vadd.f32 %v2940_v18, %v2875_v46 }
 0xfc9   :  { %v2949_v25 = vadd.f32 %v2941_v34, %v2876_v5  ;;  %v2956_v44 = vmul.f32 %v6347_v10, %v2947_v16  ;;  %v3470_v52 = vmul.f32 %v6356_v13, %v2947_v16  ;;  %v3071_v37 = vmul.f32 %v6350_v11, %v2947_v16 }
 0xfca   :  { %v7098_v39 = vpack.c.bf16 %v2948_v36, %v2946_v50  ;;  %v3296_v53 = vmul.f32 %v6353_v12, %v2947_v16  ;;  %v5820_v50 = vld [vmem:[%s7517_s13 + $0x38] sm:$0xff] }
 0xfcb   :  { %v2957_v41 = vmul.f32 %v6347_v10, %v2949_v25  ;;  %v3471_v0 = vmul.f32 %v6356_v13, %v2949_v25  ;;  %v3072_v40 = vmul.f32 %v6350_v11, %v2949_v25  ;;  %v3297_v45 = vmul.f32 %v6353_v12, %v2949_v25  ;;  %v2929_v31 = vpop.f32.mrb[48].mxu0 }
 0xfcc   :  { %5139 = vmatprep.mubr.bf16.mxu1 %v7098_v39  ;;  %5187 = vmatprep.mubr.bf16.mxu0 %v7098_v39  ;;  %v2942_v1 = vmul.f32 %v5815_v58, %v2929_v31  ;;  %v2931_v26 = vpop.f32.mrb[49].mxu0  ;;  %v2880_v27 = vmul.f32 %v5820_v50, %v7045_v54 }
 0xfcd   :  { %v2960_v38 = vpack.c.bf16 %v2957_v41, %v2956_v44  ;;  %v3474_v23 = vpack.c.bf16 %v3471_v0, %v3470_v52  ;;  %v3075_v51 = vpack.c.bf16 %v3072_v40, %v3071_v37  ;;  %v2943_v8 = vmul.f32 %v5817_v6, %v2931_v26  ;;  %v2933_v17 = vpop.f32.mrb[50].mxu0 }
 0xfce   :  { %v7124_v21 = vpack.c.bf16 %v3297_v45, %v3296_v53  ;;  %v2950_v7 = vadd.f32 %v2942_v1, %v2877_v57  ;;  %v2944_v24 = vmul.f32 %v5819_v3, %v2933_v17  ;;  %v2935_v46 = vpop.f32.mrb[51].mxu0 }
 0xfcf   :  { %5135 = vmatprep.subr.bf16.mxu1 %v2960_v38  ;;  %5183 = vmatprep.subr.bf16.mxu0 %v3474_v23  ;;  %v2951_v18 = vadd.f32 %v2943_v8, %v2878_v49  ;;  %v2945_v48 = vmul.f32 %v5821_v33, %v2935_v46 }
 0xfd0   :  { %5136 = vmatpush3.bf16.xpose.msra.mxu1 %v2960_v38  ;;  %5184 = vmatpush3.bf16.xpose.msra.mxu0 %v3474_v23  ;;  %v2952_v19 = vadd.f32 %v2944_v24, %v2879_v30 }
 0xfd1   :  { %v2953_v5 = vadd.f32 %v2945_v48, %v2880_v27  ;;  %v2958_v16 = vmul.f32 %v6347_v10, %v2951_v18  ;;  %v3472_v34 = vmul.f32 %v6356_v13, %v2951_v18  ;;  %v3073_v36 = vmul.f32 %v6350_v11, %v2951_v18 }
 0xfd2   :  { %v7141_v29 = vpack.c.bf16 %v2952_v19, %v2950_v7  ;;  %v3298_v54 = vmul.f32 %v6353_v12, %v2951_v18 }
 0xfd3   :  { %v2959_v25 = vmul.f32 %v6347_v10, %v2953_v5  ;;  %v3473_v44 = vmul.f32 %v6356_v13, %v2953_v5  ;;  %v3074_v52 = vmul.f32 %v6350_v11, %v2953_v5  ;;  %v3299_v37 = vmul.f32 %v6353_v12, %v2953_v5 }
 0xfd5   :  { %v2961_v41 = vpack.c.bf16 %v2959_v25, %v2958_v16  ;;  %v3475_v0 = vpack.c.bf16 %v3473_v44, %v3472_v34  ;;  %v3076_v40 = vpack.c.bf16 %v3074_v52, %v3073_v36  ;;  %v7150_v45 = vpack.c.bf16 %v3299_v37, %v3298_v54 }
 0xfd7   :  { %5137 = vmatprep.subr.bf16.mxu1 %v2961_v41  ;;  %5185 = vmatprep.subr.bf16.mxu0 %v3475_v0 }
 0xfd8   :  { %5138 = vmatpush3.bf16.xpose.msra.mxu1 %v2961_v41  ;;  %5186 = vmatpush3.bf16.xpose.msra.mxu0 %v3475_v0 }
 0xfd9   :  { %5143 = vmatprep.subr.bf16.mxu1 %v3075_v51 }
 0xfdf   :  { %5140 = vmatmul.mubr.bf16.vlgmr.msra.gmra.mrb[44].mxu1 %v7141_v29  ;;  %5188 = vmatmul.mubr.bf16.vlgmr.msra.gmra.mrb[52].mxu0 %v7141_v29 }
 0xfe0   :  { %5144 = vmatpush3.bf16.xpose.msra.mxu1 %v3075_v51  ;;  %5147 = vmatprep.mubr.bf16.mxu1 %v7098_v39 }
 0xfe1   :  { %5145 = vmatprep.subr.bf16.mxu1 %v3076_v40 }
 0xfe8   :  { %5146 = vmatpush3.bf16.xpose.msra.mxu1 %v3076_v40 }
 0xfe9   :  { %5151 = vmatprep.subr.bf16.mxu1 %v7062_v63 }
 0xfef   :  { %5148 = vmatmul.mubr.bf16.vlgmr.msra.gmra.mrb[48].mxu1 %v7141_v29 }
 0xff0   :  { %5152 = vmatpush3.bf16.msra.mxu1 %v7062_v63 }
 0xff1   :  { %5153 = vmatprep.subr.bf16.mxu1 %v7058_v61 }
 0xff4   :  { %5154 = vmatpush3.bf16.msra.mxu1 %v7058_v61 }
 0xff5   :  { %5159 = vmatprep.subr.bf16.mxu1 %v7064_v14 }
0x10b2   :  { %v5141_v10 = vpop.f32.mrb[44].mxu1  ;;  %v7161_v11 = vpop.f32.mrb[52].mxu0 }
0x10b3   :  { %v2996_v12 = vpop.f32.mrb[45].mxu1  ;;  %v7163_v13 = vpop.f32.mrb[53].mxu0  ;;  %v3013_v24 = vmul.f32 0.17677669, %v5141_v10 }
0x10b4   :  { %v5142_v56 = vpop.f32.mrb[46].mxu1  ;;  %v7165_v57 = vpop.f32.mrb[54].mxu0  ;;  %v3011_v6 = vmul.f32 0.17677669, %v2996_v12 }
0x10b5   :  { %v2999_v31 = vpop.f32.mrb[47].mxu1  ;;  %v7167_v53 = vpop.f32.mrb[55].mxu0  ;;  %v3014_v27 = vmul.f32 0.17677669, %v5142_v56  ;;  %v3017_v48 = vsel %vm6511_vm3, %v3013_v24, -1e+30 }
0x10b6   :  { %v3012_v30 = vmul.f32 0.17677669, %v2999_v31  ;;  %v3015_v46 = vsel %vm6498_vm0, %v3011_v6, -1e+30  ;;  %v3025_v16 = vsel %vm1235_vm1, %v3017_v48, -inf }
0x10b7   :  { %v3019_v33 = vsel %vm1235_vm1, %v3015_v46, -inf  ;;  %v3018_v5 = vsel %vm6521_vm4, %v3014_v27, -1e+30 }
0x10b8   :  { %v3016_v18 = vsel %vm6506_vm2, %v3012_v30, -1e+30  ;;  %v3028_v34 = vsel %vm1235_vm1, %v3018_v5, -inf }
0x10b9   :  { %v3022_v19 = vsel %vm1235_vm1, %v3016_v18, -inf }
0x10c2   :  { %v5149_v58 = vpop.f32.mrb[48].mxu1 }
0x10c3   :  { %v3111_v63 = vpop.f32.mrb[49].mxu1  ;;  %v3128_v1 = vmul.f32 0.17677669, %v5149_v58 }
0x10c4   :  { %v3126_v26 = vmul.f32 0.17677669, %v3111_v63  ;;  %v5150_v38 = vpop.f32.mrb[50].mxu1 }
0x10c5   :  { %v3114_v61 = vpop.f32.mrb[51].mxu1  ;;  %v3129_v23 = vmul.f32 0.17677669, %v5150_v38  ;;  %v3132_v17 = vsel %vm6511_vm3, %v3128_v1, -1e+30 }
0x10c6   :  { %v3127_v51 = vmul.f32 0.17677669, %v3114_v61  ;;  %v3130_v22 = vsel %vm6498_vm0, %v3126_v26, -1e+30  ;;  %v3140_v3 = vsel %vm1235_vm1, %v3132_v17, -inf }
0x10c7   :  { %v3134_v49 = vsel %vm1235_vm1, %v3130_v22, -inf  ;;  %v3133_v7 = vsel %vm6521_vm4, %v3129_v23, -1e+30 }
0x10c8   :  { %3135 = vmax.xlane.f32.xlu1 %v3134_v49  ;;  %v3131_v8 = vsel %vm6506_vm2, %v3127_v51, -1e+30  ;;  %v3143_v50 = vsel %vm1235_vm1, %v3133_v7, -inf }
0x10c9   :  { %v3137_v32 = vsel %vm1235_vm1, %v3131_v8, -inf }
0x10ca   :  { %3138 = vmax.xlane.f32.xlu0 %v3137_v32 }
0x10cc   :  { %3141 = vmax.xlane.f32.xlu1 %v3140_v3 }
0x10ce   :  { %3144 = vmax.xlane.f32.xlu0 %v3143_v50 }
0x10d0   :  { %3020 = vmax.xlane.f32.xlu1 %v3019_v33 }
0x10d2   :  { %3023 = vmax.xlane.f32.xlu0 %v3022_v19 }
0x10d4   :  { %3026 = vmax.xlane.f32.xlu1 %v3025_v16 }
0x10d6   :  { %3029 = vmax.xlane.f32.xlu0 %v3028_v34 }
0x1155   :  { %v3136_v36 = vpop.xlane.xlu1 %3135 }
0x1156   :  { %v3146_v54 = vsub.f32 %v3130_v22, %v3136_v36 }
0x1157   :  { %v3139_v25 = vpop.xlane.xlu0 %3138 }
0x1158   :  { %v3150_v44 = vmul.f32 1.442695, %v3146_v54  ;;  %v3147_v52 = vsub.f32 %v3131_v8, %v3139_v25 }
0x1159   :  { %v3142_v37 = vpop.xlane.xlu1 %3141 }
0x115a   :  { %5662 = vpow2.f32 %v3150_v44  ;;  %v3152_v41 = vmul.f32 1.442695, %v3147_v52  ;;  %v3148_v0 = vsub.f32 %v3132_v17, %v3142_v37 }
0x115b   :  { %v3145_v40 = vpop.xlane.xlu0 %3144 }
0x115c   :  { %5664 = vpow2.f32 %v3152_v41  ;;  %v3154_v10 = vmul.f32 1.442695, %v3148_v0  ;;  %v3149_v12 = vsub.f32 %v3133_v7, %v3145_v40 }
0x115d   :  { %v3021_v56 = vpop.xlane.xlu1 %3020 }
0x115e   :  { %5666 = vpow2.f32 %v3154_v10  ;;  %v3156_v31 = vmul.f32 1.442695, %v3149_v12  ;;  %v3031_v58 = vsub.f32 %v3015_v46, %v3021_v56 }
0x115f   :  { %v3024_v63 = vpop.xlane.xlu0 %3023 }
0x1160   :  { %5668 = vpow2.f32 %v3156_v31  ;;  %v3035_v1 = vmul.f32 1.442695, %v3031_v58  ;;  %v3032_v26 = vsub.f32 %v3016_v18, %v3024_v63 }
0x1161   :  { %v3027_v38 = vpop.xlane.xlu1 %3026 }
0x1162   :  { %5670 = vpow2.f32 %v3035_v1  ;;  %v3037_v61 = vmul.f32 1.442695, %v3032_v26  ;;  %v3033_v23 = vsub.f32 %v3017_v48, %v3027_v38 }
0x1163   :  { %v3030_v51 = vpop.xlane.xlu0 %3029 }
0x1164   :  { %v5663_v22 = vpop.eup %5662  ;;  %5672 = vpow2.f32 %v3037_v61  ;;  %v3039_v49 = vmul.f32 1.442695, %v3033_v23  ;;  %v3034_v6 = vsub.f32 %v3018_v5, %v3030_v51 }
0x1165   :  { %v3158_v8 = vsel %vm1235_vm1, %v5663_v22, 0.0 }
0x1166   :  { %v5665_v17 = vpop.eup %5664  ;;  %5674 = vpow2.f32 %v3039_v49  ;;  %v3041_v32 = vmul.f32 1.442695, %v3034_v6  ;;  %3159 = vadd.xlane.f32.xlu1 %v3158_v8 }
0x1167   :  { %v3161_v30 = vsel %vm1235_vm1, %v5665_v17, 0.0 }
0x1168   :  { %v5667_v7 = vpop.eup %5666  ;;  %5676 = vpow2.f32 %v3041_v32  ;;  %3162 = vadd.xlane.f32.xlu0 %v3161_v30 }
0x1169   :  { %v3164_v3 = vsel %vm1235_vm1, %v5667_v7, 0.0 }
0x116a   :  { %v5669_v24 = vpop.eup %5668  ;;  %3165 = vadd.xlane.f32.xlu1 %v3164_v3 }
0x116b   :  { %v3167_v46 = vsel %vm1235_vm1, %v5669_v24, 0.0 }
0x116c   :  { %v5671_v50 = vpop.eup %5670  ;;  %3168 = vadd.xlane.f32.xlu0 %v3167_v46 }
0x116d   :  { %v3043_v27 = vsel %vm1235_vm1, %v5671_v50, 0.0 }
0x116e   :  { %v5673_v18 = vpop.eup %5672  ;;  %3044 = vadd.xlane.f32.xlu1 %v3043_v27  ;;  %v3526_v27 = vmul.f32 0.17677669, %v7167_v53 }
0x116f   :  { %v3046_v33 = vsel %vm1235_vm1, %v5673_v18, 0.0 }
0x1170   :  { %v5675_v48 = vpop.eup %5674  ;;  %3047 = vadd.xlane.f32.xlu0 %v3046_v33  ;;  %v3530_v53 = vsel %vm6506_vm2, %v3526_v27, -1e+30  ;;  %v5473_v27 = vld [vmem:[%s7523_s19 + $0x58] sm:$0xff]  }
0x1171   :  { %v3049_v19 = vsel %vm1235_vm1, %v5675_v48, 0.0 }
0x1172   :  { %v5677_v5 = vpop.eup %5676  ;;  %3050 = vadd.xlane.f32.xlu1 %v3049_v19 }
0x1173   :  { %v3052_v16 = vsel %vm1235_vm1, %v5677_v5, 0.0 }
0x1174   :  { %3053 = vadd.xlane.f32.xlu0 %v3052_v16 }
0x11f3   :  { %v3160_v34 = vpop.xlane.xlu1 %3159 }
0x11f4   :  { %5678 = vrcp.f32 %v3160_v34 }
0x11f5   :  { %v3163_v36 = vpop.xlane.xlu0 %3162 }
0x11f6   :  { %5680 = vrcp.f32 %v3163_v36 }
0x11f7   :  { %v3166_v54 = vpop.xlane.xlu1 %3165 }
0x11f8   :  { %5682 = vrcp.f32 %v3166_v54 }
0x11f9   :  { %v3169_v25 = vpop.xlane.xlu0 %3168 }
0x11fa   :  { %5684 = vrcp.f32 %v3169_v25 }
0x11fb   :  { %v3045_v44 = vpop.xlane.xlu1 %3044 }
0x11fc   :  { %5686 = vrcp.f32 %v3045_v44 }
0x11fd   :  { %v3048_v52 = vpop.xlane.xlu0 %3047 }
0x11fe   :  { %v5679_v37 = vpop.eup %5678  ;;  %5688 = vrcp.f32 %v3048_v52 }
0x11ff   :  { %v3051_v0 = vpop.xlane.xlu1 %3050  ;;  %v3174_v10 = vmul.f32 %v5679_v37, %v5663_v22 }
0x1200   :  { %v5681_v41 = vpop.eup %5680 }
0x1201   :  { %v3054_v40 = vpop.xlane.xlu0 %3053  ;;  %v3175_v12 = vmul.f32 %v5681_v41, %v5665_v17 }
0x1202   :  { %v5683_v56 = vpop.eup %5682  ;;  %5690 = vrcp.f32 %v3054_v40 }
0x1203   :  { %v3178_v31 = vpack.c.bf16 %v3175_v12, %v3174_v10  ;;  %5692 = vrcp.f32 %v3051_v0  ;;  %v3176_v63 = vmul.f32 %v5683_v56, %v5667_v7 }
0x1204   :  { %v5685_v58 = vpop.eup %5684 }
0x1205   :  { %v3177_v1 = vmul.f32 %v5685_v58, %v5669_v24  ;;  %5155 = vmatprep.mubr.msk.bf16.mxu1 %vm1235_vm1, %v3178_v31 }
0x1206   :  { %v5687_v26 = vpop.eup %5686 }
0x1207   :  { %v3179_v38 = vpack.c.bf16 %v3177_v1, %v3176_v63  ;;  %v3059_v23 = vmul.f32 %v5687_v26, %v5671_v50 }
0x1208   :  { %v5689_v61 = vpop.eup %5688 }
0x1209   :  { %5156 = vmatmul.mubr.msk.bf16.vlgmr.msra.gmra.mrb[52].mxu1 %vm1235_vm1, %v3179_v38  ;;  %v3060_v51 = vmul.f32 %v5689_v61, %v5673_v18 }
0x120a   :  { %5160 = vmatpush3.bf16.msra.mxu1 %v7064_v14 }
0x120b   :  { %5161 = vmatprep.subr.bf16.mxu1 %v7060_v62  ;;  %v3063_v22 = vpack.c.bf16 %v3060_v51, %v3059_v23 }
0x120c   :  { %v5691_v49 = vpop.eup %5690 }
0x120d   :  { %5163 = vmatprep.mubr.msk.bf16.mxu1 %vm1235_vm1, %v3063_v22  ;;  %v5693_v6 = vpop.eup %5692  ;;  %v3062_v8 = vmul.f32 %v5691_v49, %v5677_v5  ;;  %v3528_v5 = vmul.f32 0.17677669, %v7165_v57 }
0x120e   :  { %5162 = vmatpush3.bf16.msra.mxu1 %v7060_v62  ;;  %v3061_v17 = vmul.f32 %v5693_v6, %v5675_v48  ;;  %v3527_v48 = vmul.f32 0.17677669, %v7161_v11  ;;  %v3536_v11 = vsel %vm1235_vm1, %v3530_v53, -inf }
0x120f   :  { %5167 = vmatprep.subr.bf16.mxu1 %v7124_v21  ;;  %v3532_v55 = vsel %vm6521_vm4, %v3528_v5, -1e+30 }
0x1210   :  { %v3064_v32 = vpack.c.bf16 %v3062_v8, %v3061_v17  ;;  %v3531_v34 = vsel %vm6511_vm3, %v3527_v48, -1e+30  ;;  %v3542_v57 = vsel %vm1235_vm1, %v3532_v55, -inf  ;;  %v5476_v48 = vld [vmem:[%s7523_s19 + $0x70] sm:$0xff]  }
0x1211   :  { %v3539_v36 = vsel %vm1235_vm1, %v3531_v34, -inf }
0x1215   :  { %5164 = vmatmul.mubr.msk.bf16.vlgmr.msra.gmra.mrb[52].mxu1 %vm1235_vm1, %v3064_v32 }
0x1216   :  { %5171 = vmatprep.mubr.bf16.mxu1 %v7098_v39 }
0x1217   :  { %5168 = vmatpush3.bf16.xpose.msra.mxu1 %v7124_v21 }
0x1218   :  { %5169 = vmatprep.subr.bf16.mxu1 %v7150_v45 }
0x121f   :  { %5170 = vmatpush3.bf16.xpose.msra.mxu1 %v7150_v45 }
0x1220   :  { %5175 = vmatprep.subr.bf16.mxu1 %v7070_v20 }
0x1226   :  { %5172 = vmatmul.mubr.bf16.vlgmr.msra.gmra.mrb[56].mxu1 %v7141_v29 }
0x1227   :  { %5176 = vmatpush3.bf16.msra.mxu1 %v7070_v20  ;;  %v3525_v20 = vmul.f32 0.17677669, %v7163_v13 }
0x1228   :  { %5177 = vmatprep.subr.bf16.mxu1 %v7066_v15 }
0x1229   :  { %v3529_v13 = vsel %vm6498_vm0, %v3525_v20, -1e+30 }
0x122a   :  { %v3533_v16 = vsel %vm1235_vm1, %v3529_v13, -inf }
0x122b   :  { %5178 = vmatpush3.bf16.msra.mxu1 %v7066_v15 }
0x122c   :  { %5191 = vmatprep.subr.bf16.mxu1 %v7072_v47 }
0x12f9   :  { %v5173_v62 = vpop.f32.mrb[56].mxu1 }
0x12fa   :  { %v3336_v14 = vpop.f32.mrb[57].mxu1  ;;  %v3353_v39 = vmul.f32 0.17677669, %v5173_v62 }
0x12fb   :  { %v3351_v21 = vmul.f32 0.17677669, %v3336_v14  ;;  %v5174_v30 = vpop.f32.mrb[58].mxu1 }
0x12fc   :  { %v3339_v7 = vpop.f32.mrb[59].mxu1  ;;  %v3354_v3 = vmul.f32 0.17677669, %v5174_v30  ;;  %v3357_v46 = vsel %vm6511_vm3, %v3353_v39, -1e+30 }
0x12fd   :  { %v3352_v45 = vmul.f32 0.17677669, %v3339_v7  ;;  %v3355_v24 = vsel %vm6498_vm0, %v3351_v21, -1e+30  ;;  %v3365_v33 = vsel %vm1235_vm1, %v3357_v46, -inf }
0x12fe   :  { %v3359_v29 = vsel %vm1235_vm1, %v3355_v24, -inf  ;;  %v3358_v18 = vsel %vm6521_vm4, %v3354_v3, -1e+30 }
0x12ff   :  { %3360 = vmax.xlane.f32.xlu1 %v3359_v29  ;;  %v3356_v15 = vsel %vm6506_vm2, %v3352_v45, -1e+30  ;;  %v3368_v19 = vsel %vm1235_vm1, %v3358_v18, -inf }
0x1300   :  { %v3362_v50 = vsel %vm1235_vm1, %v3356_v15, -inf }
0x1301   :  { %3363 = vmax.xlane.f32.xlu0 %v3362_v50  ;;  %v5472_v50 = vld [vmem:[%s7523_s19 + $0x50] sm:$0xff]  }
0x1303   :  { %3366 = vmax.xlane.f32.xlu1 %v3365_v33  ;;  %v5475_v33 = vld [vmem:[%s7523_s19 + $0x68] sm:$0xff]  }
0x1305   :  { %3369 = vmax.xlane.f32.xlu0 %v3368_v19 }
0x1307   :  { %3534 = vmax.xlane.f32.xlu1 %v3533_v16 }
0x1309   :  { %3537 = vmax.xlane.f32.xlu0 %v3536_v11 }
0x130b   :  { %3540 = vmax.xlane.f32.xlu1 %v3539_v36 }
0x130d   :  { %3543 = vmax.xlane.f32.xlu0 %v3542_v57 }
0x138c   :  { %v3361_v59 = vpop.xlane.xlu1 %3360 }
0x138d   :  { %v3371_v54 = vsub.f32 %v3355_v24, %v3361_v59 }
0x138e   :  { %v3364_v25 = vpop.xlane.xlu0 %3363 }
0x138f   :  { %v3375_v44 = vmul.f32 1.442695, %v3371_v54  ;;  %v3372_v52 = vsub.f32 %v3356_v15, %v3364_v25  ;;  %v5470_v15 = vld [vmem:[%s7523_s19 + $0x40] sm:$0xff]  }
0x1390   :  { %v3367_v37 = vpop.xlane.xlu1 %3366  ;;  %5199 = vmatprep.subr.bf16.mxu0 %v5470_v15 }
0x1391   :  { %5694 = vpow2.f32 %v3375_v44  ;;  %v3377_v60 = vmul.f32 1.442695, %v3372_v52  ;;  %v3373_v41 = vsub.f32 %v3357_v46, %v3367_v37  ;;  %v5471_v46 = vld [vmem:[%s7523_s19 + $0x48] sm:$0xff]   ;;  %5200 = vmatpush3.bf16.msra.mxu0 %v5470_v15 }
0x1392   :  { %v3370_v0 = vpop.xlane.xlu0 %3369  ;;  %5201 = vmatprep.subr.bf16.mxu0 %v5471_v46 }
0x1393   :  { %5696 = vpow2.f32 %v3377_v60  ;;  %v3379_v40 = vmul.f32 1.442695, %v3373_v41  ;;  %v3374_v9 = vsub.f32 %v3358_v18, %v3370_v0  ;;  %v5474_v18 = vld [vmem:[%s7523_s19 + $0x60] sm:$0xff]  }
0x1394   :  { %v3535_v10 = vpop.xlane.xlu1 %3534 }
0x1395   :  { %5698 = vpow2.f32 %v3379_v40  ;;  %v3381_v12 = vmul.f32 1.442695, %v3374_v9  ;;  %v3545_v56 = vsub.f32 %v3529_v13, %v3535_v10  ;;  %5202 = vmatpush3.bf16.msra.mxu0 %v5471_v46 }
0x1396   :  { %v3538_v31 = vpop.xlane.xlu0 %3537  ;;  %5203 = vmatprep.subr.bf16.mxu0 %v5472_v50 }
0x1397   :  { %5700 = vpow2.f32 %v3381_v12  ;;  %v3549_v58 = vmul.f32 1.442695, %v3545_v56  ;;  %v3546_v63 = vsub.f32 %v3530_v53, %v3538_v31 }
0x1398   :  { %v3541_v1 = vpop.xlane.xlu1 %3540 }
0x1399   :  { %5702 = vpow2.f32 %v3549_v58  ;;  %v3551_v26 = vmul.f32 1.442695, %v3546_v63  ;;  %v3547_v38 = vsub.f32 %v3531_v34, %v3541_v1  ;;  %5204 = vmatpush3.bf16.msra.mxu0 %v5472_v50 }
0x139a   :  { %v3544_v61 = vpop.xlane.xlu0 %3543  ;;  %5205 = vmatprep.subr.bf16.mxu0 %v5473_v27 }
0x139b   :  { %v7247_v23 = vpop.eup %5694  ;;  %5704 = vpow2.f32 %v3551_v26  ;;  %v3553_v51 = vmul.f32 1.442695, %v3547_v38  ;;  %v3548_v22 = vsub.f32 %v3532_v55, %v3544_v61 }
0x139c   :  { %v3383_v49 = vsel %vm1235_vm1, %v7247_v23, 0.0 }
0x139d   :  { %v7251_v6 = vpop.eup %5696  ;;  %5706 = vpow2.f32 %v3553_v51  ;;  %v3555_v8 = vmul.f32 1.442695, %v3548_v22  ;;  %3384 = vadd.xlane.f32.xlu1 %v3383_v49  ;;  %5206 = vmatpush3.bf16.msra.mxu0 %v5473_v27  ;;  %v5478_v22 = vld [vmem:[%s7525_s21 + $0x100] ss:$16 sps:$4 sm:$0xff]   ;;  %v5480_v49 = vld [vmem:[%s7525_s21 + $0x104] ss:$16 sps:$4 sm:$0xff]  }
0x139e   :  { %v3386_v17 = vsel %vm1235_vm1, %v7251_v6, 0.0  ;;  %5207 = vmatprep.subr.bf16.mxu0 %v5474_v18 }
0x139f   :  { %v7255_v32 = vpop.eup %5698  ;;  %5708 = vpow2.f32 %v3555_v8  ;;  %3387 = vadd.xlane.f32.xlu0 %v3386_v17  ;;  %v5483_v8 = vld [vmem:[%s7525_s21 + $0x10c] ss:$16 sps:$4 sm:$0xff]   ;;  %v5486_v17 = vld [vmem:[%s7525_s21 + $0x124] ss:$16 sps:$4 sm:$0xff]  }
0x13a0   :  { %v3389_v62 = vsel %vm1235_vm1, %v7255_v32, 0.0 }
0x13a1   :  { %v5701_v14 = vpop.eup %5700  ;;  %3390 = vadd.xlane.f32.xlu1 %v3389_v62  ;;  %5208 = vmatpush3.bf16.msra.mxu0 %v5474_v18  ;;  %v5484_v62 = vld [vmem:[%s7525_s21 + $0x120] ss:$16 sps:$4 sm:$0xff]  }
0x13a2   :  { %v3392_v39 = vsel %vm1235_vm1, %v5701_v14, 0.0  ;;  %5209 = vmatprep.subr.bf16.mxu0 %v5475_v33 }
0x13a3   :  { %v7260_v21 = vpop.eup %5702  ;;  %3393 = vadd.xlane.f32.xlu0 %v3392_v39  ;;  %v5492_v39 = vld [vmem:[%s7525_s21 + $0x144] ss:$16 sps:$4 sm:$0xff]  }
0x13a4   :  { %v3557_v30 = vsel %vm1235_vm1, %v7260_v21, 0.0 }
0x13a5   :  { %v5705_v7 = vpop.eup %5704  ;;  %3558 = vadd.xlane.f32.xlu1 %v3557_v30  ;;  %5210 = vmatpush3.bf16.msra.mxu0 %v5475_v33  ;;  %v5490_v30 = vld [vmem:[%s7525_s21 + $0x140] ss:$16 sps:$4 sm:$0xff]  }
0x13a6   :  { %v3560_v3 = vsel %vm1235_vm1, %v5705_v7, 0.0  ;;  %5211 = vmatprep.subr.bf16.mxu0 %v5476_v48  ;;  %v5496_v33 = vld [vmem:[%s7525_s21 + $0x160] ss:$16 sps:$4 sm:$0xff]  }
0x13a7   :  { %v7265_v45 = vpop.eup %5706  ;;  %3561 = vadd.xlane.f32.xlu0 %v3560_v3 }
0x13a8   :  { %v3563_v24 = vsel %vm1235_vm1, %v7265_v45, 0.0 }
0x13a9   :  { %v7269_v29 = vpop.eup %5708  ;;  %3564 = vadd.xlane.f32.xlu1 %v3563_v24  ;;  %5212 = vmatpush3.bf16.msra.mxu0 %v5476_v48  ;;  %v5499_v48 = vld [vmem:[%s7525_s21 + $0x168] ss:$16 sps:$4 sm:$0xff]  }
0x13aa   :  { %v3566_v20 = vsel %vm1235_vm1, %v7269_v29, 0.0 }
0x13ab   :  { %3567 = vadd.xlane.f32.xlu0 %v3566_v20 }
0x142a   :  { %v3385_v13 = vpop.xlane.xlu1 %3384 }
0x142b   :  { %5710 = vrcp.f32 %v3385_v13  ;;  %v5504_v13 = vld [vmem:[%s7525_s21 + $0x184] ss:$16 sps:$4 sm:$0xff]  }
0x142c   :  { %v3388_v19 = vpop.xlane.xlu0 %3387 }
0x142d   :  { %5712 = vrcp.f32 %v3388_v19  ;;  %v5507_v19 = vld [vmem:[%s7525_s21 + $0x18c] ss:$16 sps:$4 sm:$0xff]  }
0x142e   :  { %v3391_v5 = vpop.xlane.xlu1 %3390 }
0x142f   :  { %5714 = vrcp.f32 %v3391_v5  ;;  %v5502_v5 = vld [vmem:[%s7525_s21 + $0x180] ss:$16 sps:$4 sm:$0xff]  }
0x1430   :  { %v3394_v53 = vpop.xlane.xlu0 %3393 }
0x1431   :  { %5716 = vrcp.f32 %v3394_v53  ;;  %v5505_v53 = vld [vmem:[%s7525_s21 + $0x188] ss:$16 sps:$4 sm:$0xff]  }
0x1432   :  { %v3559_v16 = vpop.xlane.xlu1 %3558 }
0x1433   :  { %5718 = vrcp.f32 %v3559_v16  ;;  %v5510_v16 = vld [vmem:[%s7525_s21 + $0x1a4] ss:$16 sps:$4 sm:$0xff]  }
0x1434   :  { %v3562_v34 = vpop.xlane.xlu0 %3561 }
0x1435   :  { %v5711_v11 = vpop.eup %5710  ;;  %5720 = vrcp.f32 %v3562_v34  ;;  %v5508_v34 = vld [vmem:[%s7525_s21 + $0x1a0] ss:$16 sps:$4 sm:$0xff]  }
0x1436   :  { %v3565_v36 = vpop.xlane.xlu1 %3564  ;;  %v3399_v59 = vmul.f32 %v5711_v11, %v7247_v23  ;;  %v5511_v11 = vld [vmem:[%s7525_s21 + $0x1a8] ss:$16 sps:$4 sm:$0xff]  }
0x1437   :  { %v5713_v55 = vpop.eup %5712 }
0x1438   :  { %v3568_v57 = vpop.xlane.xlu0 %3567  ;;  %v3400_v54 = vmul.f32 %v5713_v55, %v7251_v6  ;;  %v5481_v6 = vld [vmem:[%s7525_s21 + $0x108] ss:$16 sps:$4 sm:$0xff]   ;;  %v5513_v55 = vld [vmem:[%s7525_s21 + $0x1ac] ss:$16 sps:$4 sm:$0xff]  }
0x1439   :  { %v5715_v25 = vpop.eup %5714  ;;  %5722 = vrcp.f32 %v3568_v57  ;;  %v5519_v57 = vld [vmem:[%s7525_s21 + $0x1cc] ss:$16 sps:$4 sm:$0xff]  }
0x143a   :  { %v3403_v44 = vpack.c.bf16 %v3400_v54, %v3399_v59  ;;  %5724 = vrcp.f32 %v3565_v36  ;;  %v3401_v37 = vmul.f32 %v5715_v25, %v7255_v32  ;;  %v5489_v32 = vld [vmem:[%s7525_s21 + $0x12c] ss:$16 sps:$4 sm:$0xff]   ;;  %v5516_v36 = vld [vmem:[%s7525_s21 + $0x1c4] ss:$16 sps:$4 sm:$0xff]   ;;  %v5514_v59 = vld [vmem:[%s7525_s21 + $0x1c0] ss:$16 sps:$4 sm:$0xff]  }
0x143b   :  { %v5717_v52 = vpop.eup %5716  ;;  %v5517_v54 = vld [vmem:[%s7525_s21 + $0x1c8] ss:$16 sps:$4 sm:$0xff]   ;;  %v5522_v25 = vld [vmem:[%s7525_s21 + $0x1e4] ss:$16 sps:$4 sm:$0xff]  }
0x143c   :  { %v3402_v60 = vmul.f32 %v5717_v52, %v5701_v14  ;;  %5179 = vmatprep.mubr.msk.bf16.mxu1 %vm1235_vm1, %v3403_v44  ;;  %v5487_v14 = vld [vmem:[%s7525_s21 + $0x128] ss:$16 sps:$4 sm:$0xff]   ;;  %v5525_v44 = vld [vmem:[%s7525_s21 + $0x1ec] ss:$16 sps:$4 sm:$0xff]   ;;  %v5520_v52 = vld [vmem:[%s7525_s21 + $0x1e0] ss:$16 sps:$4 sm:$0xff]  }
0x143d   :  { %v5719_v41 = vpop.eup %5718 }
0x143e   :  { %v3404_v0 = vpack.c.bf16 %v3402_v60, %v3401_v37  ;;  %v3573_v9 = vmul.f32 %v5719_v41, %v7260_v21  ;;  %v5495_v21 = vld [vmem:[%s7525_s21 + $0x14c] ss:$16 sps:$4 sm:$0xff]   ;;  %v5523_v37 = vld [vmem:[%s7525_s21 + $0x1e8] ss:$16 sps:$4 sm:$0xff]  }
0x143f   :  { %v5721_v40 = vpop.eup %5720 }
0x1440   :  { %5180 = vmatmul.mubr.msk.bf16.vlgmr.msra.gmra.mrb[52].mxu1 %vm1235_vm1, %v3404_v0  ;;  %v3574_v10 = vmul.f32 %v5721_v40, %v5705_v7  ;;  %v5493_v7 = vld [vmem:[%s7525_s21 + $0x148] ss:$16 sps:$4 sm:$0xff]  }
0x1441   :  { %5192 = vmatpush3.bf16.msra.mxu1 %v7072_v47  ;;  %v5477_v47 = vld [vmem:[%s7523_s19 + $0x78] sm:$0xff]  }
0x1442   :  { %5193 = vmatprep.subr.bf16.mxu1 %v7068_v4  ;;  %v3577_v12 = vpack.c.bf16 %v3574_v10, %v3573_v9  ;;  %5213 = vmatprep.subr.bf16.mxu0 %v5477_v47 }
0x1443   :  { %v5723_v56 = vpop.eup %5722  ;;  %5214 = vmatpush3.bf16.msra.mxu0 %v5477_v47 }
0x1444   :  { %5195 = vmatprep.mubr.msk.bf16.mxu1 %vm1235_vm1, %v3577_v12  ;;  %v5725_v31 = vpop.eup %5724  ;;  %v3576_v58 = vmul.f32 %v5723_v56, %v7269_v29  ;;  %4052 = vmatprep.subr.bf16.mxu0 %v5483_v8 }
0x1445   :  { %5194 = vmatpush3.bf16.msra.mxu1 %v7068_v4  ;;  %v3575_v63 = vmul.f32 %v5725_v31, %v7265_v45 }
0x1446   :  { %3999 = vmatprep.subr.bf16.mxu1 %v5480_v49 }
0x1447   :  { %v3578_v1 = vpack.c.bf16 %v3576_v58, %v3575_v63 }
0x144c   :  { %5196 = vmatmul.mubr.msk.bf16.vlgmr.msra.gmra.mrb[52].mxu1 %vm1235_vm1, %v3578_v1 }
0x144d   :  { %4031 = vmatprep.mubr.bf16.mxu1 %v5846_v2  ;;  %4000 = vmatpush1.bf16.msra.mxu1 %v5478_v22 }
0x144e   :  { %4001 = vmatprep.subr.bf16.mxu1 %v5486_v17 }
0x1451   :  { %4002 = vmatpush1.bf16.msra.mxu1 %v5484_v62 }
0x1452   :  { %4003 = vmatprep.subr.bf16.mxu1 %v5492_v39  ;;  %v5526_v39 = vld [vmem:[%s7526_s22 + $0xc0] sm:$0xff]  }
0x1455   :  { %4004 = vmatpush1.bf16.msra.mxu1 %v5490_v30  ;;  %v5528_v30 = vld [vmem:[%s7526_s22 + $0xc8] sm:$0xff]  }
0x151f   :  { %v5197_v26 = vpop.f32.mrb[52].mxu1 }
0x1520   :  { %v3625_v38 = vpop.f32.mrb[53].mxu1 }
0x1521   :  { %v5198_v61 = vpop.f32.mrb[54].mxu1 }
0x1522   :  { %v3645_v23 = vpack.c.bf16 %v5198_v61, %v5197_v26  ;;  %v3628_v4 = vpop.f32.mrb[55].mxu1  ;;  %v4669_v61 = vld [vmem:[%s7524_s20 + $0x1] ss:$0 sm:$0xff] }
0x1523   :  { %v3644_v51 = vpack.c.bf16 %v3628_v4, %v3625_v38 }
0x1525   :  { %5215 = vmatprep.mubr.bf16.mxu0 %v3644_v51 }
0x1526   :  { %5216 = vmatmul.mubr.bf16.vlgmr.msra.gmra.mrb[56].mxu0 %v3645_v23 }
0x1527   :  { %4084 = vmatprep.mubr.bf16.mxu0 %v5846_v2  ;;  %4053 = vmatpush1.bf16.msra.mxu0 %v5481_v6 }
0x1528   :  { %4054 = vmatprep.subr.bf16.mxu0 %v5489_v32 }
0x152b   :  { %4055 = vmatpush1.bf16.msra.mxu0 %v5487_v14 }
0x152c   :  { %4056 = vmatprep.subr.bf16.mxu0 %v5495_v21  ;;  %v5527_v21 = vld [vmem:[%s7526_s22 + $0x80] sm:$0xff]  }
0x152f   :  { %4057 = vmatpush1.bf16.msra.mxu0 %v5493_v7  ;;  %v5530_v7 = vld [vmem:[%s7526_s22 + $0xd0] sm:$0xff]  }
0x15f9   :  { %v5217_v3 = vpop.f32.mrb[56].mxu0 }
0x15fa   :  { %v3745_v45 = vpop.f32.mrb[57].mxu0  ;;  %v7352_v15 = vadd.f32 %v5217_v3, %v6866_v28  ;;  %v5531_v3 = vld [vmem:[%s7526_s22 + $0x90] sm:$0xff]  }
0x15fb   :  { %v7349_v24 = vadd.f32 %v3745_v45, %v6856_v43  ;;  %v5218_v29 = vpop.f32.mrb[58].mxu0  ;;  %v5532_v45 = vld [vmem:[%s7526_s22 + $0xd8] sm:$0xff]  }
0x15fc   :  { %v3748_v20 = vpop.f32.mrb[59].mxu0  ;;  %v7360_v27 = vadd.f32 %v5218_v29, %v6869_v42  ;;  %v3768_v43 = vmul.f32 %v7352_v15, %v7352_v15  ;;  %v5501_v42 = vld [vmem:[%s7525_s21 + $0x16c] ss:$16 sps:$4 sm:$0xff]  }
0x15fd   :  { %v7355_v46 = vadd.f32 %v3748_v20, %v6859_v35  ;;  %v3766_v50 = vmul.f32 %v7349_v24, %v7349_v24  ;;  %v5498_v35 = vld [vmem:[%s7525_s21 + $0x164] ss:$16 sps:$4 sm:$0xff]   ;;  %4058 = vmatprep.subr.bf16.mxu0 %v5501_v42  ;;  %v5533_v29 = vld [vmem:[%s7526_s22 + $0x98] sm:$0xff]  }
0x15fe   :  { %v3769_v28 = vmul.f32 %v7360_v27, %v7360_v27  ;;  %4005 = vmatprep.subr.bf16.mxu1 %v5498_v35  ;;  %4059 = vmatpush1.bf16.msra.mxu0 %v5499_v48  ;;  %v5534_v20 = vld [vmem:[%s7526_s22 + $0xe0] sm:$0xff]   ;;  %v5539_v35 = vld [vmem:[%s7526_s22 + $0xb0] sm:$0xff]   ;;  %v5540_v42 = vld [vmem:[%s7526_s22 + $0xf8] sm:$0xff]  }
0x15ff   :  { %3770 = vadd.xlane.f32.xlu1 %v3766_v50  ;;  %v3767_v18 = vmul.f32 %v7355_v46, %v7355_v46  ;;  %4006 = vmatpush1.bf16.msra.mxu1 %v5496_v33  ;;  %v5535_v50 = vld [vmem:[%s7526_s22 + $0xa0] sm:$0xff]   ;;  %v5541_v33 = vld [vmem:[%s7526_s22 + $0xb8] sm:$0xff]  }
0x1600   :  { %4007 = vmatprep.subr.bf16.mxu1 %v5504_v13  ;;  %4060 = vmatprep.subr.bf16.mxu0 %v5507_v19 }
0x1601   :  { %3772 = vadd.xlane.f32.xlu0 %v3767_v18  ;;  %v5536_v18 = vld [vmem:[%s7526_s22 + $0xe8] sm:$0xff]  }
0x1602   :  { %4061 = vmatpush1.bf16.msra.mxu0 %v5505_v53 }
0x1603   :  { %3774 = vadd.xlane.f32.xlu1 %v3768_v43  ;;  %4008 = vmatpush1.bf16.msra.mxu1 %v5502_v5  ;;  %v5537_v43 = vld [vmem:[%s7526_s22 + $0xa8] sm:$0xff]  }
0x1604   :  { %4009 = vmatprep.subr.bf16.mxu1 %v5510_v16  ;;  %4062 = vmatprep.subr.bf16.mxu0 %v5513_v55 }
0x1605   :  { %3776 = vadd.xlane.f32.xlu0 %v3769_v28  ;;  %v5538_v28 = vld [vmem:[%s7526_s22 + $0xf0] sm:$0xff]  }
0x1606   :  { %4063 = vmatpush1.bf16.msra.mxu0 %v5511_v11 }
0x1607   :  { %4010 = vmatpush1.bf16.msra.mxu1 %v5508_v34  ;;  %4064 = vmatprep.subr.bf16.mxu0 %v5519_v57 }
0x1608   :  { %4011 = vmatprep.subr.bf16.mxu1 %v5516_v36 }
0x160a   :  { %4065 = vmatpush1.bf16.msra.mxu0 %v5517_v54 }
0x160b   :  { %4012 = vmatpush1.bf16.msra.mxu1 %v5514_v59  ;;  %4066 = vmatprep.subr.bf16.mxu0 %v5525_v44 }
0x160c   :  { %4013 = vmatprep.subr.bf16.mxu1 %v5522_v25 }
0x160e   :  { %4067 = vmatpush1.bf16.msra.mxu0 %v5523_v37 }
0x160f   :  { %4014 = vmatpush1.bf16.msra.mxu1 %v5520_v52 }
0x1610   :  { %4943 = vmatprep.subr.bf16.mxu1 %v5526_v39 }
0x168c   :  { %v3771_v60 = vpop.xlane.xlu1 %3770 }
0x168d   :  { %v3778_v41 = vmul.f32 0.0078125, %v3771_v60 }
0x168e   :  { %v3773_v0 = vpop.xlane.xlu0 %3772 }
0x168f   :  { %v3782_v40 = vadd.f32 1e-05, %v3778_v41  ;;  %v3779_v9 = vmul.f32 0.0078125, %v3773_v0 }
0x1690   :  { %v3775_v10 = vpop.xlane.xlu1 %3774 }
0x1691   :  { %5726 = vrsqrt.f32 %v3782_v40  ;;  %v3783_v12 = vadd.f32 1e-05, %v3779_v9  ;;  %v3780_v56 = vmul.f32 0.0078125, %v3775_v10 }
0x1692   :  { %v3777_v31 = vpop.xlane.xlu0 %3776 }
0x1693   :  { %5728 = vrsqrt.f32 %v3783_v12  ;;  %v3784_v58 = vadd.f32 1e-05, %v3780_v56  ;;  %v3781_v63 = vmul.f32 0.0078125, %v3777_v31 }
0x1695   :  { %v3785_v1 = vadd.f32 1e-05, %v3781_v63  ;;  %5730 = vrsqrt.f32 %v3784_v58 }
0x1697   :  { %5732 = vrsqrt.f32 %v3785_v1 }
0x169b   :  { %v5727_v47 = vpop.eup %5726 }
0x169c   :  { %v3790_v26 = vmul.f32 %v5727_v47, %v7349_v24 }
0x169d   :  { %v5729_v38 = vpop.eup %5728 }
0x169e   :  { %v3791_v23 = vmul.f32 %v5729_v38, %v7355_v46  ;;  %v3800_v51 = vmul.f32 %v4669_v61, %v3790_v26 }
0x169f   :  { %v5731_v4 = vpop.eup %5730 }
0x16a0   :  { %v3801_v22 = vmul.f32 %v4669_v61, %v3791_v23  ;;  %v3792_v17 = vmul.f32 %v5731_v4, %v7352_v15 }
0x16a1   :  { %v5733_v49 = vpop.eup %5732 }
0x16a2   :  { %v3804_v6 = vpack.c.bf16 %v3801_v22, %v3800_v51  ;;  %v3793_v8 = vmul.f32 %v5733_v49, %v7360_v27  ;;  %v3802_v62 = vmul.f32 %v4669_v61, %v3792_v17 }
0x16a4   :  { %4032 = vmatmul.mubr.bf16.vlgmr.msra.gmra.mrb[60].mxu1 %v3804_v6  ;;  %4085 = vmatmul.mubr.bf16.vlgmr.msra.gmra.mrb[60].mxu0 %v3804_v6  ;;  %v3803_v32 = vmul.f32 %v4669_v61, %v3793_v8 }
0x16a5   :  { %4041 = vmatprep.mubr.bf16.mxu1 %v5846_v2  ;;  %4094 = vmatprep.mubr.bf16.mxu0 %v5846_v2  ;;  %v5529_v2 = vld [vmem:[%s7526_s22 + $0x88] sm:$0xff]  }
0x16a6   :  { %v3805_v14 = vpack.c.bf16 %v3803_v32, %v3802_v62  ;;  %4944 = vmatpush3.bf16.msra.mxu1 %v5527_v21 }
0x16a7   :  { %4945 = vmatprep.subr.bf16.mxu1 %v5528_v30 }
0x16aa   :  { %4946 = vmatpush3.bf16.msra.mxu1 %v5529_v2 }
0x16ab   :  { %4947 = vmatprep.subr.bf16.mxu1 %v5530_v7 }
0x16ac   :  { %4042 = vmatmul.mubr.bf16.gmra.mrb[64].mxu1 %v3805_v14  ;;  %4095 = vmatmul.mubr.bf16.gmra.mrb[64].mxu0 %v3805_v14 }
0x16ae   :  { %4948 = vmatpush3.bf16.msra.mxu1 %v5531_v3 }
0x16af   :  { %4949 = vmatprep.subr.bf16.mxu1 %v5532_v45 }
0x16b2   :  { %4950 = vmatpush3.bf16.msra.mxu1 %v5533_v29 }
0x16b3   :  { %4951 = vmatprep.subr.bf16.mxu1 %v5534_v20 }
0x16b6   :  { %4952 = vmatpush3.bf16.msra.mxu1 %v5535_v50 }
0x16b7   :  { %4953 = vmatprep.subr.bf16.mxu1 %v5536_v18 }
0x16ba   :  { %4954 = vmatpush3.bf16.msra.mxu1 %v5537_v43 }
0x16bb   :  { %4955 = vmatprep.subr.bf16.mxu1 %v5538_v28 }
0x16be   :  { %4956 = vmatpush3.bf16.msra.mxu1 %v5539_v35 }
0x16bf   :  { %4957 = vmatprep.subr.bf16.mxu1 %v5540_v42 }
0x16c2   :  { %4958 = vmatpush3.bf16.msra.mxu1 %v5541_v33 }
0x1777   :  { %v4033_v48 = vpop.f32.mrb[60].mxu1  ;;  %v4086_v13 = vpop.f32.mrb[60].mxu0 }
0x1778   :  { %v4734_v19 = vmul.f32 -1.442695, %v4033_v48  ;;  %v4035_v5 = vpop.f32.mrb[61].mxu1  ;;  %v4088_v53 = vpop.f32.mrb[61].mxu0 }
0x1779   :  { %v4735_v16 = vmul.f32 -1.442695, %v4035_v5  ;;  %v4037_v34 = vpop.f32.mrb[62].mxu1  ;;  %v4090_v11 = vpop.f32.mrb[62].mxu0 }
0x177a   :  { %5734 = vpow2.f32 %v4734_v19  ;;  %v4736_v55 = vmul.f32 -1.442695, %v4037_v34  ;;  %v4039_v36 = vpop.f32.mrb[63].mxu1  ;;  %v4092_v57 = vpop.f32.mrb[63].mxu0 }
0x177b   :  { %5736 = vpow2.f32 %v4735_v16  ;;  %v4737_v59 = vmul.f32 -1.442695, %v4039_v36 }
0x177c   :  { %5738 = vpow2.f32 %v4736_v55 }
0x177d   :  { %5740 = vpow2.f32 %v4737_v59 }
0x177f   :  { %v4043_v54 = vpop.f32.mrb[64].mxu1  ;;  %v4096_v25 = vpop.f32.mrb[64].mxu0 }
0x1780   :  { %v4738_v44 = vmul.f32 -1.442695, %v4043_v54  ;;  %v4045_v52 = vpop.f32.mrb[65].mxu1  ;;  %v4098_v37 = vpop.f32.mrb[65].mxu0 }
0x1781   :  { %v4739_v60 = vmul.f32 -1.442695, %v4045_v52  ;;  %v4047_v41 = vpop.f32.mrb[66].mxu1  ;;  %v4100_v0 = vpop.f32.mrb[66].mxu0 }
0x1782   :  { %5742 = vpow2.f32 %v4738_v44  ;;  %v4740_v40 = vmul.f32 -1.442695, %v4047_v41  ;;  %v4049_v9 = vpop.f32.mrb[67].mxu1  ;;  %v4102_v10 = vpop.f32.mrb[67].mxu0 }
0x1783   :  { %5744 = vpow2.f32 %v4739_v60  ;;  %v4741_v12 = vmul.f32 -1.442695, %v4049_v9 }
0x1784   :  { %v5735_v56 = vpop.eup %5734  ;;  %5746 = vpow2.f32 %v4740_v40 }
0x1785   :  { %v5737_v31 = vpop.eup %5736  ;;  %v4129_v58 = vadd.f32 1.0, %v5735_v56  ;;  %5748 = vpow2.f32 %v4741_v12 }
0x1786   :  { %v5739_v63 = vpop.eup %5738  ;;  %v4130_v1 = vadd.f32 1.0, %v5737_v31 }
0x1787   :  { %v5741_v47 = vpop.eup %5740  ;;  %5750 = vrcp.f32 %v4129_v58  ;;  %v4131_v26 = vadd.f32 1.0, %v5739_v63 }
0x1788   :  { %5752 = vrcp.f32 %v4130_v1  ;;  %v4132_v38 = vadd.f32 1.0, %v5741_v47 }
0x1789   :  { %5754 = vrcp.f32 %v4131_v26 }
0x178a   :  { %5756 = vrcp.f32 %v4132_v38 }
0x178c   :  { %v5743_v61 = vpop.eup %5742 }
0x178d   :  { %v5745_v23 = vpop.eup %5744  ;;  %v4133_v4 = vadd.f32 1.0, %v5743_v61 }
0x178e   :  { %v5747_v51 = vpop.eup %5746  ;;  %v4134_v22 = vadd.f32 1.0, %v5745_v23 }
0x178f   :  { %v5749_v49 = vpop.eup %5748  ;;  %5758 = vrcp.f32 %v4133_v4  ;;  %v4135_v6 = vadd.f32 1.0, %v5747_v51 }
0x1790   :  { %5760 = vrcp.f32 %v4134_v22  ;;  %v4136_v8 = vadd.f32 1.0, %v5749_v49  ;;  %v4790_v49 = vld [vmem:[%s7520_s16] ss:$0 sm:$0xff]  ;;  %s5822_s16 = scalar_lea.vmem %s4404_s25, 512 }
0x1791   :  { %v5751_v17 = vpop.eup %5750  ;;  %5762 = vrcp.f32 %v4135_v6  ;;  %p5823_p0 = scmp.ne.s32.totalorder %s4404_s25, %s5822_s16  ;;  %p5828_p2 = scmp.lt.s32.totalorder %s5822_s16, %s5822_s16 }
0x1792   :  { %v5753_v32 = vpop.eup %5752  ;;  %v4153_v62 = vmul.f32 %v5751_v17, %v4033_v48  ;;  %5764 = vrcp.f32 %v4136_v8 }
0x1793   :  { %v5755_v14 = vpop.eup %5754  ;;  %v4154_v39 = vmul.f32 %v5753_v32, %v4035_v5  ;;  %p5829_p3 = por %p5828_p2, %p5827_p1 }
0x1794   :  { %v5757_v21 = vpop.eup %5756  ;;  %v4161_v30 = vmul.f32 %v4153_v62, %v4086_v13  ;;  %v4155_v2 = vmul.f32 %v5755_v14, %v4037_v34 }
0x1795   :  { %v4162_v7 = vmul.f32 %v4154_v39, %v4088_v53  ;;  %v4156_v3 = vmul.f32 %v5757_v21, %v4039_v36  ;;  %p5830_p4 = pnand %p5829_p3, %p5823_p0 }
0x1796   :  { %v4163_v45 = vmul.f32 %v4155_v2, %v4090_v11 }
0x1797   :  { %v4164_v29 = vmul.f32 %v4156_v3, %v4092_v57 }
0x1798   :  { %v4169_v20 = vpack.c.bf16 %v4163_v45, %v4161_v30 }
0x1799   :  { %v5759_v50 = vpop.eup %5758  ;;  %v4170_v18 = vpack.c.bf16 %v4164_v29, %v4162_v7 }
0x179a   :  { %v5761_v43 = vpop.eup %5760  ;;  %v4157_v28 = vmul.f32 %v5759_v50, %v4043_v54 }
0x179b   :  { %v5763_v35 = vpop.eup %5762  ;;  %v4158_v42 = vmul.f32 %v5761_v43, %v4045_v52  ;;  %4334 = vmatprep.mubr.bf16.mxu1 %v4170_v18 }
0x179c   :  { %v5765_v33 = vpop.eup %5764  ;;  %v4165_v48 = vmul.f32 %v4157_v28, %v4096_v25  ;;  %v4159_v19 = vmul.f32 %v5763_v35, %v4047_v41  ;;  %4335 = vmatmul.mubr.bf16.vlgmr.msra.gmra.mrb[68].mxu1 %v4169_v20 }
0x179d   :  { %v4166_v5 = vmul.f32 %v4158_v42, %v4098_v37  ;;  %v4160_v16 = vmul.f32 %v5765_v33, %v4049_v9 }
0x179e   :  { %v4167_v13 = vmul.f32 %v4159_v19, %v4100_v0 }
0x179f   :  { %v4168_v34 = vmul.f32 %v4160_v16, %v4102_v10 }
0x17a0   :  { %v4171_v53 = vpack.c.bf16 %v4167_v13, %v4165_v48 }
0x17a1   :  { %v4172_v55 = vpack.c.bf16 %v4168_v34, %v4166_v5 }
0x17a3   :  { %4342 = vmatprep.mubr.bf16.mxu1 %v4172_v55 }
0x17a4   :  { %4343 = vmatmul.mubr.bf16.gmra.mrb[72].mxu1 %v4171_v53 }
0x186f   :  { %v4959_v11 = vpop.f32.mrb[68].mxu1 }
0x1870   :  { %v4960_v36 = vpop.f32.mrb[69].mxu1 }
0x1871   :  { %v4961_v57 = vadd.f32 %v4960_v36, %v4959_v11  ;;  %v4962_v59 = vpop.f32.mrb[70].mxu1 }
0x1872   :  { %v4963_v54 = vpop.f32.mrb[71].mxu1 }
0x1873   :  { %v4351_v44 = vadd.f32 %v4961_v57, %v7349_v24  ;;  %v4964_v52 = vadd.f32 %v4963_v54, %v4962_v59 }
0x1875   :  { %v4352_v25 = vadd.f32 %v4964_v52, %v7355_v46  ;;  %v4356_v60 = vmul.f32 %v4351_v44, %v4351_v44 }
0x1877   :  { %4360 = vadd.xlane.f32.xlu1 %v4356_v60  ;;  %v4965_v37 = vpop.f32.mrb[72].mxu1  ;;  %v4357_v41 = vmul.f32 %v4352_v25, %v4352_v25 }
0x1878   :  { %v4966_v0 = vpop.f32.mrb[73].mxu1 }
0x1879   :  { %v4967_v40 = vadd.f32 %v4966_v0, %v4965_v37  ;;  %4362 = vadd.xlane.f32.xlu0 %v4357_v41  ;;  %v4968_v9 = vpop.f32.mrb[74].mxu1 }
0x187a   :  { %v4969_v10 = vpop.f32.mrb[75].mxu1 }
0x187b   :  { %v4353_v12 = vadd.f32 %v4967_v40, %v7352_v15  ;;  %v4970_v56 = vadd.f32 %v4969_v10, %v4968_v9 }
0x187d   :  { %v4354_v31 = vadd.f32 %v4970_v56, %v7360_v27  ;;  %v4358_v58 = vmul.f32 %v4353_v12, %v4353_v12 }
0x187f   :  { %4364 = vadd.xlane.f32.xlu1 %v4358_v58  ;;  %v4359_v24 = vmul.f32 %v4354_v31, %v4354_v31 }
0x1881   :  { %4366 = vadd.xlane.f32.xlu0 %v4359_v24 }
0x1904   :  { %v4361_v63 = vpop.xlane.xlu1 %4360 }
0x1905   :  { %v4368_v46 = vmul.f32 0.0078125, %v4361_v63 }
0x1906   :  { %v4363_v1 = vpop.xlane.xlu0 %4362 }
0x1907   :  { %v4372_v47 = vadd.f32 1e-05, %v4368_v46  ;;  %v4369_v26 = vmul.f32 0.0078125, %v4363_v1 }
0x1909   :  { %5766 = vrsqrt.f32 %v4372_v47  ;;  %v4373_v38 = vadd.f32 1e-05, %v4369_v26 }
0x190b   :  { %5768 = vrsqrt.f32 %v4373_v38 }
0x190c   :  { %v4365_v61 = vpop.xlane.xlu1 %4364 }
0x190d   :  { %v4370_v23 = vmul.f32 0.0078125, %v4365_v61 }
0x190e   :  { %v4367_v4 = vpop.xlane.xlu0 %4366 }
0x190f   :  { %v4374_v51 = vadd.f32 1e-05, %v4370_v23  ;;  %v4371_v15 = vmul.f32 0.0078125, %v4367_v4 }
0x1911   :  { %5770 = vrsqrt.f32 %v4374_v51  ;;  %v4375_v22 = vadd.f32 1e-05, %v4371_v15 }
0x1913   :  { %v5767_v27 = vpop.eup %5766  ;;  %5772 = vrsqrt.f32 %v4375_v22 }
0x1914   :  { %v4380_v6 = vmul.f32 %v5767_v27, %v4351_v44 }
0x1915   :  { %v5769_v8 = vpop.eup %5768 }
0x1916   :  { %v4390_v17 = vmul.f32 %v4790_v49, %v4380_v6  ;;  %v4381_v32 = vmul.f32 %v5769_v8, %v4352_v25 }
0x1918   :  { %4394 = vst [vmem:[#allocation2] sm:$0xff] %v4390_v17  ;;  %v4391_v62 = vmul.f32 %v4790_v49, %v4381_v32 }
0x191a   :  { %4395 = vst [vmem:[#allocation2 + $0x8] sm:$0xff] %v4391_v62 }
0x191b   :  { %v5771_v14 = vpop.eup %5770 }
0x191c   :  { %v4382_v39 = vmul.f32 %v5771_v14, %v4353_v12 }
0x191d   :  { %v5773_v21 = vpop.eup %5772 }
0x191e   :  { %v4392_v30 = vmul.f32 %v4790_v49, %v4382_v39  ;;  %v4383_v2 = vmul.f32 %v5773_v21, %v4354_v31 }
0x1920   :  { %4396 = vst [vmem:[#allocation2 + $0x10] sm:$0xff] %v4392_v30  ;;  %v4393_v7 = vmul.f32 %v4790_v49, %v4383_v2 }
0x1922   :  { %4397 = vst [vmem:[#allocation2 + $0x18] sm:$0xff] %v4393_v7 }
0x1923   :  { %5833 = shalt.err (!%p5830_p4)
}
0x1924   :  { %s5834_s26 = scalar_lea.hbm %s7527_s23, 512 }
0x1925   :  { %p5835_p5 = scmp.ne.s32.totalorder %s7527_s23, %s5834_s26  ;;  %p5838_p6 = scmp.lt.u32.totalorder %s5834_s26, %s7527_s23 }
0x1927   :  { %p5840_p7 = pnand %p5838_p6, %p5835_p5 }
0x1929   :  { %5843 = shalt.err (!%p5840_p7)
}
0x192a   :  { %s5849_s15 = smov 128   ;;  %s5850_s9 = smov 8  }
0x192b   :  { %4409 = dma.vmem_to_hbm [thread:$0]  %s4404_s25, 512, %s7527_s23, [#allocation3], %s5849_s15, %s5849_s15, %s5850_s9  }
0x192c   :  { %5844 = dma.done.wait [#allocation3], 512  }
0x192d   :  { %5845 = vsyncadd [#allocation3], 4294966784 }
0x192e   :  { %4413 = vsyncpa [#allocation3], 1 }

</bundles_post_ra>
